<compile_context>
chip_gen: v5e
topology: v5e:2x2
jax: 0.10.0
libtpu: 0.0.40
codegen_flags: <defaults>
</compile_context>

<pallas_src>
import functools

import jax
import jax.numpy as jnp
from jax.experimental import pallas as pl
from jax.experimental.pallas import tpu as pltpu


def _gat_fused_kernel(x_ref, adj_ref, w1_ref, w2_ref, att_ref, bias_ref,
                      out_ref, *, negative_slope):
    # Edge multiplicities (f32) and edge mask, shared by both layers.
    counts = adj_ref[...].astype(jnp.float32)          # [N, N], rows=dst, cols=src
    mask = counts > 0.0
    neg_big = jnp.float32(-1e30)

    att = att_ref[...]                                  # [F, 4] bf16
    bias = bias_ref[...]                                # [2, F] f32

    def layer(x_bf16, w_ref, att_cols, bias_row, apply_relu):
        # h = x @ W on the MXU (bf16 in, f32 accumulate).
        h = jnp.dot(x_bf16, w_ref[...], preferred_element_type=jnp.float32)   # [N, F]
        h_bf = h.astype(jnp.bfloat16)

        # Both attention logits from one tiny MXU matmul: [N, 2] f32.
        logits = jnp.dot(h_bf, att_cols, preferred_element_type=jnp.float32)
        a_dst = logits[:, 0:1]                           # [N, 1]
        a_src = logits[:, 1:2]                           # [N, 1]

        # e[i, j] = leaky_relu(a_dst[i] + a_src[j])   (rows = dst, cols = src)
        e = a_dst + jnp.transpose(a_src)                 # [N, N] f32
        e = jnp.where(e >= 0.0, e, negative_slope * e)

        # Masked softmax over incoming edges; counts carry parallel-edge
        # multiplicity so the result matches PyG's scatter softmax exactly.
        e = jnp.where(mask, e, neg_big)
        e = e - jnp.max(e, axis=-1, keepdims=True)
        p = jnp.exp(e) * counts
        denom = jnp.sum(p, axis=-1, keepdims=True)       # >= 1 term (self loop)
        attn = p * pl.reciprocal(denom, approx=True)     # [N, N] f32

        # Aggregate messages on the MXU (bf16 operands, f32 accumulate) + bias.
        out = jnp.dot(attn.astype(jnp.bfloat16), h_bf,
                      preferred_element_type=jnp.float32) + bias_row
        if apply_relu:
            out = jnp.maximum(out, 0.0)
        return out

    h1 = layer(x_ref[...], w1_ref, att[:, 0:2], bias[0:1, :], True)   # conv1 + relu
    out = layer(h1.astype(jnp.bfloat16), w2_ref, att[:, 2:4], bias[1:2, :], False)
    out_ref[...] = out


def gat_forward_fused(x, adj, params1, params2, *, negative_slope=0.2):
    """Fused GAT.forward: conv1 -> relu -> conv2 in one pallas_call."""
    w1, att1_src, att1_dst, b1 = params1
    w2, att2_src, att2_dst, b2 = params2
    n, f_in = x.shape
    f_out = w1.shape[1]

    # Pack the small per-layer parameters: att columns are
    # [dst1, src1, dst2, src2]; bias rows are [bias1, bias2].
    att_packed = jnp.concatenate(
        [att1_dst.reshape(f_out, 1), att1_src.reshape(f_out, 1),
         att2_dst.reshape(f_out, 1), att2_src.reshape(f_out, 1)],
        axis=1).astype(jnp.bfloat16)                     # [F, 4]
    bias_packed = jnp.concatenate(
        [b1.reshape(1, f_out), b2.reshape(1, f_out)], axis=0
    ).astype(jnp.float32)                                # [2, F]

    # bf16 at the call boundary for the memory/MXU-heavy operands.
    x_bf = x.astype(jnp.bfloat16)
    adj_bf = adj.astype(jnp.bfloat16)                    # small-int counts: exact in bf16
    w1_bf = w1.astype(jnp.bfloat16)
    w2_bf = w2.astype(jnp.bfloat16)

    kernel = functools.partial(_gat_fused_kernel, negative_slope=negative_slope)
    vmem = pl.BlockSpec(memory_space=pltpu.MemorySpace.VMEM)

    flops = 2 * (2 * n * f_in * f_out        # x @ W
                 + 2 * n * f_out * 2         # logits
                 + 2 * n * n * f_out)        # attn @ h
    transcendentals = 2 * (n * n + n)        # exp + reciprocal per layer
    bytes_accessed = (n * f_in * 2 + n * n * 2 + 2 * f_in * f_out * 2
                      + f_out * 4 * 2 + 2 * f_out * 4 + n * f_out * 4)

    return pl.pallas_call(
        kernel,
        out_shape=jax.ShapeDtypeStruct((n, f_out), jnp.float32),
        in_specs=[vmem, vmem, vmem, vmem, vmem, vmem],
        out_specs=vmem,
        cost_estimate=pl.CostEstimate(
            flops=flops, transcendentals=transcendentals,
            bytes_accessed=bytes_accessed),
    )(x_bf, adj_bf, w1_bf, w2_bf, att_packed, bias_packed)


def init_gatconv_params(key, f_in, f_out):
    """Deterministic glorot-style init, matching PyG GATConv shapes (heads=1)."""
    k_w, k_as, k_ad = jax.random.split(key, 3)
    s_w = (6.0 / (f_in + f_out)) ** 0.5
    w = jax.random.uniform(k_w, (f_in, f_out), jnp.float32, -s_w, s_w)
    s_a = (6.0 / (1 + f_out)) ** 0.5
    att_src = jax.random.uniform(k_as, (1, f_out), jnp.float32, -s_a, s_a)
    att_dst = jax.random.uniform(k_ad, (1, f_out), jnp.float32, -s_a, s_a)
    bias = jnp.zeros((1, f_out), jnp.float32)
    return w, att_src, att_dst, bias


def build_dense_adj(edge_index, num_nodes):
    """adj[dst, src] = multiplicity of edge (src -> dst); diagonal forced to 1.

    Parallel edges are kept as counts (matches PyG scatter softmax on
    multigraphs); the diagonal set(1.0) reproduces remove_self_loops +
    add_self_loops of GATConv.
    """
    src, dst = edge_index[0], edge_index[1]
    adj = jnp.zeros((num_nodes, num_nodes), jnp.float32)
    adj = adj.at[dst, src].add(1.0)
    diag = jnp.arange(num_nodes)
    adj = adj.at[diag, diag].set(1.0)
    return adj


def gat_forward(x, edge_index, params1, params2):
    """GAT.forward: conv1 -> relu -> conv2 (single fused Pallas kernel)."""
    n = x.shape[0]
    adj = build_dense_adj(edge_index, n)
    return gat_forward_fused(x, adj, params1, params2)


if __name__ == "__main__":
    key = jax.random.PRNGKey(0)
    k_x, k_src, k_dst, k_p1, k_p2 = jax.random.split(key, 5)

    N, F, E = 32, 768, 96   # F fixed at 768 by the module definition
    x = jax.random.normal(k_x, (N, F), jnp.float32)
    src = jax.random.randint(k_src, (E,), 0, N)
    dst = jax.random.randint(k_dst, (E,), 0, N)
    edge_index = jnp.stack([src, dst]).astype(jnp.int32)   # [2, E], PyG convention

    params1 = init_gatconv_params(k_p1, F, F)
    params2 = init_gatconv_params(k_p2, F, F)

    out = gat_forward(x, edge_index, params1, params2)
    jax.block_until_ready(out)
    assert out.shape == (N, F) and out.dtype == jnp.float32
    assert bool(jnp.all(jnp.isfinite(out)))
    print("KERNEL_OK")
</pallas_src>

<mosaic_0001>
module attributes {stable_mosaic.version = 11 : i64} {
  func.func @_gat_fused_kernel(%arg0: memref<32x768xbf16, #tpu.memory_space<vmem>>, %arg1: memref<32x32xbf16, #tpu.memory_space<vmem>>, %arg2: memref<768x768xbf16, #tpu.memory_space<vmem>>, %arg3: memref<768x768xbf16, #tpu.memory_space<vmem>>, %arg4: memref<768x4xbf16, #tpu.memory_space<vmem>>, %arg5: memref<2x768xf32, #tpu.memory_space<vmem>>, %arg6: memref<32x768xf32, #tpu.memory_space<vmem>>) attributes {dimension_semantics = [], scalar_prefetch = 0 : i64, scratch_operands = 0 : i64, tpu.core_type = #tpu.core_type<tc>} {
    %c0 = arith.constant 0 : index
    %c0_0 = arith.constant 0 : index
    %0 = vector.load %arg1[%c0, %c0_0] : memref<32x32xbf16, #tpu.memory_space<vmem>>, vector<32x32xbf16>
    %1 = arith.extf %0 : vector<32x32xbf16> to vector<32x32xf32>
    %cst = arith.constant 0.000000e+00 : f32
    %2 = vector.broadcast %cst : f32 to vector<32x32xf32>
    %3 = arith.cmpf ogt, %1, %2 : vector<32x32xf32>
    %c0_1 = arith.constant 0 : index
    %c0_2 = arith.constant 0 : index
    %4 = vector.load %arg4[%c0_1, %c0_2] : memref<768x4xbf16, #tpu.memory_space<vmem>>, vector<768x4xbf16>
    %c0_3 = arith.constant 0 : index
    %c0_4 = arith.constant 0 : index
    %5 = vector.load %arg5[%c0_3, %c0_4] : memref<2x768xf32, #tpu.memory_space<vmem>>, vector<2x768xf32>
    %c0_5 = arith.constant 0 : index
    %c0_6 = arith.constant 0 : index
    %6 = vector.load %arg0[%c0_5, %c0_6] : memref<32x768xbf16, #tpu.memory_space<vmem>>, vector<32x768xbf16>
    %7 = vector.extract_strided_slice %4 {offsets = [0, 0], sizes = [768, 2], strides = [1, 1]} : vector<768x4xbf16> to vector<768x2xbf16>
    %8 = vector.extract_strided_slice %5 {offsets = [0, 0], sizes = [1, 768], strides = [1, 1]} : vector<2x768xf32> to vector<1x768xf32>
    %c0_7 = arith.constant 0 : index
    %c0_8 = arith.constant 0 : index
    %9 = vector.load %arg2[%c0_7, %c0_8] : memref<768x768xbf16, #tpu.memory_space<vmem>>, vector<768x768xbf16>
    %cst_9 = arith.constant dense<0.000000e+00> : vector<32x768xf32>
    %10 = tpu.matmul %6, %9, %cst_9 {dimension_numbers = #tpu.dot_dimension_numbers<[1], [0], [0], [1], [0, 0, 1, 1], [], []>} : vector<32x768xbf16>, vector<768x768xbf16>, vector<32x768xf32> -> vector<32x768xf32>
    %11 = arith.truncf %10 : vector<32x768xf32> to vector<32x768xbf16>
    %cst_10 = arith.constant dense<0.000000e+00> : vector<32x2xf32>
    %12 = tpu.matmul %11, %7, %cst_10 {dimension_numbers = #tpu.dot_dimension_numbers<[1], [0], [0], [1], [0, 0, 1, 1], [], []>} : vector<32x768xbf16>, vector<768x2xbf16>, vector<32x2xf32> -> vector<32x2xf32>
    %13 = vector.extract_strided_slice %12 {offsets = [0, 0], sizes = [32, 1], strides = [1, 1]} : vector<32x2xf32> to vector<32x1xf32>
    %14 = vector.extract_strided_slice %12 {offsets = [0, 1], sizes = [32, 1], strides = [1, 1]} : vector<32x2xf32> to vector<32x1xf32>
    %15 = tpu.transpose %14, [1, 0] : vector<32x1xf32> -> vector<1x32xf32>
    %16 = vector.broadcast %13 : vector<32x1xf32> to vector<32x32xf32>
    %17 = vector.broadcast %15 : vector<1x32xf32> to vector<32x32xf32>
    %18 = arith.addf %16, %17 : vector<32x32xf32>
    %cst_11 = arith.constant 0.000000e+00 : f32
    %19 = vector.broadcast %cst_11 : f32 to vector<32x32xf32>
    %20 = arith.cmpf oge, %18, %19 : vector<32x32xf32>
    %cst_12 = arith.constant 2.000000e-01 : f32
    %21 = vector.broadcast %cst_12 : f32 to vector<32x32xf32>
    %22 = arith.mulf %21, %18 : vector<32x32xf32>
    %23 = arith.select %20, %18, %22 : vector<32x32xi1>, vector<32x32xf32>
    %cst_13 = arith.constant -1.000000e+30 : f32
    %24 = vector.broadcast %cst_13 : f32 to vector<32x32xf32>
    %25 = arith.select %3, %23, %24 : vector<32x32xi1>, vector<32x32xf32>
    %cst_14 = arith.constant dense<0xFF800000> : vector<32xf32>
    %26 = vector.multi_reduction <maximumf>, %25, %cst_14 [1] : vector<32x32xf32> to vector<32xf32>
    %27 = vector.shape_cast %26 : vector<32xf32> to vector<32x1xf32>
    %28 = vector.broadcast %27 : vector<32x1xf32> to vector<32x32xf32>
    %29 = arith.subf %25, %28 : vector<32x32xf32>
    %30 = math.exp %29 : vector<32x32xf32>
    %31 = arith.mulf %30, %1 : vector<32x32xf32>
    %cst_15 = arith.constant dense<0.000000e+00> : vector<32xf32>
    %32 = vector.multi_reduction <add>, %31, %cst_15 [1] : vector<32x32xf32> to vector<32xf32>
    %33 = vector.shape_cast %32 : vector<32xf32> to vector<32x1xf32>
    %34 = tpu.reciprocal %33 {approx = true} : vector<32x1xf32> -> vector<32x1xf32>
    %35 = vector.broadcast %34 : vector<32x1xf32> to vector<32x32xf32>
    %36 = arith.mulf %31, %35 : vector<32x32xf32>
    %37 = arith.truncf %36 : vector<32x32xf32> to vector<32x32xbf16>
    %cst_16 = arith.constant dense<0.000000e+00> : vector<32x768xf32>
    %38 = tpu.matmul %37, %11, %cst_16 {dimension_numbers = #tpu.dot_dimension_numbers<[1], [0], [0], [1], [0, 0, 1, 1], [], []>} : vector<32x32xbf16>, vector<32x768xbf16>, vector<32x768xf32> -> vector<32x768xf32>
    %39 = vector.broadcast %8 : vector<1x768xf32> to vector<32x768xf32>
    %40 = arith.addf %38, %39 : vector<32x768xf32>
    %cst_17 = arith.constant 0.000000e+00 : f32
    %41 = vector.broadcast %cst_17 : f32 to vector<32x768xf32>
    %42 = arith.maximumf %40, %41 : vector<32x768xf32>
    %43 = arith.truncf %42 : vector<32x768xf32> to vector<32x768xbf16>
    %44 = vector.extract_strided_slice %4 {offsets = [0, 2], sizes = [768, 2], strides = [1, 1]} : vector<768x4xbf16> to vector<768x2xbf16>
    %45 = vector.extract_strided_slice %5 {offsets = [1, 0], sizes = [1, 768], strides = [1, 1]} : vector<2x768xf32> to vector<1x768xf32>
    %c0_18 = arith.constant 0 : index
    %c0_19 = arith.constant 0 : index
    %46 = vector.load %arg3[%c0_18, %c0_19] : memref<768x768xbf16, #tpu.memory_space<vmem>>, vector<768x768xbf16>
    %cst_20 = arith.constant dense<0.000000e+00> : vector<32x768xf32>
    %47 = tpu.matmul %43, %46, %cst_20 {dimension_numbers = #tpu.dot_dimension_numbers<[1], [0], [0], [1], [0, 0, 1, 1], [], []>} : vector<32x768xbf16>, vector<768x768xbf16>, vector<32x768xf32> -> vector<32x768xf32>
    %48 = arith.truncf %47 : vector<32x768xf32> to vector<32x768xbf16>
    %cst_21 = arith.constant dense<0.000000e+00> : vector<32x2xf32>
    %49 = tpu.matmul %48, %44, %cst_21 {dimension_numbers = #tpu.dot_dimension_numbers<[1], [0], [0], [1], [0, 0, 1, 1], [], []>} : vector<32x768xbf16>, vector<768x2xbf16>, vector<32x2xf32> -> vector<32x2xf32>
    %50 = vector.extract_strided_slice %49 {offsets = [0, 0], sizes = [32, 1], strides = [1, 1]} : vector<32x2xf32> to vector<32x1xf32>
    %51 = vector.extract_strided_slice %49 {offsets = [0, 1], sizes = [32, 1], strides = [1, 1]} : vector<32x2xf32> to vector<32x1xf32>
    %52 = tpu.transpose %51, [1, 0] : vector<32x1xf32> -> vector<1x32xf32>
    %53 = vector.broadcast %50 : vector<32x1xf32> to vector<32x32xf32>
    %54 = vector.broadcast %52 : vector<1x32xf32> to vector<32x32xf32>
    %55 = arith.addf %53, %54 : vector<32x32xf32>
    %cst_22 = arith.constant 0.000000e+00 : f32
    %56 = vector.broadcast %cst_22 : f32 to vector<32x32xf32>
    %57 = arith.cmpf oge, %55, %56 : vector<32x32xf32>
    %cst_23 = arith.constant 2.000000e-01 : f32
    %58 = vector.broadcast %cst_23 : f32 to vector<32x32xf32>
    %59 = arith.mulf %58, %55 : vector<32x32xf32>
    %60 = arith.select %57, %55, %59 : vector<32x32xi1>, vector<32x32xf32>
    %cst_24 = arith.constant -1.000000e+30 : f32
    %61 = vector.broadcast %cst_24 : f32 to vector<32x32xf32>
    %62 = arith.select %3, %60, %61 : vector<32x32xi1>, vector<32x32xf32>
    %cst_25 = arith.constant dense<0xFF800000> : vector<32xf32>
    %63 = vector.multi_reduction <maximumf>, %62, %cst_25 [1] : vector<32x32xf32> to vector<32xf32>
    %64 = vector.shape_cast %63 : vector<32xf32> to vector<32x1xf32>
    %65 = vector.broadcast %64 : vector<32x1xf32> to vector<32x32xf32>
    %66 = arith.subf %62, %65 : vector<32x32xf32>
    %67 = math.exp %66 : vector<32x32xf32>
    %68 = arith.mulf %67, %1 : vector<32x32xf32>
    %cst_26 = arith.constant dense<0.000000e+00> : vector<32xf32>
    %69 = vector.multi_reduction <add>, %68, %cst_26 [1] : vector<32x32xf32> to vector<32xf32>
    %70 = vector.shape_cast %69 : vector<32xf32> to vector<32x1xf32>
    %71 = tpu.reciprocal %70 {approx = true} : vector<32x1xf32> -> vector<32x1xf32>
    %72 = vector.broadcast %71 : vector<32x1xf32> to vector<32x32xf32>
    %73 = arith.mulf %68, %72 : vector<32x32xf32>
    %74 = arith.truncf %73 : vector<32x32xf32> to vector<32x32xbf16>
    %cst_27 = arith.constant dense<0.000000e+00> : vector<32x768xf32>
    %75 = tpu.matmul %74, %48, %cst_27 {dimension_numbers = #tpu.dot_dimension_numbers<[1], [0], [0], [1], [0, 0, 1, 1], [], []>} : vector<32x32xbf16>, vector<32x768xbf16>, vector<32x768xf32> -> vector<32x768xf32>
    %76 = vector.broadcast %45 : vector<1x768xf32> to vector<32x768xf32>
    %77 = arith.addf %75, %76 : vector<32x768xf32>
    %c0_28 = arith.constant 0 : index
    %c0_29 = arith.constant 0 : index
    %78 = vector.load %arg6[%c0_28, %c0_29] : memref<32x768xf32, #tpu.memory_space<vmem>>, vector<32x768xf32>
    tpu.vector_store %arg6[%c0_28, %c0_29], %77 {strides = array<i32>} : memref<32x768xf32, #tpu.memory_space<vmem>>, vector<32x768xf32>,
    return
  }
}

</mosaic_0001>

<bundles_post_ra>
// kernel: tpu_custom_call.1
= control target key start
LH: loop header
LB: loop body
LE: loop exit
PB: predicated region body
PF: predicated region fallthrough
CT: control target
= control target key end

     0   :  { %11 = vsyncpa [#allocation3], 0  ;;  %s10999_s0 = inlined_call_operand.hbm [shape: bf16[32,768], index: 0, kind: input, shape index: {}]   ;;  %s11000_s1 = inlined_call_operand.hbm [shape: bf16[32,32], index: 1, kind: input, shape index: {}]   ;;  %s11001_s2 = inlined_call_operand.hbm [shape: bf16[768,768], index: 2, kind: input, shape index: {}]   ;;  %s11002_s3 = inlined_call_operand.hbm [shape: bf16[768,768], index: 3, kind: input, shape index: {}]   ;;  %s11003_s4 = inlined_call_operand.vmem [shape: bf16[768,4], index: 4, kind: input, shape index: {}]   ;;  %s11004_s5 = inlined_call_operand.hbm [shape: f32[2,768], index: 5, kind: input, shape index: {}]   ;;  %s11005_s6 = inlined_call_operand.hbm [shape: f32[32,768], index: 6, kind: output, shape index: {}]  }
   0x1   :  { %12 = vsyncpa [#allocation6], 0 }
   0x2   :  { %13 = vsyncpa [#allocation9], 0  ;;  %s32_s23 = sshll.u32 %s11000_s1, 4  ;;  %s33_s23 = int_to_ptr.hbm [resolvable:$true] %s32_s23 }
   0x3   :  { %14 = vsyncpa [#allocation4], 0  ;;  %s9869_s24 = smov [#allocation5]   ;;  %s9870_s26 = smov 64  }
   0x4   :  { %s34_s25 = sshll.u32 %s9869_s24, 4  ;;  %s9871_s27 = smov 4   ;;  %s35_s25 = int_to_ptr.vmem [resolvable:$true] %s34_s25 }
   0x5   :  { %40 = dma.hbm_to_vmem [thread:$0]  %s33_s23, 256, %s35_s25, [#allocation6], %s9870_s26, %s9870_s26, %s9871_s27  }
   0x6   :  { %s58_s30 = sshll.u32 %s11002_s3, 4  ;;  %s9872_s7 = smov [#allocation8]   ;;  %s59_s30 = int_to_ptr.hbm [resolvable:$true] %s58_s30 }
   0x7   :  { %s60_s8 = sshll.u32 %s9872_s7, 4  ;;  %s19_s11 = sshll.u32 %s10999_s0, 4  ;;  %s61_s8 = int_to_ptr.vmem [resolvable:$true] %s60_s8  ;;  %s20_s11 = int_to_ptr.hbm [resolvable:$true] %s19_s11 }
   0x8   :  { %s9873_s1 = smov 384   ;;  %s9874_s12 = smov 24  }
   0x9   :  { %66 = dma.hbm_to_vmem [thread:$0]  %s59_s30, 36864, %s61_s8, [#allocation9], %s9873_s1, %s9873_s1, %s9874_s12  }
   0xa   :  { %s45_s15 = sshll.u32 %s11001_s2, 4  ;;  %s9875_s16 = smov [#allocation2]   ;;  %s46_s15 = int_to_ptr.hbm [resolvable:$true] %s45_s15 }
   0xb   :  { %s21_s17 = sshll.u32 %s9875_s16, 4  ;;  %s9876_s3 = smov [#allocation7]   ;;  %s22_s17 = int_to_ptr.vmem [resolvable:$true] %s21_s17 }
   0xc   :  { %27 = dma.hbm_to_vmem [thread:$0]  %s20_s11, 1536, %s22_s17, [#allocation3], %s9873_s1, %s9873_s1, %s9874_s12  }
   0xd   :  { %s47_s18 = sshll.u32 %s9876_s3, 4  ;;  %s74_s0 = sshll.u32 %s11004_s5, 4  ;;  %s48_s18 = int_to_ptr.vmem [resolvable:$true] %s47_s18  ;;  %s75_s0 = int_to_ptr.hbm [resolvable:$true] %s74_s0 }
   0xe   :  { %53 = dma.hbm_to_vmem [thread:$0]  %s46_s15, 36864, %s48_s18, [#allocation6], %s9873_s1, %s9873_s1, %s9874_s12  }
   0xf   :  { %s9877_s21 = smov [#allocation10]  }
  0x10   :  { %s76_s22 = sshll.u32 %s9877_s21, 4  ;;  %s77_s22 = int_to_ptr.vmem [resolvable:$true] %s76_s22 }
  0x11   :  { %79 = dma.hbm_to_vmem [thread:$0]  %s75_s0, 192, %s77_s22, [#allocation9]  }
  0x12   :  { %9861 = dma.done.wait [#allocation3], 1536  }
  0x13   :  { %9862 = vsyncadd [#allocation3], 4294965760 }
  0x14   :  { %9863 = dma.done.wait [#allocation6], 37120  }
  0x15   :  { %9864 = vsyncadd [#allocation6], 4294930176 }
  0x16   :  { %9865 = dma.done.wait [#allocation9], 37056  }
  0x17   :  { %9866 = vsyncadd [#allocation9], 4294930240  ;;  %v6639_v0 = vld [vmem:[#allocation7 + $0x150] sm:$0xf]  ;;  %v9094_v1 = vld [vmem:[#allocation7 + $0x164] sm:$0xf0] }
  0x18   :  { %v6831_v2 = vld [vmem:[#allocation7 + $0x2d0] sm:$0xf]  ;;  %v6640_v3 = vor.u32 %v9094_v1, %v6639_v0  ;;  %v9142_v4 = vld [vmem:[#allocation7 + $0x2e4] sm:$0xf0]  ;;  %v6615_v11 = vld [vmem:[#allocation7 + $0x120] sm:$0xf] }
  0x19   :  { %v7023_v5 = vld [vmem:[#allocation7 + $0x450] sm:$0xf]  ;;  %v9190_v6 = vld [vmem:[#allocation7 + $0x464] sm:$0xf0]  ;;  %v6832_v7 = vor.u32 %v9142_v4, %v6831_v2  ;;  %v9088_v13 = vld [vmem:[#allocation7 + $0x134] sm:$0xf0] }
  0x1a   :  { %v7024_v8 = vor.u32 %v9190_v6, %v7023_v5  ;;  %v7215_v9 = vld [vmem:[#allocation7 + $0x5d0] sm:$0xf]  ;;  %v9238_v10 = vld [vmem:[#allocation7 + $0x5e4] sm:$0xf0]  ;;  %2011 = vmatpush.bf16.msra.mxu0 %v6640_v3  ;;  %v6807_v14 = vld [vmem:[#allocation7 + $0x2a0] sm:$0xf]  ;;  %v6616_v16 = vor.u32 %v9088_v13, %v6615_v11 }
  0x1b   :  { %v7216_v12 = vor.u32 %v9238_v10, %v7215_v9  ;;  %v9136_v15 = vld [vmem:[#allocation7 + $0x2b4] sm:$0xf0]  ;;  %2030 = vmatpush.bf16.msra.mxu1 %v6832_v7  ;;  %v6999_v18 = vld [vmem:[#allocation7 + $0x420] sm:$0xf]  ;;  %v6591_v23 = vld [vmem:[#allocation7 + $0xf0] sm:$0xf] }
  0x1c   :  { %2049 = vmatpush.bf16.msra.mxu2 %v7024_v8  ;;  %v6808_v17 = vor.u32 %v9136_v15, %v6807_v14  ;;  %v9184_v19 = vld [vmem:[#allocation7 + $0x434] sm:$0xf0]  ;;  %v7191_v20 = vld [vmem:[#allocation7 + $0x5a0] sm:$0xf]  ;;  %v9082_v24 = vld [vmem:[#allocation7 + $0x104] sm:$0xf0] }
  0x1d   :  { %2068 = vmatpush.bf16.msra.mxu3 %v7216_v12  ;;  %v7000_v21 = vor.u32 %v9184_v19, %v6999_v18  ;;  %v9232_v22 = vld [vmem:[#allocation7 + $0x5b4] sm:$0xf0]  ;;  %v6783_v26 = vld [vmem:[#allocation7 + $0x270] sm:$0xf]  ;;  %v9130_v27 = vld [vmem:[#allocation7 + $0x284] sm:$0xf0]  ;;  %v6592_v29 = vor.u32 %v9082_v24, %v6591_v23 }
  0x1e   :  { %v7192_v25 = vor.u32 %v9232_v22, %v7191_v20  ;;  %v6975_v28 = vld [vmem:[#allocation7 + $0x3f0] sm:$0xf]  ;;  %2012 = vmatpush.bf16.msra.mxu0 %v6616_v16  ;;  %v9178_v30 = vld [vmem:[#allocation7 + $0x404] sm:$0xf0]  ;;  %v6784_v33 = vor.u32 %v9130_v27, %v6783_v26  ;;  %v6567_v35 = vld [vmem:[#allocation7 + $0xc0] sm:$0xf] }
  0x1f   :  { %v7167_v31 = vld [vmem:[#allocation7 + $0x570] sm:$0xf]  ;;  %v9226_v32 = vld [vmem:[#allocation7 + $0x584] sm:$0xf0]  ;;  %2031 = vmatpush.bf16.msra.mxu1 %v6808_v17  ;;  %v6976_v34 = vor.u32 %v9178_v30, %v6975_v28  ;;  %v9076_v36 = vld [vmem:[#allocation7 + $0xd4] sm:$0xf0] }
  0x20   :  { %2050 = vmatpush.bf16.msra.mxu2 %v7000_v21  ;;  %v6759_v37 = vld [vmem:[#allocation7 + $0x240] sm:$0xf]  ;;  %v7168_v38 = vor.u32 %v9226_v32, %v7167_v31  ;;  %v9124_v39 = vld [vmem:[#allocation7 + $0x254] sm:$0xf0]  ;;  %v6568_v44 = vor.u32 %v9076_v36, %v6567_v35  ;;  %v6543_v47 = vld [vmem:[#allocation7 + $0x90] sm:$0xf] }
  0x21   :  { %2069 = vmatpush.bf16.msra.mxu3 %v7192_v25  ;;  %v6951_v40 = vld [vmem:[#allocation7 + $0x3c0] sm:$0xf]  ;;  %v9172_v41 = vld [vmem:[#allocation7 + $0x3d4] sm:$0xf0]  ;;  %v6760_v45 = vor.u32 %v9124_v39, %v6759_v37  ;;  %v9070_v48 = vld [vmem:[#allocation7 + $0xa4] sm:$0xf0] }
  0x22   :  { %v7143_v42 = vld [vmem:[#allocation7 + $0x540] sm:$0xf]  ;;  %v9220_v43 = vld [vmem:[#allocation7 + $0x554] sm:$0xf0]  ;;  %2013 = vmatpush.bf16.msra.mxu0 %v6592_v29  ;;  %v6952_v46 = vor.u32 %v9172_v41, %v6951_v40  ;;  %v6735_v49 = vld [vmem:[#allocation7 + $0x210] sm:$0xf]  ;;  %v6544_v56 = vor.u32 %v9070_v48, %v6543_v47 }
  0x23   :  { %2032 = vmatpush.bf16.msra.mxu1 %v6784_v33  ;;  %v7144_v50 = vor.u32 %v9220_v43, %v7143_v42  ;;  %v9118_v51 = vld [vmem:[#allocation7 + $0x224] sm:$0xf0]  ;;  %v6927_v52 = vld [vmem:[#allocation7 + $0x390] sm:$0xf]  ;;  %v6519_v59 = vld [vmem:[#allocation7 + $0x60] sm:$0xf] }
  0x24   :  { %2051 = vmatpush.bf16.msra.mxu2 %v6976_v34  ;;  %v9166_v53 = vld [vmem:[#allocation7 + $0x3a4] sm:$0xf0]  ;;  %v7119_v54 = vld [vmem:[#allocation7 + $0x510] sm:$0xf]  ;;  %v6736_v57 = vor.u32 %v9118_v51, %v6735_v49  ;;  %v9064_v60 = vld [vmem:[#allocation7 + $0x74] sm:$0xf0] }
  0x25   :  { %2070 = vmatpush.bf16.msra.mxu3 %v7168_v38  ;;  %v9214_v55 = vld [vmem:[#allocation7 + $0x524] sm:$0xf0]  ;;  %v6928_v58 = vor.u32 %v9166_v53, %v6927_v52  ;;  %v6711_v61 = vld [vmem:[#allocation7 + $0x1e0] sm:$0xf]  ;;  %v9112_v63 = vld [vmem:[#allocation7 + $0x1f4] sm:$0xf0]  ;;  %v6520_v4 = vor.u32 %v9064_v60, %v6519_v59 }
  0x26   :  { %2014 = vmatpush.bf16.msra.mxu0 %v6568_v44  ;;  %v7120_v62 = vor.u32 %v9214_v55, %v7119_v54  ;;  %v6903_v0 = vld [vmem:[#allocation7 + $0x360] sm:$0xf]  ;;  %v9160_v1 = vld [vmem:[#allocation7 + $0x374] sm:$0xf0]  ;;  %v6495_v5 = vld [vmem:[#allocation7 + $0x30] sm:$0xf]  ;;  %v6712_v6 = vor.u32 %v9112_v63, %v6711_v61 }
  0x27   :  { %2033 = vmatpush.bf16.msra.mxu1 %v6760_v45  ;;  %v7095_v2 = vld [vmem:[#allocation7 + $0x4e0] sm:$0xf]  ;;  %v9208_v3 = vld [vmem:[#allocation7 + $0x4f4] sm:$0xf0]  ;;  %v6904_v7 = vor.u32 %v9160_v1, %v6903_v0  ;;  %v9058_v8 = vld [vmem:[#allocation7 + $0x44] sm:$0xf0] }
  0x28   :  { %2052 = vmatpush.bf16.msra.mxu2 %v6952_v46  ;;  %v6687_v9 = vld [vmem:[#allocation7 + $0x1b0] sm:$0xf]  ;;  %v9106_v10 = vld [vmem:[#allocation7 + $0x1c4] sm:$0xf0]  ;;  %v7096_v11 = vor.u32 %v9208_v3, %v7095_v2  ;;  %v6471_v16 = vld [vmem:[#allocation7] sm:$0xf]  ;;  %v6496_v18 = vor.u32 %v9058_v8, %v6495_v5 }
  0x29   :  { %2071 = vmatpush.bf16.msra.mxu3 %v7144_v50  ;;  %v6879_v12 = vld [vmem:[#allocation7 + $0x330] sm:$0xf]  ;;  %v9154_v13 = vld [vmem:[#allocation7 + $0x344] sm:$0xf0]  ;;  %v9052_v17 = vld [vmem:[#allocation7 + $0x14] sm:$0xf0]  ;;  %v6688_v23 = vor.u32 %v9106_v10, %v6687_v9 }
  0x2a   :  { %2015 = vmatpush.bf16.msra.mxu0 %v6544_v56  ;;  %v7071_v14 = vld [vmem:[#allocation7 + $0x4b0] sm:$0xf]  ;;  %v9202_v15 = vld [vmem:[#allocation7 + $0x4c4] sm:$0xf0]  ;;  %v6663_v19 = vld [vmem:[#allocation7 + $0x180] sm:$0xf]  ;;  %v6880_v24 = vor.u32 %v9154_v13, %v6879_v12  ;;  %v6472_v35 = vor.u32 %v9052_v17, %v6471_v16 }
  0x2b   :  { %2034 = vmatpush.bf16.msra.mxu1 %v6736_v57  ;;  %v9100_v20 = vld [vmem:[#allocation7 + $0x194] sm:$0xf0]  ;;  %v6855_v21 = vld [vmem:[#allocation7 + $0x300] sm:$0xf]  ;;  %v7407_v27 = vld [vmem:[#allocation7 + $0x750] sm:$0xf]  ;;  %v7072_v28 = vor.u32 %v9202_v15, %v7071_v14 }
  0x2c   :  { %2053 = vmatpush.bf16.msra.mxu2 %v6928_v58  ;;  %v9148_v22 = vld [vmem:[#allocation7 + $0x314] sm:$0xf0]  ;;  %v7047_v25 = vld [vmem:[#allocation7 + $0x480] sm:$0xf]  ;;  %v9286_v29 = vld [vmem:[#allocation7 + $0x764] sm:$0xf0]  ;;  %v6664_v39 = vor.u32 %v9100_v20, %v6663_v19 }
  0x2d   :  { %2072 = vmatpush.bf16.msra.mxu3 %v7120_v62  ;;  %v9196_v26 = vld [vmem:[#allocation7 + $0x494] sm:$0xf0]  ;;  %v9091_v30 = vld [vmem:[#allocation7 + $0x154] sm:$0xf]  ;;  %v6641_v31 = vld [vmem:[#allocation7 + $0x168] sm:$0xf0]  ;;  %v6856_v40 = vor.u32 %v9148_v22, %v6855_v21  ;;  %v7408_v45 = vor.u32 %v9286_v29, %v7407_v27 }
  0x2e   :  { %2016 = vmatpush.bf16.msra.mxu0 %v6520_v4  ;;  %v9139_v32 = vld [vmem:[#allocation7 + $0x2d4] sm:$0xf]  ;;  %v6833_v33 = vld [vmem:[#allocation7 + $0x2e8] sm:$0xf0]  ;;  %v6423_v34 = vld [vmem:[#allocation2] sm:$0xf]  ;;  %v7048_v44 = vor.u32 %v9196_v26, %v7047_v25  ;;  %v6644_v49 = vor.u32 %v9091_v30, %v6641_v31 }
  0x2f   :  { %2035 = vmatpush.bf16.msra.mxu1 %v6712_v6  ;;  %v9040_v36 = vld [vmem:[#allocation2 + $0x14] sm:$0xf0]  ;;  %v9037_v37 = vld [vmem:[#allocation2 + $0x4] sm:$0xf]  ;;  %v6425_v38 = vld [vmem:[#allocation2 + $0x18] sm:$0xf0]  ;;  %v6836_v50 = vor.u32 %v9139_v32, %v6833_v33 }
  0x30   :  { %2054 = vmatpush.bf16.msra.mxu2 %v6904_v7  ;;  %v6431_v41 = vld [vmem:[#allocation2 + $0x8] sm:$0xf]  ;;  %v9041_v42 = vld [vmem:[#allocation2 + $0x1c] sm:$0xf0]  ;;  %v9038_v43 = vld [vmem:[#allocation2 + $0xc] sm:$0xf]  ;;  %v9934_v54 = vor.u32 %v9040_v36, %v6423_v34  ;;  %v9936_v55 = vor.u32 %v9037_v37, %v6425_v38 }
  0x31   :  { %2073 = vmatpush.bf16.msra.mxu3 %v7096_v11  ;;  %v6433_v46 = vld [vmem:[#allocation2 + $0x20] sm:$0xf0]  ;;  %v7599_v47 = vld [vmem:[#allocation7 + $0x8d0] sm:$0xf]  ;;  %v9334_v48 = vld [vmem:[#allocation7 + $0x8e4] sm:$0xf0]  ;;  %v9938_v59 = vor.u32 %v9041_v42, %v6431_v41 }
  0x32   :  { %2017 = vmatpush.bf16.msra.mxu0 %v6496_v18  ;;  %v7383_v51 = vld [vmem:[#allocation7 + $0x720] sm:$0xf]  ;;  %v9280_v52 = vld [vmem:[#allocation7 + $0x734] sm:$0xf0]  ;;  %v9085_v53 = vld [vmem:[#allocation7 + $0x124] sm:$0xf]  ;;  %v9940_v60 = vor.u32 %v9038_v43, %v6433_v46  ;;  %v7600_v61 = vor.u32 %v9334_v48, %v7599_v47 }
  0x33   :  { %2036 = vmatpush.bf16.msra.mxu1 %v6688_v23  ;;  %v6617_v56 = vld [vmem:[#allocation7 + $0x138] sm:$0xf0]  ;;  %v9133_v57 = vld [vmem:[#allocation7 + $0x2a4] sm:$0xf]  ;;  %v7384_v62 = vor.u32 %v9280_v52, %v7383_v51  ;;  %v7575_v63 = vld [vmem:[#allocation7 + $0x8a0] sm:$0xf] }
  0x34   :  { %2055 = vmatpush.bf16.msra.mxu2 %v6880_v24  ;;  %v6809_v58 = vld [vmem:[#allocation7 + $0x2b8] sm:$0xf0]  ;;  %v9328_v0 = vld [vmem:[#allocation7 + $0x8b4] sm:$0xf0]  ;;  %v6620_v1 = vor.u32 %v9085_v53, %v6617_v56  ;;  %v7359_v3 = vld [vmem:[#allocation7 + $0x6f0] sm:$0xf] }
  0x35   :  { %2074 = vmatpush.bf16.msra.mxu3 %v7072_v28  ;;  %v6812_v2 = vor.u32 %v9133_v57, %v6809_v58  ;;  %v9274_v4 = vld [vmem:[#allocation7 + $0x704] sm:$0xf0]  ;;  %v9079_v5 = vld [vmem:[#allocation7 + $0xf4] sm:$0xf]  ;;  %v6593_v6 = vld [vmem:[#allocation7 + $0x108] sm:$0xf0]  ;;  %v7576_v9 = vor.u32 %v9328_v0, %v7575_v63 }
  0x36   :  { %2018 = vmatpush.bf16.msra.mxu0 %v6472_v35  ;;  %v9127_v7 = vld [vmem:[#allocation7 + $0x274] sm:$0xf]  ;;  %v6785_v8 = vld [vmem:[#allocation7 + $0x288] sm:$0xf0]  ;;  %v7360_v10 = vor.u32 %v9274_v4, %v7359_v3  ;;  %v7551_v11 = vld [vmem:[#allocation7 + $0x870] sm:$0xf]  ;;  %v6596_v13 = vor.u32 %v9079_v5, %v6593_v6 }
  0x37   :  { %2037 = vmatpush.bf16.msra.mxu1 %v6664_v39  ;;  %v9322_v12 = vld [vmem:[#allocation7 + $0x884] sm:$0xf0]  ;;  %v6788_v14 = vor.u32 %v9127_v7, %v6785_v8  ;;  %v7335_v15 = vld [vmem:[#allocation7 + $0x6c0] sm:$0xf]  ;;  %v9268_v16 = vld [vmem:[#allocation7 + $0x6d4] sm:$0xf0] }
  0x38   :  { %2056 = vmatpush.bf16.msra.mxu2 %v6856_v40  ;;  %v9073_v17 = vld [vmem:[#allocation7 + $0xc4] sm:$0xf]  ;;  %v6569_v18 = vld [vmem:[#allocation7 + $0xd8] sm:$0xf0]  ;;  %v7527_v21 = vld [vmem:[#allocation7 + $0x840] sm:$0xf]  ;;  %v7552_v24 = vor.u32 %v9322_v12, %v7551_v11  ;;  %v7336_v25 = vor.u32 %v9268_v16, %v7335_v15 }
  0x39   :  { %2075 = vmatpush.bf16.msra.mxu3 %v7048_v44  ;;  %2019 = vmatmul.bf16.vlgmr.msra.gmra.mxu0 %v9934_v54  ;;  %v9121_v19 = vld [vmem:[#allocation7 + $0x244] sm:$0xf]  ;;  %v6761_v20 = vld [vmem:[#allocation7 + $0x258] sm:$0xf0]  ;;  %v9316_v22 = vld [vmem:[#allocation7 + $0x854] sm:$0xf0]  ;;  %v6572_v29 = vor.u32 %v9073_v17, %v6569_v18 }
  0x3a   :  { %2087 = vmatpush.bf16.msrb.mxu0 %v7408_v45  ;;  %2038 = vmatmul.bf16.vlgmr.msra.gmra.mxu1 %v9936_v55  ;;  %v7311_v23 = vld [vmem:[#allocation7 + $0x690] sm:$0xf]  ;;  %v9262_v26 = vld [vmem:[#allocation7 + $0x6a4] sm:$0xf0]  ;;  %v9067_v27 = vld [vmem:[#allocation7 + $0x94] sm:$0xf]  ;;  %v6764_v30 = vor.u32 %v9121_v19, %v6761_v20  ;;  %v7528_v40 = vor.u32 %v9316_v22, %v7527_v21 }
  0x3b   :  { %2057 = vmatmul.bf16.vlgmr.msra.gmra.mxu2 %v9938_v59  ;;  %2106 = vmatpush.bf16.msrb.mxu1 %v7600_v61  ;;  %v6545_v28 = vld [vmem:[#allocation7 + $0xa8] sm:$0xf0]  ;;  %v9115_v31 = vld [vmem:[#allocation7 + $0x214] sm:$0xf]  ;;  %v6447_v33 = vld [vmem:[#allocation2 + $0x30] sm:$0xf]  ;;  %v7312_v41 = vor.u32 %v9262_v26, %v7311_v23 }
  0x3c   :  { %2125 = vmatpush.bf16.msrb.mxu2 %v6644_v49  ;;  %2076 = vmatmul.bf16.vlgmr.msra.gmra.mxu3 %v9940_v60  ;;  %v6737_v32 = vld [vmem:[#allocation7 + $0x228] sm:$0xf0]  ;;  %v9046_v34 = vld [vmem:[#allocation2 + $0x44] sm:$0xf0]  ;;  %v9043_v35 = vld [vmem:[#allocation2 + $0x34] sm:$0xf]  ;;  %v6548_v45 = vor.u32 %v9067_v27, %v6545_v28 }
  0x3d   :  { %2144 = vmatpush.bf16.msrb.mxu3 %v6836_v50  ;;  %v6449_v36 = vld [vmem:[#allocation2 + $0x48] sm:$0xf0]  ;;  %v6455_v37 = vld [vmem:[#allocation2 + $0x38] sm:$0xf]  ;;  %v9047_v38 = vld [vmem:[#allocation2 + $0x4c] sm:$0xf0]  ;;  %v6740_v46 = vor.u32 %v9115_v31, %v6737_v32  ;;  %v9946_v50 = vor.u32 %v9046_v34, %v6447_v33 }
  0x3e   :  { %2088 = vmatpush.bf16.msrb.mxu0 %v7384_v62  ;;  %v9044_v39 = vld [vmem:[#allocation2 + $0x3c] sm:$0xf]  ;;  %v6457_v42 = vld [vmem:[#allocation2 + $0x50] sm:$0xf0]  ;;  %v7503_v43 = vld [vmem:[#allocation7 + $0x810] sm:$0xf]  ;;  %v9948_v51 = vor.u32 %v9043_v35, %v6449_v36  ;;  %v9950_v57 = vor.u32 %v9047_v38, %v6455_v37 }
  0x3f   :  { %2107 = vmatpush.bf16.msrb.mxu1 %v7576_v9  ;;  %v9310_v44 = vld [vmem:[#allocation7 + $0x824] sm:$0xf0]  ;;  %v7287_v47 = vld [vmem:[#allocation7 + $0x660] sm:$0xf]  ;;  %v9256_v48 = vld [vmem:[#allocation7 + $0x674] sm:$0xf0]  ;;  %v9952_v58 = vor.u32 %v9044_v39, %v6457_v42 }
  0x40   :  { %2126 = vmatpush.bf16.msrb.mxu2 %v6620_v1  ;;  %v9061_v49 = vld [vmem:[#allocation7 + $0x64] sm:$0xf]  ;;  %v6521_v52 = vld [vmem:[#allocation7 + $0x78] sm:$0xf0]  ;;  %v7504_v61 = vor.u32 %v9310_v44, %v7503_v43  ;;  %v7288_v62 = vor.u32 %v9256_v48, %v7287_v47  ;;  %v7479_v63 = vld [vmem:[#allocation7 + $0x7e0] sm:$0xf] }
  0x41   :  { %2145 = vmatpush.bf16.msrb.mxu3 %v6812_v2  ;;  %v9109_v53 = vld [vmem:[#allocation7 + $0x1e4] sm:$0xf]  ;;  %v6713_v56 = vld [vmem:[#allocation7 + $0x1f8] sm:$0xf0]  ;;  %v9304_v0 = vld [vmem:[#allocation7 + $0x7f4] sm:$0xf0]  ;;  %v6524_v1 = vor.u32 %v9061_v49, %v6521_v52 }
  0x42   :  { %2089 = vmatpush.bf16.msrb.mxu0 %v7360_v10  ;;  %v6716_v2 = vor.u32 %v9109_v53, %v6713_v56  ;;  %v7263_v3 = vld [vmem:[#allocation7 + $0x630] sm:$0xf]  ;;  %v9250_v4 = vld [vmem:[#allocation7 + $0x644] sm:$0xf0]  ;;  %v9055_v5 = vld [vmem:[#allocation7 + $0x34] sm:$0xf]  ;;  %v7480_v9 = vor.u32 %v9304_v0, %v7479_v63 }
  0x43   :  { %2108 = vmatpush.bf16.msrb.mxu1 %v7552_v24  ;;  %v6497_v6 = vld [vmem:[#allocation7 + $0x48] sm:$0xf0]  ;;  %v9103_v7 = vld [vmem:[#allocation7 + $0x1b4] sm:$0xf]  ;;  %v7264_v10 = vor.u32 %v9250_v4, %v7263_v3  ;;  %v7455_v11 = vld [vmem:[#allocation7 + $0x7b0] sm:$0xf] }
  0x44   :  { %2127 = vmatpush.bf16.msrb.mxu2 %v6596_v13  ;;  %v6689_v8 = vld [vmem:[#allocation7 + $0x1c8] sm:$0xf0]  ;;  %v9298_v12 = vld [vmem:[#allocation7 + $0x7c4] sm:$0xf0]  ;;  %v7239_v13 = vld [vmem:[#allocation7 + $0x600] sm:$0xf] }
  0x45   :  { %2146 = vmatpush.bf16.msrb.mxu3 %v6788_v14  ;;  %v6500_v14 = vor.u32 %v9055_v5, %v6497_v6  ;;  %v6692_v15 = vor.u32 %v9103_v7, %v6689_v8  ;;  %v9244_v16 = vld [vmem:[#allocation7 + $0x614] sm:$0xf0]  ;;  %v9049_v17 = vld [vmem:[#allocation7 + $0x4] sm:$0xf]  ;;  %v6473_v18 = vld [vmem:[#allocation7 + $0x18] sm:$0xf0] }
  0x46   :  { %2090 = vmatpush.bf16.msrb.mxu0 %v7336_v25  ;;  %v9097_v19 = vld [vmem:[#allocation7 + $0x184] sm:$0xf]  ;;  %v6665_v20 = vld [vmem:[#allocation7 + $0x198] sm:$0xf0]  ;;  %v9187_v21 = vld [vmem:[#allocation7 + $0x454] sm:$0xf]  ;;  %v7456_v25 = vor.u32 %v9298_v12, %v7455_v11  ;;  %v7240_v26 = vor.u32 %v9244_v16, %v7239_v13 }
  0x47   :  { %2109 = vmatpush.bf16.msrb.mxu1 %v7528_v40  ;;  %v7025_v22 = vld [vmem:[#allocation7 + $0x468] sm:$0xf0]  ;;  %v9283_v23 = vld [vmem:[#allocation7 + $0x754] sm:$0xf]  ;;  %v7431_v31 = vld [vmem:[#allocation7 + $0x780] sm:$0xf] }
  0x48   :  { %2128 = vmatpush.bf16.msrb.mxu2 %v6572_v29  ;;  %v7409_v24 = vld [vmem:[#allocation7 + $0x768] sm:$0xf0]  ;;  %v9331_v27 = vld [vmem:[#allocation7 + $0x8d4] sm:$0xf]  ;;  %v6476_v29 = vor.u32 %v9049_v17, %v6473_v18  ;;  %v9292_v32 = vld [vmem:[#allocation7 + $0x794] sm:$0xf0]  ;;  %v7028_v34 = vor.u32 %v9187_v21, %v7025_v22 }
  0x49   :  { %2147 = vmatpush.bf16.msrb.mxu3 %v6764_v30  ;;  %2024 = vmatmul.bf16.gmra.mxu0 %v9946_v50  ;;  %v7601_v28 = vld [vmem:[#allocation7 + $0x8e8] sm:$0xf0]  ;;  %v6668_v30 = vor.u32 %v9097_v19, %v6665_v20  ;;  %v9181_v33 = vld [vmem:[#allocation7 + $0x424] sm:$0xf]  ;;  %v7412_v35 = vor.u32 %v9283_v23, %v7409_v24  ;;  %v7001_v36 = vld [vmem:[#allocation7 + $0x438] sm:$0xf0]  ;;  %v7432_v43 = vor.u32 %v9292_v32, %v7431_v31 }
  0x4a   :  { %2091 = vmatpush.bf16.msrb.mxu0 %v7312_v41  ;;  %2043 = vmatmul.bf16.gmra.mxu1 %v9948_v51  ;;  %v9235_v37 = vld [vmem:[#allocation7 + $0x5d4] sm:$0xf]  ;;  %v7217_v38 = vld [vmem:[#allocation7 + $0x5e8] sm:$0xf0]  ;;  %v7604_v39 = vor.u32 %v9331_v27, %v7601_v28  ;;  %v9277_v40 = vld [vmem:[#allocation7 + $0x724] sm:$0xf]  ;;  %v7004_v52 = vor.u32 %v9181_v33, %v7001_v36 }
  0x4b   :  { %2062 = vmatmul.bf16.gmra.mxu2 %v9950_v57  ;;  %2110 = vmatpush.bf16.msrb.mxu1 %v7504_v61  ;;  %v7385_v41 = vld [vmem:[#allocation7 + $0x738] sm:$0xf0]  ;;  %v9325_v42 = vld [vmem:[#allocation7 + $0x8a4] sm:$0xf]  ;;  %v7220_v49 = vor.u32 %v9235_v37, %v7217_v38  ;;  %v9175_v56 = vld [vmem:[#allocation7 + $0x3f4] sm:$0xf] }
  0x4c   :  { %2129 = vmatpush.bf16.msrb.mxu2 %v6548_v45  ;;  %2081 = vmatmul.bf16.gmra.mxu3 %v9952_v58  ;;  %v7577_v44 = vld [vmem:[#allocation7 + $0x8b8] sm:$0xf0]  ;;  %v6439_v45 = vld [vmem:[#allocation2 + $0x10] sm:$0xf]  ;;  %v9039_v47 = vld [vmem:[#allocation2 + $0x14] sm:$0xf]  ;;  %v7388_v53 = vor.u32 %v9277_v40, %v7385_v41 }
  0x4d   :  { %2148 = vmatpush.bf16.msrb.mxu3 %v6740_v46  ;;  %v9042_v46 = vld [vmem:[#allocation2 + $0x24] sm:$0xf0]  ;;  %v6441_v48 = vld [vmem:[#allocation2 + $0x28] sm:$0xf0]  ;;  %v9229_v61 = vld [vmem:[#allocation7 + $0x5a4] sm:$0xf]  ;;  %v7580_v63 = vor.u32 %v9325_v42, %v7577_v44 }
  0x4e   :  { %2092 = vmatpush.bf16.msrb.mxu0 %v7288_v62  ;;  %v7193_v62 = vld [vmem:[#allocation7 + $0x5b8] sm:$0xf0]  ;;  %v9958_v0 = vor.u32 %v9042_v46, %v6439_v45  ;;  %v7361_v3 = vld [vmem:[#allocation7 + $0x708] sm:$0xf0]  ;;  %v9960_v4 = vor.u32 %v9039_v47, %v6441_v48  ;;  %v9319_v5 = vld [vmem:[#allocation7 + $0x874] sm:$0xf] }
  0x4f   :  { %2111 = vmatpush.bf16.msrb.mxu1 %v7480_v9  ;;  %v7553_v6 = vld [vmem:[#allocation7 + $0x888] sm:$0xf0]  ;;  %v7196_v7 = vor.u32 %v9229_v61, %v7193_v62  ;;  %v9223_v11 = vld [vmem:[#allocation7 + $0x574] sm:$0xf]  ;;  %v7337_v16 = vld [vmem:[#allocation7 + $0x6d8] sm:$0xf0] }
  0x50   :  { %2130 = vmatpush.bf16.msrb.mxu2 %v6524_v1  ;;  %v6977_v1 = vld [vmem:[#allocation7 + $0x408] sm:$0xf0]  ;;  %v7556_v13 = vor.u32 %v9319_v5, %v7553_v6  ;;  %v9313_v17 = vld [vmem:[#allocation7 + $0x844] sm:$0xf]  ;;  %v7529_v18 = vld [vmem:[#allocation7 + $0x858] sm:$0xf0] }
  0x51   :  { %2149 = vmatpush.bf16.msrb.mxu3 %v6716_v2  ;;  %v9271_v2 = vld [vmem:[#allocation7 + $0x6f4] sm:$0xf]  ;;  %v6980_v8 = vor.u32 %v9175_v56, %v6977_v1  ;;  %v7169_v12 = vld [vmem:[#allocation7 + $0x588] sm:$0xf0]  ;;  %v9217_v23 = vld [vmem:[#allocation7 + $0x544] sm:$0xf] }
  0x52   :  { %2093 = vmatpush.bf16.msrb.mxu0 %v7264_v10  ;;  %v7364_v9 = vor.u32 %v9271_v2, %v7361_v3  ;;  %v9169_v10 = vld [vmem:[#allocation7 + $0x3c4] sm:$0xf]  ;;  %v7172_v19 = vor.u32 %v9223_v11, %v7169_v12  ;;  %v9163_v22 = vld [vmem:[#allocation7 + $0x394] sm:$0xf]  ;;  %v7145_v24 = vld [vmem:[#allocation7 + $0x558] sm:$0xf0] }
  0x53   :  { %2112 = vmatpush.bf16.msrb.mxu1 %v7456_v25  ;;  %v7532_v25 = vor.u32 %v9313_v17, %v7529_v18  ;;  %v9259_v27 = vld [vmem:[#allocation7 + $0x694] sm:$0xf]  ;;  %v7313_v28 = vld [vmem:[#allocation7 + $0x6a8] sm:$0xf0]  ;;  %v7148_v31 = vor.u32 %v9217_v23, %v7145_v24  ;;  %v9157_v32 = vld [vmem:[#allocation7 + $0x364] sm:$0xf] }
  0x54   :  { %2131 = vmatpush.bf16.msrb.mxu2 %v6500_v14  ;;  %v6953_v14 = vld [vmem:[#allocation7 + $0x3d8] sm:$0xf0]  ;;  %v9211_v36 = vld [vmem:[#allocation7 + $0x514] sm:$0xf]  ;;  %v7121_v37 = vld [vmem:[#allocation7 + $0x528] sm:$0xf0] }
  0x55   :  { %2150 = vmatpush.bf16.msrb.mxu3 %v6692_v15  ;;  %v9265_v15 = vld [vmem:[#allocation7 + $0x6c4] sm:$0xf]  ;;  %v6956_v20 = vor.u32 %v9169_v10, %v6953_v14  ;;  %v7289_v40 = vld [vmem:[#allocation7 + $0x678] sm:$0xf0]  ;;  %v9048_v44 = vld [vmem:[#allocation2 + $0x54] sm:$0xf0]  ;;  %v7124_v47 = vor.u32 %v9211_v36, %v7121_v37 }
  0x56   :  { %2094 = vmatpush.bf16.msrb.mxu0 %v7240_v26  ;;  %v7340_v21 = vor.u32 %v9265_v15, %v7337_v16  ;;  %v6929_v26 = vld [vmem:[#allocation7 + $0x3a8] sm:$0xf0]  ;;  %v9301_v41 = vld [vmem:[#allocation7 + $0x7e4] sm:$0xf]  ;;  %v7481_v42 = vld [vmem:[#allocation7 + $0x7f8] sm:$0xf0] }
  0x57   :  { %2113 = vmatpush.bf16.msrb.mxu1 %v7432_v43  ;;  %v6932_v33 = vor.u32 %v9163_v22, %v6929_v26  ;;  %v6463_v43 = vld [vmem:[#allocation2 + $0x40] sm:$0xf]  ;;  %v9045_v45 = vld [vmem:[#allocation2 + $0x44] sm:$0xf]  ;;  %v6465_v46 = vld [vmem:[#allocation2 + $0x58] sm:$0xf0]  ;;  %v7484_v61 = vor.u32 %v9301_v41, %v7481_v42 }
  0x58   :  { %2132 = vmatpush.bf16.msrb.mxu2 %v6476_v29  ;;  %v9307_v29 = vld [vmem:[#allocation7 + $0x814] sm:$0xf]  ;;  %v7097_v56 = vld [vmem:[#allocation7 + $0x4f8] sm:$0xf0]  ;;  %v9966_v62 = vor.u32 %v9048_v44, %v6463_v43  ;;  %v7265_v2 = vld [vmem:[#allocation7 + $0x648] sm:$0xf0]  ;;  %v9968_v3 = vor.u32 %v9045_v45, %v6465_v46 }
  0x59   :  { %2151 = vmatpush.bf16.msrb.mxu3 %v6668_v30  ;;  %2095 = vmatmul.bf16.vlgmr.msrb.gmra.mxu0 %v9958_v0  ;;  %v7505_v30 = vld [vmem:[#allocation7 + $0x828] sm:$0xf0]  ;;  %v9247_v1 = vld [vmem:[#allocation7 + $0x634] sm:$0xf]  ;;  %v9241_v12 = vld [vmem:[#allocation7 + $0x604] sm:$0xf] }
  0x5a   :  { %2163 = vmatpush.bf16.msra.mxu0 %v7028_v34  ;;  %2114 = vmatmul.bf16.vlgmr.msrb.gmra.mxu1 %v9960_v4  ;;  %v7316_v34 = vor.u32 %v9259_v27, %v7313_v28  ;;  %v7508_v38 = vor.u32 %v9307_v29, %v7505_v30  ;;  %v9295_v5 = vld [vmem:[#allocation7 + $0x7b4] sm:$0xf]  ;;  %v7457_v6 = vld [vmem:[#allocation7 + $0x7c8] sm:$0xf0]  ;;  %v7268_v11 = vor.u32 %v9247_v1, %v7265_v2  ;;  %v7241_v16 = vld [vmem:[#allocation7 + $0x618] sm:$0xf0] }
  0x5b   :  { %2182 = vmatpush.bf16.msra.mxu1 %v7220_v49  ;;  %2133 = vmatmul.bf16.vlgmr.msrb.gmra.mxu2 %v9934_v54  ;;  %v7073_v14 = vld [vmem:[#allocation7 + $0x4c8] sm:$0xf0]  ;;  %v7460_v15 = vor.u32 %v9295_v5, %v7457_v6  ;;  %v9289_v17 = vld [vmem:[#allocation7 + $0x784] sm:$0xf]  ;;  %v7433_v18 = vld [vmem:[#allocation7 + $0x798] sm:$0xf0]  ;;  %v7244_v27 = vor.u32 %v9241_v12, %v7241_v16 }
  0x5c   :  { %2201 = vmatpush.bf16.msra.mxu2 %v7412_v35  ;;  %2152 = vmatmul.bf16.vlgmr.msrb.gmra.mxu3 %v9936_v55  ;;  %v6905_v35 = vld [vmem:[#allocation7 + $0x378] sm:$0xf0]  ;;  %v9191_v22 = vld [vmem:[#allocation7 + $0x46c] sm:$0xf0]  ;;  %v7223_v23 = vld [vmem:[#allocation7 + $0x5d8] sm:$0xf]  ;;  %v7436_v30 = vor.u32 %v9289_v17, %v7433_v18 }
  0x5d   :  { %2220 = vmatpush.bf16.msra.mxu3 %v7604_v39  ;;  %v9253_v39 = vld [vmem:[#allocation7 + $0x664] sm:$0xf]  ;;  %v6908_v48 = vor.u32 %v9157_v32, %v6905_v35  ;;  %v9239_v24 = vld [vmem:[#allocation7 + $0x5ec] sm:$0xf0]  ;;  %v7049_v29 = vld [vmem:[#allocation7 + $0x498] sm:$0xf0] }
  0x5e   :  { %2164 = vmatpush.bf16.msra.mxu0 %v7004_v52  ;;  %v7292_v49 = vor.u32 %v9253_v39, %v7289_v40  ;;  %v9151_v52 = vld [vmem:[#allocation7 + $0x334] sm:$0xf]  ;;  %v9193_v28 = vld [vmem:[#allocation7 + $0x484] sm:$0xf]  ;;  %v6839_v32 = vld [vmem:[#allocation7 + $0x2d8] sm:$0xf]  ;;  %v7224_v35 = vor.u32 %v9239_v24, %v7223_v23 }
  0x5f   :  { %2183 = vmatpush.bf16.msra.mxu1 %v7196_v7  ;;  %v6623_v36 = vld [vmem:[#allocation7 + $0x128] sm:$0xf]  ;;  %v9089_v37 = vld [vmem:[#allocation7 + $0x13c] sm:$0xf0]  ;;  %v7052_v42 = vor.u32 %v9193_v28, %v7049_v29  ;;  %v9227_v1 = vld [vmem:[#allocation7 + $0x58c] sm:$0xf0] }
  0x60   :  { %2202 = vmatpush.bf16.msra.mxu2 %v7388_v53  ;;  %v9205_v53 = vld [vmem:[#allocation7 + $0x4e4] sm:$0xf]  ;;  %v9185_v39 = vld [vmem:[#allocation7 + $0x43c] sm:$0xf0]  ;;  %v7199_v40 = vld [vmem:[#allocation7 + $0x5a8] sm:$0xf]  ;;  %v6624_v44 = vor.u32 %v9089_v37, %v6623_v36 }
  0x61   :  { %2221 = vmatpush.bf16.msra.mxu3 %v7580_v63  ;;  %v6881_v63 = vld [vmem:[#allocation7 + $0x348] sm:$0xf0]  ;;  %v7100_v7 = vor.u32 %v9205_v53, %v7097_v56  ;;  %v9233_v41 = vld [vmem:[#allocation7 + $0x5bc] sm:$0xf0]  ;;  %v6815_v45 = vld [vmem:[#allocation7 + $0x2a8] sm:$0xf] }
  0x62   :  { %2165 = vmatpush.bf16.msra.mxu0 %v6980_v8  ;;  %v9145_v8 = vld [vmem:[#allocation7 + $0x304] sm:$0xf]  ;;  %v6884_v10 = vor.u32 %v9151_v52, %v6881_v63  ;;  %v9137_v46 = vld [vmem:[#allocation7 + $0x2bc] sm:$0xf0]  ;;  %v9083_v52 = vld [vmem:[#allocation7 + $0x10c] sm:$0xf0] }
  0x63   :  { %2184 = vmatpush.bf16.msra.mxu1 %v7172_v19  ;;  %v6647_v19 = vld [vmem:[#allocation7 + $0x158] sm:$0xf]  ;;  %v6816_v56 = vor.u32 %v9137_v46, %v6815_v45  ;;  %v9131_v5 = vld [vmem:[#allocation7 + $0x28c] sm:$0xf0]  ;;  %v9173_v12 = vld [vmem:[#allocation7 + $0x3dc] sm:$0xf0] }
  0x64   :  { %2203 = vmatpush.bf16.msra.mxu2 %v7364_v9  ;;  %v6857_v9 = vld [vmem:[#allocation7 + $0x318] sm:$0xf0]  ;;  %v6983_v53 = vld [vmem:[#allocation7 + $0x3f8] sm:$0xf]  ;;  %v6767_v16 = vld [vmem:[#allocation7 + $0x248] sm:$0xf] }
  0x65   :  { %2222 = vmatpush.bf16.msra.mxu3 %v7556_v13  ;;  %v9199_v13 = vld [vmem:[#allocation7 + $0x4b4] sm:$0xf]  ;;  %v6860_v26 = vor.u32 %v9145_v8, %v6857_v9  ;;  %v7175_v63 = vld [vmem:[#allocation7 + $0x578] sm:$0xf]  ;;  %v6575_v9 = vld [vmem:[#allocation7 + $0xc8] sm:$0xf] }
  0x66   :  { %2166 = vmatpush.bf16.msra.mxu0 %v6956_v20  ;;  %v9095_v20 = vld [vmem:[#allocation7 + $0x16c] sm:$0xf0]  ;;  %v6791_v2 = vld [vmem:[#allocation7 + $0x278] sm:$0xf]  ;;  %v7176_v8 = vor.u32 %v9227_v1, %v7175_v63  ;;  %v9125_v17 = vld [vmem:[#allocation7 + $0x25c] sm:$0xf0] }
  0x67   :  { %2185 = vmatpush.bf16.msra.mxu1 %v7148_v31  ;;  %v6648_v31 = vor.u32 %v9095_v20, %v6647_v19  ;;  %v6935_v23 = vld [vmem:[#allocation7 + $0x398] sm:$0xf]  ;;  %v9167_v24 = vld [vmem:[#allocation7 + $0x3ac] sm:$0xf0]  ;;  %v9161_v36 = vld [vmem:[#allocation7 + $0x37c] sm:$0xf0] }
  0x68   :  { %2204 = vmatpush.bf16.msra.mxu2 %v7340_v21  ;;  %v7031_v21 = vld [vmem:[#allocation7 + $0x458] sm:$0xf]  ;;  %v9119_v29 = vld [vmem:[#allocation7 + $0x22c] sm:$0xf0]  ;;  %v7103_v37 = vld [vmem:[#allocation7 + $0x4e8] sm:$0xf] }
  0x69   :  { %2223 = vmatpush.bf16.msra.mxu3 %v7532_v25  ;;  %2100 = vmatmul.bf16.gmra.mxu0 %v9966_v62  ;;  %v7076_v25 = vor.u32 %v9199_v13, %v7073_v14  ;;  %v7151_v13 = vld [vmem:[#allocation7 + $0x548] sm:$0xf]  ;;  %v9221_v14 = vld [vmem:[#allocation7 + $0x55c] sm:$0xf0]  ;;  %v6743_v28 = vld [vmem:[#allocation7 + $0x218] sm:$0xf] }
  0x6a   :  { %2167 = vmatpush.bf16.msra.mxu0 %v6932_v33  ;;  %2119 = vmatmul.bf16.gmra.mxu1 %v9968_v3  ;;  %v9143_v33 = vld [vmem:[#allocation7 + $0x2ec] sm:$0xf0]  ;;  %v7152_v20 = vor.u32 %v9221_v14, %v7151_v13  ;;  %v6503_v45 = vld [vmem:[#allocation7 + $0x38] sm:$0xf]  ;;  %v6479_v1 = vld [vmem:[#allocation7 + $0x8] sm:$0xf] }
  0x6b   :  { %2186 = vmatpush.bf16.msra.mxu1 %v7124_v47  ;;  %2138 = vmatmul.bf16.gmra.mxu2 %v9946_v50  ;;  %v6840_v43 = vor.u32 %v9143_v33, %v6839_v32  ;;  %v6527_v33 = vld [vmem:[#allocation7 + $0x68] sm:$0xf]  ;;  %v9059_v46 = vld [vmem:[#allocation7 + $0x4c] sm:$0xf0]  ;;  %v9092_v14 = vld [vmem:[#allocation7 + $0x15c] sm:$0xf] }
  0x6c   :  { %2205 = vmatpush.bf16.msra.mxu2 %v7316_v34  ;;  %2157 = vmatmul.bf16.gmra.mxu3 %v9948_v51  ;;  %v7032_v34 = vor.u32 %v9191_v22, %v7031_v21  ;;  %v6551_v21 = vld [vmem:[#allocation7 + $0x98] sm:$0xf]  ;;  %v9071_v22 = vld [vmem:[#allocation7 + $0xac] sm:$0xf0]  ;;  %v6504_v63 = vor.u32 %v9059_v46, %v6503_v45  ;;  %v9128_v45 = vld [vmem:[#allocation7 + $0x27c] sm:$0xf] }
  0x6d   :  { %2224 = vmatpush.bf16.msra.mxu3 %v7508_v38  ;;  %v7007_v38 = vld [vmem:[#allocation7 + $0x428] sm:$0xf]  ;;  %v6793_v46 = vld [vmem:[#allocation7 + $0x290] sm:$0xf0]  ;;  %s9879_s30 = smov 127   ;;  %vm3194_vm4 = vcmask 261120  }
  0x6e   :  { %2168 = vmatpush.bf16.msra.mxu0 %v6908_v48  ;;  %v7008_v47 = vor.u32 %v9185_v39, %v7007_v38  ;;  %v7200_v48 = vor.u32 %v9233_v41, %v7199_v40  ;;  %v9209_v38 = vld [vmem:[#allocation7 + $0x4fc] sm:$0xf0]  ;;  %v6744_v39 = vor.u32 %v9119_v29, %v6743_v28  ;;  %v6719_v40 = vld [vmem:[#allocation7 + $0x1e8] sm:$0xf]  ;;  %s9880_s7 = smov 126   ;;  %s6406_s14 = sshll.u32 %s11005_s6, 4  ;;  %s6407_s14 = int_to_ptr.hbm [resolvable:$true] %s6406_s14 }
  0x6f   :  { %2187 = vmatpush.bf16.msra.mxu1 %v7100_v7  ;;  %v9113_v41 = vld [vmem:[#allocation7 + $0x1fc] sm:$0xf0]  ;;  %s9882_s15 = smov 768   ;;  %s9883_s16 = smov 48  }
  0x70   :  { %2206 = vmatpush.bf16.msra.mxu2 %v7292_v49  ;;  %v6599_v49 = vld [vmem:[#allocation7 + $0xf8] sm:$0xf]  ;;  %v9281_v29 = vld [vmem:[#allocation7 + $0x73c] sm:$0xf0] }
  0x71   :  { %2225 = vmatpush.bf16.msra.mxu3 %v7484_v61  ;;  %v9179_v61 = vld [vmem:[#allocation7 + $0x40c] sm:$0xf0]  ;;  %v6600_v6 = vor.u32 %v9083_v52, %v6599_v49  ;;  %v7079_v49 = vld [vmem:[#allocation7 + $0x4b8] sm:$0xf] }
  0x72   :  { %2169 = vmatpush.bf16.msra.mxu0 %v6884_v10  ;;  %v6984_v7 = vor.u32 %v9179_v61, %v6983_v53  ;;  %v9077_v10 = vld [vmem:[#allocation7 + $0xdc] sm:$0xf0]  ;;  %v9203_v52 = vld [vmem:[#allocation7 + $0x4cc] sm:$0xf0]  ;;  %v6720_v53 = vor.u32 %v9113_v41, %v6719_v40  ;;  %v7367_v40 = vld [vmem:[#allocation7 + $0x6f8] sm:$0xf] }
  0x73   :  { %2188 = vmatpush.bf16.msra.mxu1 %v7076_v25  ;;  %v6576_v18 = vor.u32 %v9077_v10, %v6575_v9  ;;  %v7127_v25 = vld [vmem:[#allocation7 + $0x518] sm:$0xf]  ;;  %v9107_v61 = vld [vmem:[#allocation7 + $0x1cc] sm:$0xf0]  ;;  %v7055_v9 = vld [vmem:[#allocation7 + $0x488] sm:$0xf] }
  0x74   :  { %2207 = vmatpush.bf16.msra.mxu2 %v7268_v11  ;;  %v6959_v11 = vld [vmem:[#allocation7 + $0x3c8] sm:$0xf]  ;;  %v9197_v10 = vld [vmem:[#allocation7 + $0x49c] sm:$0xf0] }
  0x75   :  { %2226 = vmatpush.bf16.msra.mxu3 %v7460_v15  ;;  %v6792_v15 = vor.u32 %v9131_v5, %v6791_v2  ;;  %v6960_v19 = vor.u32 %v9173_v12, %v6959_v11  ;;  %v9053_v2 = vld [vmem:[#allocation7 + $0x1c] sm:$0xf0]  ;;  %v7415_v11 = vld [vmem:[#allocation7 + $0x758] sm:$0xf]  ;;  %v9287_v12 = vld [vmem:[#allocation7 + $0x76c] sm:$0xf0] }
  0x76   :  { %2170 = vmatpush.bf16.msra.mxu0 %v6860_v26  ;;  %v9215_v26 = vld [vmem:[#allocation7 + $0x52c] sm:$0xf0] }
  0x77   :  { %2189 = vmatpush.bf16.msra.mxu1 %v7052_v42  ;;  %v7128_v32 = vor.u32 %v9215_v26, %v7127_v25  ;;  %v7416_v25 = vor.u32 %v9287_v12, %v7415_v11  ;;  %v7535_v11 = vld [vmem:[#allocation7 + $0x848] sm:$0xf]  ;;  %v9317_v12 = vld [vmem:[#allocation7 + $0x85c] sm:$0xf0] }
  0x78   :  { %2208 = vmatpush.bf16.msra.mxu2 %v7244_v27  ;;  %v6768_v27 = vor.u32 %v9125_v17, %v6767_v16  ;;  %v9140_v16 = vld [vmem:[#allocation7 + $0x2dc] sm:$0xf]  ;;  %v6480_v17 = vor.u32 %v9053_v2, %v6479_v1  ;;  %v9074_v1 = vld [vmem:[#allocation7 + $0xcc] sm:$0xf]  ;;  %v6577_v2 = vld [vmem:[#allocation7 + $0xe0] sm:$0xf0] }
  0x79   :  { %2227 = vmatpush.bf16.msra.mxu3 %v7436_v30  ;;  %2171 = vmatmul.bf16.vlgmr.msra.gmra.mxu0 %v9938_v59  ;;  %v6552_v30 = vor.u32 %v9071_v22, %v6551_v21  ;;  %v7056_v22 = vor.u32 %v9197_v10, %v7055_v9  ;;  %v6580_v9 = vor.u32 %v9074_v1, %v6577_v2  ;;  %v7319_v10 = vld [vmem:[#allocation7 + $0x698] sm:$0xf]  ;;  %v9188_v1 = vld [vmem:[#allocation7 + $0x45c] sm:$0xf]  ;;  %v7033_v2 = vld [vmem:[#allocation7 + $0x470] sm:$0xf0] }
  0x7a   :  { %2239 = vmatpush.bf16.msrb.mxu0 %v6648_v31  ;;  %2190 = vmatmul.bf16.vlgmr.msra.gmra.mxu1 %v9940_v60  ;;  %v6936_v31 = vor.u32 %v9167_v24, %v6935_v23  ;;  %v7607_v23 = vld [vmem:[#allocation7 + $0x8d8] sm:$0xf]  ;;  %v9335_v24 = vld [vmem:[#allocation7 + $0x8ec] sm:$0xf0] }
  0x7b   :  { %2258 = vmatpush.bf16.msrb.mxu1 %v6840_v43  ;;  %2209 = vmatmul.bf16.vlgmr.msra.gmra.mxu2 %v9958_v0 }
  0x7c   :  { %2277 = vmatpush.bf16.msrb.mxu2 %v7032_v34  ;;  %2228 = vmatmul.bf16.vlgmr.msra.gmra.mxu3 %v9960_v4  ;;  %v9065_v34 = vld [vmem:[#allocation7 + $0x7c] sm:$0xf0] }
  0x7d   :  { %2296 = vmatpush.bf16.msrb.mxu3 %v7224_v35  ;;  %v6911_v35 = vld [vmem:[#allocation7 + $0x368] sm:$0xf]  ;;  %v6528_v42 = vor.u32 %v9065_v34, %v6527_v33  ;;  %v9134_v33 = vld [vmem:[#allocation7 + $0x2ac] sm:$0xf]  ;;  %v6817_v34 = vld [vmem:[#allocation7 + $0x2c0] sm:$0xf0] }
  0x7e   :  { %2240 = vmatpush.bf16.msrb.mxu0 %v6624_v44  ;;  %v6912_v43 = vor.u32 %v9161_v36, %v6911_v35  ;;  %v7104_v44 = vor.u32 %v9209_v38, %v7103_v37  ;;  %v7608_v35 = vor.u32 %v9335_v24, %v7607_v23  ;;  %v7583_v36 = vld [vmem:[#allocation7 + $0x8a8] sm:$0xf]  ;;  %v9329_v37 = vld [vmem:[#allocation7 + $0x8bc] sm:$0xf0]  ;;  %v6820_v41 = vor.u32 %v9134_v33, %v6817_v34  ;;  %v7511_v23 = vld [vmem:[#allocation7 + $0x818] sm:$0xf] }
  0x7f   :  { %2259 = vmatpush.bf16.msrb.mxu1 %v6816_v56  ;;  %v6695_v56 = vld [vmem:[#allocation7 + $0x1b8] sm:$0xf]  ;;  %v9311_v24 = vld [vmem:[#allocation7 + $0x82c] sm:$0xf0] }
  0x80   :  { %2278 = vmatpush.bf16.msrb.mxu2 %v7008_v47  ;;  %v6887_v47 = vld [vmem:[#allocation7 + $0x338] sm:$0xf]  ;;  %v6696_v13 = vor.u32 %v9107_v61, %v6695_v56  ;;  %v9323_v56 = vld [vmem:[#allocation7 + $0x88c] sm:$0xf0]  ;;  %v6796_v61 = vor.u32 %v9128_v45, %v6793_v46 }
  0x81   :  { %2297 = vmatpush.bf16.msrb.mxu3 %v7200_v48  ;;  %v9155_v48 = vld [vmem:[#allocation7 + $0x34c] sm:$0xf0]  ;;  %v7271_v34 = vld [vmem:[#allocation7 + $0x638] sm:$0xf] }
  0x82   :  { %2241 = vmatpush.bf16.msrb.mxu0 %v6600_v6  ;;  %v6888_v5 = vor.u32 %v9155_v48, %v6887_v47  ;;  %v7080_v6 = vor.u32 %v9203_v52, %v7079_v49  ;;  %v7584_v47 = vor.u32 %v9329_v37, %v7583_v36  ;;  %v7343_v52 = vld [vmem:[#allocation7 + $0x6c8] sm:$0xf]  ;;  %v9305_v36 = vld [vmem:[#allocation7 + $0x7fc] sm:$0xf0] }
  0x83   :  { %2260 = vmatpush.bf16.msrb.mxu1 %v6792_v15  ;;  %v6649_v15 = vld [vmem:[#allocation7 + $0x170] sm:$0xf0] }
  0x84   :  { %2279 = vmatpush.bf16.msrb.mxu2 %v6984_v7  ;;  %v6863_v7 = vld [vmem:[#allocation7 + $0x308] sm:$0xf]  ;;  %v6652_v26 = vor.u32 %v9092_v14, %v6649_v15  ;;  %v9263_v14 = vld [vmem:[#allocation7 + $0x6ac] sm:$0xf0]  ;;  %v9068_v15 = vld [vmem:[#allocation7 + $0x9c] sm:$0xf] }
  0x85   :  { %2298 = vmatpush.bf16.msrb.mxu3 %v7176_v8  ;;  %v9149_v8 = vld [vmem:[#allocation7 + $0x31c] sm:$0xf0] }
  0x86   :  { %2242 = vmatpush.bf16.msrb.mxu0 %v6576_v18  ;;  %v6841_v18 = vld [vmem:[#allocation7 + $0x2f0] sm:$0xf0]  ;;  %v6864_v21 = vor.u32 %v9149_v8, %v6863_v7 }
  0x87   :  { %2261 = vmatpush.bf16.msrb.mxu1 %v6768_v27  ;;  %v7391_v27 = vld [vmem:[#allocation7 + $0x728] sm:$0xf]  ;;  %v6844_v28 = vor.u32 %v9140_v16, %v6841_v18  ;;  %v6553_v16 = vld [vmem:[#allocation7 + $0xb0] sm:$0xf0] }
  0x88   :  { %2280 = vmatpush.bf16.msrb.mxu2 %v6960_v19  ;;  %v6671_v19 = vld [vmem:[#allocation7 + $0x188] sm:$0xf]  ;;  %v7392_v38 = vor.u32 %v9281_v29, %v7391_v27  ;;  %v6745_v18 = vld [vmem:[#allocation7 + $0x230] sm:$0xf0]  ;;  %v9062_v27 = vld [vmem:[#allocation7 + $0x6c] sm:$0xf] }
  0x89   :  { %2299 = vmatpush.bf16.msrb.mxu3 %v7152_v20  ;;  %2176 = vmatmul.bf16.gmra.mxu0 %v9950_v57  ;;  %v9101_v20 = vld [vmem:[#allocation7 + $0x19c] sm:$0xf0]  ;;  %v9110_v29 = vld [vmem:[#allocation7 + $0x1ec] sm:$0xf] }
  0x8a   :  { %2243 = vmatpush.bf16.msrb.mxu0 %v6552_v30  ;;  %2195 = vmatmul.bf16.gmra.mxu1 %v9952_v58  ;;  %v9086_v30 = vld [vmem:[#allocation7 + $0x12c] sm:$0xf] }
  0x8b   :  { %2262 = vmatpush.bf16.msrb.mxu1 %v6744_v39  ;;  %2214 = vmatmul.bf16.gmra.mxu2 %v9966_v62 }
  0x8c   :  { %2281 = vmatpush.bf16.msrb.mxu2 %v6936_v31  ;;  %2233 = vmatmul.bf16.gmra.mxu3 %v9968_v3  ;;  %v6625_v31 = vld [vmem:[#allocation7 + $0x140] sm:$0xf0] }
  0x8d   :  { %2300 = vmatpush.bf16.msrb.mxu3 %v7128_v32  ;;  %v6672_v32 = vor.u32 %v9101_v20, %v6671_v19  ;;  %v6628_v39 = vor.u32 %v9086_v30, %v6625_v31  ;;  %v7536_v19 = vor.u32 %v9317_v12, %v7535_v11  ;;  %v7320_v20 = vor.u32 %v9263_v14, %v7319_v10  ;;  %v6721_v30 = vld [vmem:[#allocation7 + $0x200] sm:$0xf0]  ;;  %v7439_v12 = vld [vmem:[#allocation7 + $0x788] sm:$0xf] }
  0x8e   :  { %2244 = vmatpush.bf16.msrb.mxu0 %v6528_v42  ;;  %v9275_v42 = vld [vmem:[#allocation7 + $0x70c] sm:$0xf0]  ;;  %v7512_v31 = vor.u32 %v9311_v24, %v7511_v23  ;;  %v6724_v37 = vor.u32 %v9110_v29, %v6721_v30  ;;  %v7393_v23 = vld [vmem:[#allocation7 + $0x740] sm:$0xf0]  ;;  %v9326_v24 = vld [vmem:[#allocation7 + $0x8ac] sm:$0xf] }
  0x8f   :  { %2263 = vmatpush.bf16.msrb.mxu1 %v6720_v53  ;;  %v7368_v48 = vor.u32 %v9275_v42, %v7367_v40  ;;  %v7559_v53 = vld [vmem:[#allocation7 + $0x878] sm:$0xf]  ;;  %v6505_v40 = vld [vmem:[#allocation7 + $0x50] sm:$0xf0]  ;;  %v9230_v29 = vld [vmem:[#allocation7 + $0x5ac] sm:$0xf] }
  0x90   :  { %2282 = vmatpush.bf16.msrb.mxu2 %v6912_v43  ;;  %v9080_v43 = vld [vmem:[#allocation7 + $0xfc] sm:$0xf]  ;;  %v7560_v7 = vor.u32 %v9323_v56, %v7559_v53  ;;  %v6697_v42 = vld [vmem:[#allocation7 + $0x1d0] sm:$0xf0]  ;;  %v6481_v56 = vld [vmem:[#allocation7 + $0x20] sm:$0xf0] }
  0x91   :  { %2301 = vmatpush.bf16.msrb.mxu3 %v7104_v44  ;;  %v6601_v44 = vld [vmem:[#allocation7 + $0x110] sm:$0xf0]  ;;  %v7201_v30 = vld [vmem:[#allocation7 + $0x5c0] sm:$0xf0] }
  0x92   :  { %2245 = vmatpush.bf16.msrb.mxu0 %v6504_v63  ;;  %v6604_v49 = vor.u32 %v9080_v43, %v6601_v44  ;;  %v9269_v63 = vld [vmem:[#allocation7 + $0x6dc] sm:$0xf0]  ;;  %v7247_v43 = vld [vmem:[#allocation7 + $0x608] sm:$0xf] }
  0x93   :  { %2264 = vmatpush.bf16.msrb.mxu1 %v6696_v13  ;;  %v7344_v8 = vor.u32 %v9269_v63, %v7343_v52  ;;  %v9245_v44 = vld [vmem:[#allocation7 + $0x61c] sm:$0xf0]  ;;  %v9299_v52 = vld [vmem:[#allocation7 + $0x7cc] sm:$0xf0]  ;;  %v6673_v63 = vld [vmem:[#allocation7 + $0x1a0] sm:$0xf0] }
  0x94   :  { %2283 = vmatpush.bf16.msrb.mxu2 %v6888_v5  ;;  %v9122_v5 = vld [vmem:[#allocation7 + $0x24c] sm:$0xf]  ;;  %v7248_v10 = vor.u32 %v9245_v44, %v7247_v43 }
  0x95   :  { %2302 = vmatpush.bf16.msrb.mxu3 %v7080_v6  ;;  %v6769_v6 = vld [vmem:[#allocation7 + $0x260] sm:$0xf0] }
  0x96   :  { %2246 = vmatpush.bf16.msrb.mxu0 %v6480_v17  ;;  %v6772_v13 = vor.u32 %v9122_v5, %v6769_v6  ;;  %v9116_v17 = vld [vmem:[#allocation7 + $0x21c] sm:$0xf]  ;;  %v7417_v6 = vld [vmem:[#allocation7 + $0x770] sm:$0xf0] }
  0x97   :  { %2265 = vmatpush.bf16.msrb.mxu1 %v6672_v32  ;;  %v9284_v5 = vld [vmem:[#allocation7 + $0x75c] sm:$0xf] }
  0x98   :  { %2284 = vmatpush.bf16.msrb.mxu2 %v6864_v21  ;;  %v6556_v21 = vor.u32 %v9068_v15, %v6553_v16  ;;  %v7036_v15 = vor.u32 %v9188_v1, %v7033_v2  ;;  %v9236_v16 = vld [vmem:[#allocation7 + $0x5dc] sm:$0xf] }
  0x99   :  { %2303 = vmatpush.bf16.msrb.mxu3 %v7056_v22  ;;  %2247 = vmatmul.bf16.vlgmr.msrb.gmra.mxu0 %v9934_v54  ;;  %v7295_v22 = vld [vmem:[#allocation7 + $0x668] sm:$0xf]  ;;  %v9164_v2 = vld [vmem:[#allocation7 + $0x39c] sm:$0xf] }
  0x9a   :  { %2315 = vmatpush.bf16.msra.mxu0 %v7416_v25  ;;  %2266 = vmatmul.bf16.vlgmr.msrb.gmra.mxu1 %v9936_v55  ;;  %v6748_v25 = vor.u32 %v9116_v17, %v6745_v18  ;;  %v7225_v17 = vld [vmem:[#allocation7 + $0x5f0] sm:$0xf0]  ;;  %v7420_v18 = vor.u32 %v9284_v5, %v7417_v6 }
  0x9b   :  { %2334 = vmatpush.bf16.msra.mxu1 %v7608_v35  ;;  %2285 = vmatmul.bf16.vlgmr.msrb.gmra.mxu2 %v9938_v59  ;;  %v7487_v35 = vld [vmem:[#allocation7 + $0x7e8] sm:$0xf]  ;;  %v6937_v5 = vld [vmem:[#allocation7 + $0x3b0] sm:$0xf0] }
  0x9c   :  { %2353 = vmatpush.bf16.msra.mxu2 %v6652_v26  ;;  %2304 = vmatmul.bf16.vlgmr.msrb.gmra.mxu3 %v9940_v60  ;;  %v9257_v26 = vld [vmem:[#allocation7 + $0x67c] sm:$0xf0]  ;;  %v7488_v45 = vor.u32 %v9305_v36, %v7487_v35  ;;  %v9272_v35 = vld [vmem:[#allocation7 + $0x6fc] sm:$0xf]  ;;  %v7369_v36 = vld [vmem:[#allocation7 + $0x710] sm:$0xf0] }
  0x9d   :  { %2372 = vmatpush.bf16.msra.mxu3 %v6844_v28  ;;  %v6529_v28 = vld [vmem:[#allocation7 + $0x80] sm:$0xf0]  ;;  %v7296_v32 = vor.u32 %v9257_v26, %v7295_v22  ;;  %v9278_v22 = vld [vmem:[#allocation7 + $0x72c] sm:$0xf]  ;;  %v7372_v43 = vor.u32 %v9272_v35, %v7369_v36 }
  0x9e   :  { %2316 = vmatpush.bf16.msra.mxu0 %v7392_v38  ;;  %v6532_v33 = vor.u32 %v9062_v27, %v6529_v28  ;;  %v9251_v38 = vld [vmem:[#allocation7 + $0x64c] sm:$0xf0]  ;;  %v7228_v27 = vor.u32 %v9236_v16, %v7225_v17  ;;  %v6913_v16 = vld [vmem:[#allocation7 + $0x380] sm:$0xf0] }
  0x9f   :  { %2335 = vmatpush.bf16.msra.mxu1 %v7584_v47  ;;  %v7272_v46 = vor.u32 %v9251_v38, %v7271_v34  ;;  %v6985_v34 = vld [vmem:[#allocation7 + $0x410] sm:$0xf0] }
  0xa0   :  { %2354 = vmatpush.bf16.msra.mxu2 %v6628_v39  ;;  %v9056_v39 = vld [vmem:[#allocation7 + $0x3c] sm:$0xf]  ;;  %v7561_v38 = vld [vmem:[#allocation7 + $0x890] sm:$0xf0] }
  0xa1   :  { %2373 = vmatpush.bf16.msra.mxu3 %v6820_v41  ;;  %v9104_v41 = vld [vmem:[#allocation7 + $0x1bc] sm:$0xf]  ;;  %v6508_v47 = vor.u32 %v9056_v39, %v6505_v40  ;;  %v7204_v39 = vor.u32 %v9230_v29, %v7201_v30 }
  0xa2   :  { %2317 = vmatpush.bf16.msra.mxu0 %v7368_v48  ;;  %v9050_v48 = vld [vmem:[#allocation7 + $0xc] sm:$0xf]  ;;  %v6700_v53 = vor.u32 %v9104_v41, %v6697_v42  ;;  %v9224_v41 = vld [vmem:[#allocation7 + $0x57c] sm:$0xf]  ;;  %v7177_v42 = vld [vmem:[#allocation7 + $0x590] sm:$0xf0] }
  0xa3   :  { %2336 = vmatpush.bf16.msra.mxu1 %v7560_v7  ;;  %v9332_v7 = vld [vmem:[#allocation7 + $0x8dc] sm:$0xf]  ;;  %v6484_v11 = vor.u32 %v9050_v48, %v6481_v56  ;;  %v7345_v48 = vld [vmem:[#allocation7 + $0x6e0] sm:$0xf0] }
  0xa4   :  { %2355 = vmatpush.bf16.msra.mxu2 %v6604_v49  ;;  %v7463_v49 = vld [vmem:[#allocation7 + $0x7b8] sm:$0xf] }
  0xa5   :  { %2374 = vmatpush.bf16.msra.mxu3 %v6796_v61  ;;  %v9098_v61 = vld [vmem:[#allocation7 + $0x18c] sm:$0xf] }
  0xa6   :  { %2318 = vmatpush.bf16.msra.mxu0 %v7344_v8  ;;  %v7609_v8 = vld [vmem:[#allocation7 + $0x8f0] sm:$0xf0]  ;;  %v6676_v14 = vor.u32 %v9098_v61, %v6673_v63  ;;  %v7180_v61 = vor.u32 %v9224_v41, %v7177_v42  ;;  %v7105_v41 = vld [vmem:[#allocation7 + $0x500] sm:$0xf0] }
  0xa7   :  { %2337 = vmatpush.bf16.msra.mxu1 %v7536_v19  ;;  %v7612_v19 = vor.u32 %v9332_v7, %v7609_v8  ;;  %v9260_v8 = vld [vmem:[#allocation7 + $0x69c] sm:$0xf]  ;;  %v7273_v42 = vld [vmem:[#allocation7 + $0x650] sm:$0xf0] }
  0xa8   :  { %2356 = vmatpush.bf16.msra.mxu2 %v6580_v9  ;;  %v7464_v9 = vor.u32 %v9299_v52, %v7463_v49  ;;  %v9314_v49 = vld [vmem:[#allocation7 + $0x84c] sm:$0xf]  ;;  %v7537_v52 = vld [vmem:[#allocation7 + $0x860] sm:$0xf0] }
  0xa9   :  { %2375 = vmatpush.bf16.msra.mxu3 %v6772_v13  ;;  %v9293_v13 = vld [vmem:[#allocation7 + $0x79c] sm:$0xf0]  ;;  %2252 = vmatmul.bf16.gmra.mxu0 %v9946_v50  ;;  %v7540_v7 = vor.u32 %v9314_v49, %v7537_v52 }
  0xaa   :  { %2319 = vmatpush.bf16.msra.mxu0 %v7320_v20  ;;  %2271 = vmatmul.bf16.gmra.mxu1 %v9948_v51  ;;  %v9182_v20 = vld [vmem:[#allocation7 + $0x42c] sm:$0xf]  ;;  %v7440_v26 = vor.u32 %v9293_v13, %v7439_v12  ;;  %v9308_v12 = vld [vmem:[#allocation7 + $0x81c] sm:$0xf]  ;;  %v7513_v13 = vld [vmem:[#allocation7 + $0x830] sm:$0xf0] }
  0xab   :  { %2338 = vmatpush.bf16.msra.mxu1 %v7512_v31  ;;  %2290 = vmatmul.bf16.gmra.mxu2 %v9950_v57  ;;  %v7396_v31 = vor.u32 %v9278_v22, %v7393_v23  ;;  %v7129_v22 = vld [vmem:[#allocation7 + $0x530] sm:$0xf0] }
  0xac   :  { %2357 = vmatpush.bf16.msra.mxu2 %v6556_v21  ;;  %v7009_v21 = vld [vmem:[#allocation7 + $0x440] sm:$0xf0]  ;;  %2309 = vmatmul.bf16.gmra.mxu3 %v9952_v58 }
  0xad   :  { %2376 = vmatpush.bf16.msra.mxu3 %v6748_v25  ;;  %v7585_v25 = vld [vmem:[#allocation7 + $0x8c0] sm:$0xf0]  ;;  %v7012_v28 = vor.u32 %v9182_v20, %v7009_v21  ;;  %v9254_v20 = vld [vmem:[#allocation7 + $0x66c] sm:$0xf]  ;;  %v9212_v21 = vld [vmem:[#allocation7 + $0x51c] sm:$0xf] }
  0xae   :  { %2320 = vmatpush.bf16.msra.mxu0 %v7296_v32  ;;  %v7588_v32 = vor.u32 %v9326_v24, %v7585_v25  ;;  %v7297_v25 = vld [vmem:[#allocation7 + $0x680] sm:$0xf0]  ;;  %v7132_v35 = vor.u32 %v9212_v21, %v7129_v22  ;;  %v6631_v22 = vld [vmem:[#allocation7 + $0x130] sm:$0xf] }
  0xaf   :  { %2339 = vmatpush.bf16.msra.mxu1 %v7488_v45  ;;  %v9170_v45 = vld [vmem:[#allocation7 + $0x3cc] sm:$0xf] }
  0xb0   :  { %2358 = vmatpush.bf16.msra.mxu2 %v6532_v33  ;;  %v9176_v33 = vld [vmem:[#allocation7 + $0x3fc] sm:$0xf] }
  0xb1   :  { %2377 = vmatpush.bf16.msra.mxu3 %v6724_v37  ;;  %v9320_v37 = vld [vmem:[#allocation7 + $0x87c] sm:$0xf]  ;;  %v6988_v40 = vor.u32 %v9176_v33, %v6985_v34  ;;  %v6889_v34 = vld [vmem:[#allocation7 + $0x350] sm:$0xf0] }
  0xb2   :  { %2321 = vmatpush.bf16.msra.mxu0 %v7272_v46  ;;  %v7564_v44 = vor.u32 %v9320_v37, %v7561_v38  ;;  %v6961_v46 = vld [vmem:[#allocation7 + $0x3e0] sm:$0xf0]  ;;  %v9152_v33 = vld [vmem:[#allocation7 + $0x33c] sm:$0xf]  ;;  %v7300_v37 = vor.u32 %v9254_v20, %v7297_v25  ;;  %v9090_v25 = vld [vmem:[#allocation7 + $0x144] sm:$0xf0] }
  0xb3   :  { %2340 = vmatpush.bf16.msra.mxu1 %v7464_v9  ;;  %v6964_v1 = vor.u32 %v9170_v45, %v6961_v46  ;;  %v9218_v9 = vld [vmem:[#allocation7 + $0x54c] sm:$0xf]  ;;  %v6892_v45 = vor.u32 %v9152_v33, %v6889_v34  ;;  %v6847_v33 = vld [vmem:[#allocation7 + $0x2e0] sm:$0xf]  ;;  %v9144_v34 = vld [vmem:[#allocation7 + $0x2f4] sm:$0xf0] }
  0xb4   :  { %2359 = vmatpush.bf16.msra.mxu2 %v6508_v47  ;;  %v9266_v47 = vld [vmem:[#allocation7 + $0x6cc] sm:$0xf] }
  0xb5   :  { %2378 = vmatpush.bf16.msra.mxu3 %v6700_v53  ;;  %v7348_v6 = vor.u32 %v9266_v47, %v7345_v48  ;;  %v9146_v46 = vld [vmem:[#allocation7 + $0x30c] sm:$0xf]  ;;  %v6865_v47 = vld [vmem:[#allocation7 + $0x320] sm:$0xf0] }
  0xb6   :  { %2322 = vmatpush.bf16.msra.mxu0 %v7248_v10  ;;  %v2020_v53 = vpop.f32.mrf.mxu0  ;;  %v7153_v10 = vld [vmem:[#allocation7 + $0x560] sm:$0xf0]  ;;  %v9242_v48 = vld [vmem:[#allocation7 + $0x60c] sm:$0xf] }
  0xb7   :  { %2341 = vmatpush.bf16.msra.mxu1 %v7440_v26  ;;  %v2039_v56 = vpop.f32.mrf.mxu1  ;;  %v7156_v17 = vor.u32 %v9218_v9, %v7153_v10  ;;  %v9302_v26 = vld [vmem:[#allocation7 + $0x7ec] sm:$0xf] }
  0xb8   :  { %2360 = vmatpush.bf16.msra.mxu2 %v6484_v11  ;;  %v2040_v63 = vadd.f32 %v2039_v56, %v2020_v53  ;;  %v7321_v11 = vld [vmem:[#allocation7 + $0x6b0] sm:$0xf0]  ;;  %v7249_v56 = vld [vmem:[#allocation7 + $0x620] sm:$0xf0] }
  0xb9   :  { %2379 = vmatpush.bf16.msra.mxu3 %v6676_v14  ;;  %v6940_v14 = vor.u32 %v9164_v2, %v6937_v5  ;;  %2323 = vmatmul.bf16.vlgmr.msra.gmra.mxu0 %v9958_v0  ;;  %v9290_v5 = vld [vmem:[#allocation7 + $0x78c] sm:$0xf]  ;;  %v7252_v20 = vor.u32 %v9242_v48, %v7249_v56  ;;  %v9180_v48 = vld [vmem:[#allocation7 + $0x414] sm:$0xf0]  ;;  %v6823_v56 = vld [vmem:[#allocation7 + $0x2b0] sm:$0xf] }
  0xba   :  { %2391 = vmatpush.bf16.msrb.mxu0 %v7036_v15  ;;  %v9158_v15 = vld [vmem:[#allocation7 + $0x36c] sm:$0xf]  ;;  %2342 = vmatmul.bf16.vlgmr.msra.gmra.mxu1 %v9960_v4 }
  0xbb   :  { %2410 = vmatpush.bf16.msrb.mxu1 %v7228_v27  ;;  %v7489_v27 = vld [vmem:[#allocation7 + $0x800] sm:$0xf0]  ;;  %2361 = vmatmul.bf16.vlgmr.msra.gmra.mxu2 %v9934_v54 }
  0xbc   :  { %2429 = vmatpush.bf16.msrb.mxu2 %v7420_v18  ;;  %v7324_v18 = vor.u32 %v9260_v8, %v7321_v11  ;;  %2380 = vmatmul.bf16.vlgmr.msra.gmra.mxu3 %v9936_v55  ;;  %v7492_v38 = vor.u32 %v9302_v26, %v7489_v27  ;;  %v9096_v11 = vld [vmem:[#allocation7 + $0x174] sm:$0xf0]  ;;  %v9194_v26 = vld [vmem:[#allocation7 + $0x48c] sm:$0xf]  ;;  %v7057_v27 = vld [vmem:[#allocation7 + $0x4a0] sm:$0xf0] }
  0xbd   :  { %2448 = vmatpush.bf16.msrb.mxu3 %v7612_v19  ;;  %v7516_v19 = vor.u32 %v9308_v12, %v7513_v13  ;;  %v7039_v12 = vld [vmem:[#allocation7 + $0x460] sm:$0xf]  ;;  %v9192_v13 = vld [vmem:[#allocation7 + $0x474] sm:$0xf0] }
  0xbe   :  { %2392 = vmatpush.bf16.msrb.mxu0 %v7012_v28  ;;  %v2058_v23 = vpop.f32.mrf.mxu2  ;;  %v2022_v29 = vpop.f32.mrf.mxu0 }
  0xbf   :  { %2411 = vmatpush.bf16.msrb.mxu1 %v7204_v39  ;;  %v2077_v24 = vpop.f32.mrf.mxu3  ;;  %v2059_v28 = vadd.f32 %v2058_v23, %v2040_v63  ;;  %v2041_v30 = vpop.f32.mrf.mxu1  ;;  %v9248_v39 = vld [vmem:[#allocation7 + $0x63c] sm:$0xf]  ;;  %v7081_v63 = vld [vmem:[#allocation7 + $0x4d0] sm:$0xf0] }
  0xc0   :  { %2430 = vmatpush.bf16.msrb.mxu2 %v7396_v31  ;;  %v2042_v31 = vadd.f32 %v2041_v30, %v2022_v29  ;;  %v7276_v52 = vor.u32 %v9248_v39, %v7273_v42  ;;  %v7015_v29 = vld [vmem:[#allocation7 + $0x430] sm:$0xf]  ;;  %v9186_v30 = vld [vmem:[#allocation7 + $0x444] sm:$0xf0]  ;;  %v6632_v39 = vor.u32 %v9090_v25, %v6631_v22  ;;  %v9084_v42 = vld [vmem:[#allocation7 + $0x114] sm:$0xf0] }
  0xc1   :  { %2449 = vmatpush.bf16.msrb.mxu3 %v7588_v32  ;;  %v6916_v32 = vor.u32 %v9158_v15, %v6913_v16  ;;  %v9994_v36 = vadd.f32 %v2077_v24, %v2059_v28  ;;  %v6868_v15 = vor.u32 %v9146_v46, %v6865_v47  ;;  %v7231_v16 = vld [vmem:[#allocation7 + $0x5e0] sm:$0xf]  ;;  %v7040_v24 = vor.u32 %v9192_v13, %v7039_v12  ;;  %v9222_v12 = vld [vmem:[#allocation7 + $0x564] sm:$0xf0] }
  0xc2   :  { %2393 = vmatpush.bf16.msrb.mxu0 %v6988_v40  ;;  %v9206_v40 = vld [vmem:[#allocation7 + $0x4ec] sm:$0xf]  ;;  %v6991_v47 = vld [vmem:[#allocation7 + $0x400] sm:$0xf] }
  0xc3   :  { %2412 = vmatpush.bf16.msrb.mxu1 %v7180_v61  ;;  %v7108_v49 = vor.u32 %v9206_v40, %v7105_v41  ;;  %v9200_v61 = vld [vmem:[#allocation7 + $0x4bc] sm:$0xf]  ;;  %v7016_v40 = vor.u32 %v9186_v30, %v7015_v29  ;;  %v6607_v41 = vld [vmem:[#allocation7 + $0x100] sm:$0xf]  ;;  %v9216_v30 = vld [vmem:[#allocation7 + $0x534] sm:$0xf0] }
  0xc4   :  { %2431 = vmatpush.bf16.msrb.mxu2 %v7372_v43  ;;  %v9296_v43 = vld [vmem:[#allocation7 + $0x7bc] sm:$0xf]  ;;  %v6799_v13 = vld [vmem:[#allocation7 + $0x280] sm:$0xf] }
  0xc5   :  { %2450 = vmatpush.bf16.msrb.mxu3 %v7564_v44  ;;  %v7465_v44 = vld [vmem:[#allocation7 + $0x7d0] sm:$0xf0]  ;;  %v6943_v25 = vld [vmem:[#allocation7 + $0x3a0] sm:$0xf] }
  0xc6   :  { %2394 = vmatpush.bf16.msrb.mxu0 %v6964_v1  ;;  %v7468_v53 = vor.u32 %v9296_v43, %v7465_v44  ;;  %v2060_v1 = vpop.f32.mrf.mxu2  ;;  %v2025_v9 = vpop.f32.mrf.mxu0  ;;  %v7135_v29 = vld [vmem:[#allocation7 + $0x520] sm:$0xf] }
  0xc7   :  { %2413 = vmatpush.bf16.msrb.mxu1 %v7156_v17  ;;  %v2079_v2 = vpop.f32.mrf.mxu3  ;;  %v2061_v8 = vadd.f32 %v2060_v1, %v2042_v31  ;;  %v2044_v10 = vpop.f32.mrf.mxu1  ;;  %v9240_v17 = vld [vmem:[#allocation7 + $0x5f4] sm:$0xf0]  ;;  %v7207_v31 = vld [vmem:[#allocation7 + $0x5b0] sm:$0xf]  ;;  %v6608_v1 = vor.u32 %v9084_v42, %v6607_v41  ;;  %v7136_v41 = vor.u32 %v9216_v30, %v7135_v29  ;;  %v9066_v42 = vld [vmem:[#allocation7 + $0x84] sm:$0xf0] }
  0xc8   :  { %2432 = vmatpush.bf16.msrb.mxu2 %v7348_v6  ;;  %v7441_v6 = vld [vmem:[#allocation7 + $0x7a0] sm:$0xf0]  ;;  %v7232_v28 = vor.u32 %v9240_v17, %v7231_v16  ;;  %v6657_v30 = vld [vmem:[#allocation7 + $0x178] sm:$0xf0] }
  0xc9   :  { %2451 = vmatpush.bf16.msrb.mxu3 %v7540_v7  ;;  %v6655_v7 = vld [vmem:[#allocation7 + $0x160] sm:$0xf]  ;;  %v7444_v21 = vor.u32 %v9290_v5, %v7441_v6  ;;  %2328 = vmatmul.bf16.gmra.mxu0 %v9966_v62  ;;  %v6583_v5 = vld [vmem:[#allocation7 + $0xd0] sm:$0xf]  ;;  %v9078_v6 = vld [vmem:[#allocation7 + $0xe4] sm:$0xf0] }
  0xca   :  { %2395 = vmatpush.bf16.msrb.mxu0 %v6940_v14  ;;  %v2045_v14 = vadd.f32 %v2044_v10, %v2025_v9  ;;  %v6656_v23 = vor.u32 %v9096_v11, %v6655_v7  ;;  %2347 = vmatmul.bf16.gmra.mxu1 %v9968_v3  ;;  %v9174_v9 = vld [vmem:[#allocation7 + $0x3e4] sm:$0xf0]  ;;  %v7159_v10 = vld [vmem:[#allocation7 + $0x550] sm:$0xf] }
  0xcb   :  { %2414 = vmatpush.bf16.msrb.mxu1 %v7132_v35  ;;  %v7060_v35 = vor.u32 %v9194_v26, %v7057_v27  ;;  %2366 = vmatmul.bf16.gmra.mxu2 %v9946_v50  ;;  %v9168_v26 = vld [vmem:[#allocation7 + $0x3b4] sm:$0xf0] }
  0xcc   :  { %2433 = vmatpush.bf16.msrb.mxu2 %v7324_v18  ;;  %v7084_v18 = vor.u32 %v9200_v61, %v7081_v63  ;;  %v9138_v61 = vld [vmem:[#allocation7 + $0x2c4] sm:$0xf0]  ;;  %2385 = vmatmul.bf16.gmra.mxu3 %v9948_v51 }
  0xcd   :  { %2452 = vmatpush.bf16.msrb.mxu3 %v7516_v19  ;;  %v9996_v19 = vadd.f32 %v2079_v2, %v2061_v8  ;;  %v6992_v2 = vor.u32 %v9180_v48, %v6991_v47  ;;  %v6967_v8 = vld [vmem:[#allocation7 + $0x3d0] sm:$0xf]  ;;  %v6824_v11 = vor.u32 %v9138_v61, %v6823_v56 }
  0xce   :  { %2396 = vmatpush.bf16.msrb.mxu0 %v6916_v32  ;;  %v9234_v32 = vld [vmem:[#allocation7 + $0x5c4] sm:$0xf0] }
  0xcf   :  { %2415 = vmatpush.bf16.msrb.mxu1 %v7108_v49  ;;  %v7208_v44 = vor.u32 %v9234_v32, %v7207_v31  ;;  %v2046_v46 = vpop.f32.mrf.mxu1  ;;  %v7183_v49 = vld [vmem:[#allocation7 + $0x580] sm:$0xf] }
  0xd0   :  { %2434 = vmatpush.bf16.msrb.mxu2 %v7300_v37  ;;  %v2063_v37 = vpop.f32.mrf.mxu2 }
  0xd1   :  { %2453 = vmatpush.bf16.msrb.mxu3 %v7492_v38  ;;  %v2082_v38 = vpop.f32.mrf.mxu3  ;;  %v2064_v43 = vadd.f32 %v2063_v37, %v2045_v14  ;;  %v9132_v14 = vld [vmem:[#allocation7 + $0x294] sm:$0xf0]  ;;  %v6535_v37 = vld [vmem:[#allocation7 + $0x70] sm:$0xf] }
  0xd2   :  { %2397 = vmatpush.bf16.msrb.mxu0 %v6892_v45  ;;  %v2027_v45 = vpop.f32.mrf.mxu0  ;;  %v6800_v27 = vor.u32 %v9132_v14, %v6799_v13  ;;  %v6487_v13 = vld [vmem:[#allocation7 + $0x10] sm:$0xf]  ;;  %v9054_v14 = vld [vmem:[#allocation7 + $0x24] sm:$0xf0] }
  0xd3   :  { %2416 = vmatpush.bf16.msrb.mxu1 %v7084_v18  ;;  %v10002_v63 = vadd.f32 %v2082_v38, %v2064_v43  ;;  %v6584_v18 = vor.u32 %v9078_v6, %v6583_v5  ;;  %v6775_v38 = vld [vmem:[#allocation7 + $0x250] sm:$0xf]  ;;  %v9156_v5 = vld [vmem:[#allocation7 + $0x354] sm:$0xf0] }
  0xd4   :  { %2435 = vmatpush.bf16.msrb.mxu2 %v7276_v52  ;;  %v6848_v52 = vor.u32 %v9144_v34, %v6847_v33  ;;  %v6919_v43 = vld [vmem:[#allocation7 + $0x370] sm:$0xf] }
  0xd5   :  { %2454 = vmatpush.bf16.msrb.mxu3 %v7468_v53  ;;  %v9228_v53 = vld [vmem:[#allocation7 + $0x594] sm:$0xf0] }
  0xd6   :  { %2398 = vmatpush.bf16.msrb.mxu0 %v6868_v15  ;;  %v7184_v7 = vor.u32 %v9228_v53, %v7183_v49  ;;  %v2047_v15 = vadd.f32 %v2046_v46, %v2027_v45  ;;  %v7111_v45 = vld [vmem:[#allocation7 + $0x4f0] sm:$0xf]  ;;  %v9210_v46 = vld [vmem:[#allocation7 + $0x504] sm:$0xf0]  ;;  %v6511_v49 = vld [vmem:[#allocation7 + $0x40] sm:$0xf] }
  0xd7   :  { %2417 = vmatpush.bf16.msrb.mxu1 %v7060_v35  ;;  %v2115_v33 = vpop.f32.mrf.mxu1  ;;  %v6944_v35 = vor.u32 %v9168_v26, %v6943_v25  ;;  %v9120_v53 = vld [vmem:[#allocation7 + $0x234] sm:$0xf0]  ;;  %v7112_v61 = vor.u32 %v9210_v46, %v7111_v45  ;;  %v7063_v25 = vld [vmem:[#allocation7 + $0x490] sm:$0xf]  ;;  %v9198_v26 = vld [vmem:[#allocation7 + $0x4a4] sm:$0xf0] }
  0xd8   :  { %2436 = vmatpush.bf16.msrb.mxu2 %v7252_v20  ;;  %v2065_v16 = vpop.f32.mrf.mxu2  ;;  %v6968_v20 = vor.u32 %v9174_v9, %v6967_v8  ;;  %v7087_v8 = vld [vmem:[#allocation7 + $0x4c0] sm:$0xf]  ;;  %v9204_v9 = vld [vmem:[#allocation7 + $0x4d4] sm:$0xf0] }
  0xd9   :  { %2455 = vmatpush.bf16.msrb.mxu3 %v7444_v21  ;;  %v2084_v17 = vpop.f32.mrf.mxu3  ;;  %v6559_v21 = vld [vmem:[#allocation7 + $0xa0] sm:$0xf]  ;;  %v2066_v22 = vadd.f32 %v2065_v16, %v2047_v15  ;;  %2399 = vmatmul.bf16.vlgmr.msrb.gmra.mxu0 %v9938_v59 }
  0xda   :  { %2467 = vmatpush.bf16.msra.mxu0 %v6656_v23  ;;  %v7160_v23 = vor.u32 %v9222_v12, %v7159_v10  ;;  %2418 = vmatmul.bf16.vlgmr.msrb.gmra.mxu1 %v9940_v60 }
  0xdb   :  { %2486 = vmatpush.bf16.msra.mxu1 %v6848_v52  ;;  %v10004_v31 = vadd.f32 %v2084_v17, %v2066_v22  ;;  %v6751_v52 = vld [vmem:[#allocation7 + $0x220] sm:$0xf]  ;;  %2437 = vmatmul.bf16.vlgmr.msrb.gmra.mxu2 %v9958_v0 }
  0xdc   :  { %2505 = vmatpush.bf16.msra.mxu2 %v7040_v24  ;;  %v9072_v24 = vld [vmem:[#allocation7 + $0xb4] sm:$0xf0]  ;;  %2456 = vmatmul.bf16.vlgmr.msrb.gmra.mxu3 %v9960_v4  ;;  %v6752_v15 = vor.u32 %v9120_v53, %v6751_v52  ;;  %v7399_v52 = vld [vmem:[#allocation7 + $0x730] sm:$0xf]  ;;  %v9282_v53 = vld [vmem:[#allocation7 + $0x744] sm:$0xf0] }
  0xdd   :  { %2524 = vmatpush.bf16.msra.mxu3 %v7232_v28  ;;  %v2096_v28 = vpop.f32.mrf.mxu0  ;;  %v6560_v34 = vor.u32 %v9072_v24, %v6559_v21  ;;  %v9114_v21 = vld [vmem:[#allocation7 + $0x204] sm:$0xf0] }
  0xde   :  { %2468 = vmatpush.bf16.msra.mxu0 %v6632_v39  ;;  %v2097_v32 = vadd.f32 %v2096_v28, %v9994_v36  ;;  %v9126_v39 = vld [vmem:[#allocation7 + $0x264] sm:$0xf0]  ;;  %v6536_v36 = vor.u32 %v9066_v42, %v6535_v37  ;;  %v9093_v28 = vld [vmem:[#allocation7 + $0x164] sm:$0xf]  ;;  %v7064_v42 = vor.u32 %v9198_v26, %v7063_v25 }
  0xdf   :  { %2487 = vmatpush.bf16.msra.mxu1 %v6824_v11  ;;  %v6776_v47 = vor.u32 %v9126_v39, %v6775_v38  ;;  %v2117_v12 = vpop.f32.mrf.mxu1  ;;  %v9150_v24 = vld [vmem:[#allocation7 + $0x324] sm:$0xf0]  ;;  %v6703_v38 = vld [vmem:[#allocation7 + $0x1c0] sm:$0xf]  ;;  %v9108_v39 = vld [vmem:[#allocation7 + $0x1d4] sm:$0xf0]  ;;  %v6660_v45 = vor.u32 %v9093_v28, %v6657_v30 }
  0xe0   :  { %2506 = vmatpush.bf16.msra.mxu2 %v7016_v40  ;;  %v2116_v40 = vadd.f32 %v2115_v33, %v2097_v32  ;;  %v2134_v56 = vpop.f32.mrf.mxu2  ;;  %v9141_v32 = vld [vmem:[#allocation7 + $0x2e4] sm:$0xf]  ;;  %v6849_v33 = vld [vmem:[#allocation7 + $0x2f8] sm:$0xf0]  ;;  %v7591_v28 = vld [vmem:[#allocation7 + $0x8b0] sm:$0xf] }
  0xe1   :  { %2525 = vmatpush.bf16.msra.mxu3 %v7208_v44  ;;  %v9162_v44 = vld [vmem:[#allocation7 + $0x384] sm:$0xf0]  ;;  %v2153_v6 = vpop.f32.mrf.mxu3  ;;  %v6852_v46 = vor.u32 %v9141_v32, %v6849_v33 }
  0xe2   :  { %2469 = vmatpush.bf16.msra.mxu0 %v6608_v1  ;;  %v6920_v48 = vor.u32 %v9162_v44, %v6919_v43  ;;  %v9060_v1 = vld [vmem:[#allocation7 + $0x54] sm:$0xf0]  ;;  %v10011_v10 = vadd.f32 %v2153_v6, %v2134_v56  ;;  %v9087_v56 = vld [vmem:[#allocation7 + $0x134] sm:$0xf]  ;;  %v6679_v6 = vld [vmem:[#allocation7 + $0x190] sm:$0xf] }
  0xe3   :  { %2488 = vmatpush.bf16.msra.mxu1 %v6800_v27  ;;  %v6512_v16 = vor.u32 %v9060_v1, %v6511_v49  ;;  %v7423_v27 = vld [vmem:[#allocation7 + $0x760] sm:$0xf]  ;;  %v6704_v49 = vor.u32 %v9108_v39, %v6703_v38  ;;  %v6633_v1 = vld [vmem:[#allocation7 + $0x148] sm:$0xf0]  ;;  %v9330_v30 = vld [vmem:[#allocation7 + $0x8c4] sm:$0xf0] }
  0xe4   :  { %2507 = vmatpush.bf16.msra.mxu2 %v6992_v2  ;;  %v6895_v2 = vld [vmem:[#allocation7 + $0x340] sm:$0xf]  ;;  %v6585_v39 = vld [vmem:[#allocation7 + $0xe8] sm:$0xf0] }
  0xe5   :  { %2526 = vmatpush.bf16.msra.mxu3 %v7184_v7  ;;  %v2098_v7 = vpop.f32.mrf.mxu0  ;;  %v6896_v17 = vor.u32 %v9156_v5, %v6895_v2  ;;  %v9135_v2 = vld [vmem:[#allocation7 + $0x2b4] sm:$0xf]  ;;  %v6825_v5 = vld [vmem:[#allocation7 + $0x2c8] sm:$0xf0] }
  0xe6   :  { %2470 = vmatpush.bf16.msra.mxu0 %v6584_v18  ;;  %v2099_v11 = vadd.f32 %v2098_v7, %v9996_v19  ;;  %v6871_v18 = vld [vmem:[#allocation7 + $0x310] sm:$0xf]  ;;  %v9288_v19 = vld [vmem:[#allocation7 + $0x774] sm:$0xf0]  ;;  %v9102_v7 = vld [vmem:[#allocation7 + $0x1a4] sm:$0xf0] }
  0xe7   :  { %2489 = vmatpush.bf16.msra.mxu1 %v6776_v47  ;;  %v6872_v37 = vor.u32 %v9150_v24, %v6871_v18  ;;  %v7424_v43 = vor.u32 %v9288_v19, %v7423_v27  ;;  %v9129_v18 = vld [vmem:[#allocation7 + $0x284] sm:$0xf] }
  0xe8   :  { %2508 = vmatpush.bf16.msra.mxu2 %v6968_v20  ;;  %v6727_v20 = vld [vmem:[#allocation7 + $0x1f0] sm:$0xf]  ;;  %v2118_v22 = vadd.f32 %v2117_v12, %v2099_v11  ;;  %v6636_v11 = vor.u32 %v9087_v56, %v6633_v1  ;;  %v6828_v12 = vor.u32 %v9135_v2, %v6825_v5  ;;  %v6561_v56 = vld [vmem:[#allocation7 + $0xb8] sm:$0xf0]  ;;  %v9117_v1 = vld [vmem:[#allocation7 + $0x224] sm:$0xf] }
  0xe9   :  { %2527 = vmatpush.bf16.msra.mxu3 %v7160_v23  ;;  %v7088_v23 = vor.u32 %v9204_v9, %v7087_v8  ;;  %v2155_v44 = vpop.f32.mrf.mxu3  ;;  %v7400_v8 = vor.u32 %v9282_v53, %v7399_v52  ;;  %v9336_v9 = vld [vmem:[#allocation7 + $0x8f4] sm:$0xf0]  ;;  %2404 = vmatmul.bf16.gmra.mxu0 %v9950_v57  ;;  %v9069_v52 = vld [vmem:[#allocation7 + $0xa4] sm:$0xf]  ;;  %v6753_v2 = vld [vmem:[#allocation7 + $0x238] sm:$0xf0] }
  0xea   :  { %2471 = vmatpush.bf16.msra.mxu0 %v6560_v34  ;;  %v10014_v29 = vpack.c.bf16 %v2118_v22, %v2116_v40  ;;  %v6728_v34 = vor.u32 %v9114_v21, %v6727_v20  ;;  %v6801_v20 = vld [vmem:[#allocation7 + $0x298] sm:$0xf0]  ;;  %v6680_v21 = vor.u32 %v9102_v7, %v6679_v6  ;;  %2423 = vmatmul.bf16.gmra.mxu1 %v9952_v58 }
  0xeb   :  { %2490 = vmatpush.bf16.msra.mxu1 %v6752_v15  ;;  %v9081_v15 = vld [vmem:[#allocation7 + $0x104] sm:$0xf]  ;;  %2442 = vmatmul.bf16.gmra.mxu2 %v9966_v62  ;;  %v6804_v33 = vor.u32 %v9129_v18, %v6801_v20  ;;  %v6729_v18 = vld [vmem:[#allocation7 + $0x208] sm:$0xf0]  ;;  %v7543_v20 = vld [vmem:[#allocation7 + $0x850] sm:$0xf] }
  0xec   :  { %2509 = vmatpush.bf16.msra.mxu2 %v6944_v35  ;;  %v6488_v35 = vor.u32 %v9054_v14, %v6487_v13  ;;  %v7375_v13 = vld [vmem:[#allocation7 + $0x700] sm:$0xf]  ;;  %v9276_v14 = vld [vmem:[#allocation7 + $0x714] sm:$0xf0]  ;;  %2461 = vmatmul.bf16.gmra.mxu3 %v9968_v3 }
  0xed   :  { %2528 = vmatpush.bf16.msra.mxu3 %v7136_v41  ;;  %v2136_v41 = vpop.f32.mrf.mxu2  ;;  %v2101_v40 = vpop.f32.mrf.mxu0  ;;  %v7376_v26 = vor.u32 %v9276_v14, %v7375_v13  ;;  %v9258_v13 = vld [vmem:[#allocation7 + $0x684] sm:$0xf0]  ;;  %v9063_v14 = vld [vmem:[#allocation7 + $0x74] sm:$0xf] }
  0xee   :  { %2472 = vmatpush.bf16.msra.mxu0 %v6536_v36  ;;  %v10016_v47 = vadd.f32 %v2155_v44, %v2136_v41  ;;  %v2102_v36 = vadd.f32 %v2101_v40, %v10002_v63  ;;  %v7615_v63 = vld [vmem:[#allocation7 + $0x8e0] sm:$0xf]  ;;  %v9123_v41 = vld [vmem:[#allocation7 + $0x254] sm:$0xf] }
  0xef   :  { %2491 = vmatpush.bf16.msra.mxu1 %v6728_v34  ;;  %v7616_v24 = vor.u32 %v9336_v9, %v7615_v63  ;;  %v7351_v34 = vld [vmem:[#allocation7 + $0x6d0] sm:$0xf]  ;;  %v6564_v9 = vor.u32 %v9069_v52, %v6561_v56  ;;  %v9099_v52 = vld [vmem:[#allocation7 + $0x194] sm:$0xf]  ;;  %v6681_v56 = vld [vmem:[#allocation7 + $0x1a8] sm:$0xf0] }
  0xf0   :  { %2510 = vmatpush.bf16.msra.mxu2 %v6920_v48  ;;  %v2120_v48 = vpop.f32.mrf.mxu1 }
  0xf1   :  { %2529 = vmatpush.bf16.msra.mxu3 %v7112_v61  ;;  %v2121_v61 = vadd.f32 %v2120_v48, %v2102_v36  ;;  %v2158_v22 = vpop.f32.mrf.mxu3  ;;  %v7327_v48 = vld [vmem:[#allocation7 + $0x6a0] sm:$0xf] }
  0xf2   :  { %2473 = vmatpush.bf16.msra.mxu0 %v6512_v16 }
  0xf3   :  { %2492 = vmatpush.bf16.msra.mxu1 %v6704_v49  ;;  %v9264_v49 = vld [vmem:[#allocation7 + $0x6b4] sm:$0xf0] }
  0xf4   :  { %2511 = vmatpush.bf16.msra.mxu2 %v6896_v17  ;;  %v6609_v17 = vld [vmem:[#allocation7 + $0x118] sm:$0xf0]  ;;  %v7328_v7 = vor.u32 %v9264_v49, %v7327_v48  ;;  %v9051_v48 = vld [vmem:[#allocation7 + $0x14] sm:$0xf]  ;;  %v6489_v49 = vld [vmem:[#allocation7 + $0x28] sm:$0xf0] }
  0xf5   :  { %2530 = vmatpush.bf16.msra.mxu3 %v7088_v23  ;;  %v2139_v16 = vpop.f32.mrf.mxu2  ;;  %v2103_v23 = vpop.f32.mrf.mxu0  ;;  %v6612_v32 = vor.u32 %v9081_v15, %v6609_v17  ;;  %v9111_v17 = vld [vmem:[#allocation7 + $0x1f4] sm:$0xf] }
  0xf6   :  { %2474 = vmatpush.bf16.msra.mxu0 %v6488_v35  ;;  %v10023_v25 = vadd.f32 %v2158_v22, %v2139_v16  ;;  %v2104_v27 = vadd.f32 %v2103_v23, %v10004_v31  ;;  %v9270_v35 = vld [vmem:[#allocation7 + $0x6e4] sm:$0xf0]  ;;  %v6537_v16 = vld [vmem:[#allocation7 + $0x88] sm:$0xf0]  ;;  %v7279_v23 = vld [vmem:[#allocation7 + $0x640] sm:$0xf] }
  0xf7   :  { %2493 = vmatpush.bf16.msra.mxu1 %v6680_v21  ;;  %v7352_v31 = vor.u32 %v9270_v35, %v7351_v34  ;;  %v9318_v21 = vld [vmem:[#allocation7 + $0x864] sm:$0xf0] }
  0xf8   :  { %2512 = vmatpush.bf16.msra.mxu2 %v6872_v37  ;;  %v2122_v19 = vpop.f32.mrf.mxu1  ;;  %v9075_v37 = vld [vmem:[#allocation7 + $0xd4] sm:$0xf] }
  0xf9   :  { %2531 = vmatpush.bf16.msra.mxu3 %v7064_v42  ;;  %v2123_v38 = vadd.f32 %v2122_v19, %v2104_v27  ;;  %v6777_v42 = vld [vmem:[#allocation7 + $0x268] sm:$0xf0]  ;;  %v6588_v40 = vor.u32 %v9075_v37, %v6585_v39  ;;  %v10030_v5 = vpop.f32.mrf.mxu3  ;;  %v9057_v27 = vld [vmem:[#allocation7 + $0x44] sm:$0xf]  ;;  %v6513_v19 = vld [vmem:[#allocation7 + $0x58] sm:$0xf0]  ;;  %2475 = vmatmul.bf16.vlgmr.msra.gmra.mxu0 %v9934_v54 }
  0xfa   :  { %2543 = vmatpush.bf16.msrb.mxu0 %v7424_v43  ;;  %v7592_v43 = vor.u32 %v9330_v30, %v7591_v28  ;;  %v6780_v36 = vor.u32 %v9123_v41, %v6777_v42  ;;  %v9105_v30 = vld [vmem:[#allocation7 + $0x1c4] sm:$0xf]  ;;  %2494 = vmatmul.bf16.vlgmr.msra.gmra.mxu1 %v9936_v55  ;;  %v9312_v39 = vld [vmem:[#allocation7 + $0x834] sm:$0xf0]  ;;  %v6516_v42 = vor.u32 %v9057_v27, %v6513_v19 }
  0xfb   :  { %2562 = vmatpush.bf16.msrb.mxu1 %v7616_v24  ;;  %v10026_v44 = vpack.c.bf16 %v2123_v38, %v2121_v61  ;;  %v6732_v24 = vor.u32 %v9111_v17, %v6729_v18  ;;  %2513 = vmatmul.bf16.vlgmr.msra.gmra.mxu2 %v9938_v59  ;;  %v7519_v38 = vld [vmem:[#allocation7 + $0x820] sm:$0xf]  ;;  %v9183_v18 = vld [vmem:[#allocation7 + $0x434] sm:$0xf] }
  0xfc   :  { %2581 = vmatpush.bf16.msrb.mxu2 %v6660_v45  ;;  %v7567_v45 = vld [vmem:[#allocation7 + $0x880] sm:$0xf]  ;;  %2532 = vmatmul.bf16.vlgmr.msra.gmra.mxu3 %v9940_v60 }
  0xfd   :  { %2600 = vmatpush.bf16.msrb.mxu3 %v6852_v46  ;;  %v9324_v46 = vld [vmem:[#allocation7 + $0x894] sm:$0xf0]  ;;  %v10028_v53 = vpop.f32.mrf.mxu2  ;;  %v2172_v6 = vpop.f32.mrf.mxu0 }
  0xfe   :  { %2544 = vmatpush.bf16.msrb.mxu0 %v7400_v8  ;;  %v7568_v61 = vor.u32 %v9324_v46, %v7567_v45  ;;  %v2173_v8 = vadd.f32 %v2172_v6, %v10011_v10  ;;  %v6540_v10 = vor.u32 %v9063_v14, %v6537_v16  ;;  %v9246_v45 = vld [vmem:[#allocation7 + $0x624] sm:$0xf0]  ;;  %v7520_v6 = vor.u32 %v9312_v39, %v7519_v38  ;;  %v9300_v38 = vld [vmem:[#allocation7 + $0x7d4] sm:$0xf0] }
  0xff   :  { %2563 = vmatpush.bf16.msrb.mxu1 %v7592_v43  ;;  %v6684_v14 = vor.u32 %v9099_v52, %v6681_v56 }
 0x100   :  { %2582 = vmatpush.bf16.msrb.mxu2 %v6636_v11  ;;  %v2191_v63 = vpop.f32.mrf.mxu1  ;;  %v6756_v11 = vor.u32 %v9117_v1, %v6753_v2  ;;  %v9189_v1 = vld [vmem:[#allocation7 + $0x464] sm:$0xf]  ;;  %v7041_v2 = vld [vmem:[#allocation7 + $0x478] sm:$0xf0] }
 0x101   :  { %2601 = vmatpush.bf16.msrb.mxu3 %v6828_v12  ;;  %v7303_v12 = vld [vmem:[#allocation7 + $0x670] sm:$0xf]  ;;  %v2192_v15 = vadd.f32 %v2191_v63, %v2173_v8  ;;  %v2229_v35 = vpop.f32.mrf.mxu3  ;;  %v9333_v8 = vld [vmem:[#allocation7 + $0x8e4] sm:$0xf] }
 0x102   :  { %2545 = vmatpush.bf16.msrb.mxu0 %v7376_v26  ;;  %v7304_v22 = vor.u32 %v9258_v13, %v7303_v12  ;;  %v9252_v26 = vld [vmem:[#allocation7 + $0x654] sm:$0xf0]  ;;  %v9306_v12 = vld [vmem:[#allocation7 + $0x804] sm:$0xf0] }
 0x103   :  { %2564 = vmatpush.bf16.msrb.mxu1 %v7568_v61  ;;  %v7280_v41 = vor.u32 %v9252_v26, %v7279_v23  ;;  %v9285_v61 = vld [vmem:[#allocation7 + $0x764] sm:$0xf]  ;;  %v7401_v26 = vld [vmem:[#allocation7 + $0x748] sm:$0xf0] }
 0x104   :  { %2583 = vmatpush.bf16.msrb.mxu2 %v6612_v32  ;;  %v6705_v32 = vld [vmem:[#allocation7 + $0x1d8] sm:$0xf0] }
 0x105   :  { %2602 = vmatpush.bf16.msrb.mxu3 %v6804_v33  ;;  %v2210_v28 = vpop.f32.mrf.mxu2  ;;  %v7544_v33 = vor.u32 %v9318_v21, %v7543_v20  ;;  %v2174_v37 = vpop.f32.mrf.mxu0 }
 0x106   :  { %2546 = vmatpush.bf16.msrb.mxu0 %v7352_v31  ;;  %v2211_v34 = vadd.f32 %v2210_v28, %v2192_v15  ;;  %v7255_v31 = vld [vmem:[#allocation7 + $0x610] sm:$0xf]  ;;  %v7044_v15 = vor.u32 %v9189_v1, %v7041_v2  ;;  %v9327_v28 = vld [vmem:[#allocation7 + $0x8b4] sm:$0xf]  ;;  %v6969_v1 = vld [vmem:[#allocation7 + $0x3e8] sm:$0xf0] }
 0x107   :  { %2565 = vmatpush.bf16.msrb.mxu1 %v7544_v33  ;;  %v7256_v63 = vor.u32 %v9246_v45, %v7255_v31  ;;  %v7377_v31 = vld [vmem:[#allocation7 + $0x718] sm:$0xf0]  ;;  %v9321_v45 = vld [vmem:[#allocation7 + $0x884] sm:$0xf]  ;;  %v7447_v2 = vld [vmem:[#allocation7 + $0x790] sm:$0xf] }
 0x108   :  { %2584 = vmatpush.bf16.msrb.mxu2 %v6588_v40  ;;  %v2193_v43 = vpop.f32.mrf.mxu1  ;;  %v2230_v46 = vadd.f32 %v2229_v35, %v2211_v34  ;;  %v6708_v40 = vor.u32 %v9105_v30, %v6705_v32  ;;  %v7593_v30 = vld [vmem:[#allocation7 + $0x8c8] sm:$0xf0]  ;;  %v9177_v35 = vld [vmem:[#allocation7 + $0x404] sm:$0xf] }
 0x109   :  { %2603 = vmatpush.bf16.msrb.mxu3 %v6780_v36  ;;  %v2175_v36 = vadd.f32 %v2174_v37, %v10016_v47  ;;  %v6492_v47 = vor.u32 %v9051_v48, %v6489_v49  ;;  %v7471_v37 = vld [vmem:[#allocation7 + $0x7c0] sm:$0xf]  ;;  %2480 = vmatmul.bf16.gmra.mxu0 %v9946_v50 }
 0x10a   :  { %2547 = vmatpush.bf16.msrb.mxu0 %v7328_v7  ;;  %v7425_v7 = vld [vmem:[#allocation7 + $0x778] sm:$0xf0]  ;;  %v7472_v48 = vor.u32 %v9300_v38, %v7471_v37  ;;  %2499 = vmatmul.bf16.gmra.mxu1 %v9948_v51  ;;  %v6921_v38 = vld [vmem:[#allocation7 + $0x388] sm:$0xf0] }
 0x10b   :  { %v2194_v13 = vadd.f32 %v2193_v43, %v2175_v36  ;;  %v7428_v16 = vor.u32 %v9285_v61, %v7425_v7  ;;  %2566 = vmatpush.bf16.msrb.mxu1 %v7520_v6  ;;  %v9273_v43 = vld [vmem:[#allocation7 + $0x704] sm:$0xf]  ;;  %v9171_v36 = vld [vmem:[#allocation7 + $0x3d4] sm:$0xf]  ;;  %v9294_v6 = vld [vmem:[#allocation7 + $0x7a4] sm:$0xf0]  ;;  %2518 = vmatmul.bf16.gmra.mxu2 %v9950_v57 }
 0x10c   :  { %2585 = vmatpush.bf16.msrb.mxu2 %v6564_v9  ;;  %v7617_v9 = vld [vmem:[#allocation7 + $0x8f8] sm:$0xf0]  ;;  %v7380_v52 = vor.u32 %v9273_v43, %v7377_v31  ;;  %2537 = vmatmul.bf16.gmra.mxu3 %v9952_v58 }
 0x10d   :  { %2604 = vmatpush.bf16.msrb.mxu3 %v6756_v11  ;;  %v7495_v11 = vld [vmem:[#allocation7 + $0x7f0] sm:$0xf]  ;;  %v2212_v17 = vpop.f32.mrf.mxu2  ;;  %v7620_v20 = vor.u32 %v9333_v8, %v7617_v9  ;;  %v10038_v23 = vpop.f32.mrf.mxu0  ;;  %v9267_v8 = vld [vmem:[#allocation7 + $0x6d4] sm:$0xf] }
 0x10e   :  { %2548 = vmatpush.bf16.msrb.mxu0 %v7304_v22  ;;  %v2213_v21 = vadd.f32 %v2212_v17, %v2194_v13  ;;  %v2231_v22 = vpop.f32.mrf.mxu3  ;;  %v7496_v27 = vor.u32 %v9306_v12, %v7495_v11  ;;  %v9315_v9 = vld [vmem:[#allocation7 + $0x854] sm:$0xf]  ;;  %v7545_v12 = vld [vmem:[#allocation7 + $0x868] sm:$0xf0]  ;;  %v9237_v13 = vld [vmem:[#allocation7 + $0x5e4] sm:$0xf] }
 0x10f   :  { %v9165_v17 = vld [vmem:[#allocation7 + $0x3a4] sm:$0xf] }
 0x110   :  { %2586 = vmatpush.bf16.msrb.mxu2 %v6540_v10  ;;  %v7017_v10 = vld [vmem:[#allocation7 + $0x448] sm:$0xf0]  ;;  %v10040_v19 = vpop.f32.mrf.mxu1  ;;  %v2232_v32 = vadd.f32 %v2231_v22, %v2213_v21  ;;  %2567 = vmatpush.bf16.msrb.mxu1 %v7496_v27  ;;  %v9261_v21 = vld [vmem:[#allocation7 + $0x6a4] sm:$0xf]  ;;  %v7329_v22 = vld [vmem:[#allocation7 + $0x6b8] sm:$0xf0] }
 0x111   :  { %2605 = vmatpush.bf16.msrb.mxu3 %v6732_v24  ;;  %v9279_v24 = vld [vmem:[#allocation7 + $0x734] sm:$0xf]  ;;  %v7020_v33 = vor.u32 %v9183_v18, %v7017_v10  ;;  %v6945_v18 = vld [vmem:[#allocation7 + $0x3b8] sm:$0xf0]  ;;  %v9309_v10 = vld [vmem:[#allocation7 + $0x824] sm:$0xf] }
 0x112   :  { %2549 = vmatpush.bf16.msrb.mxu0 %v7280_v41  ;;  %v7404_v34 = vor.u32 %v9279_v24, %v7401_v26  ;;  %v10042_v39 = vpack.c.bf16 %v2232_v32, %v2230_v46  ;;  %v7596_v41 = vor.u32 %v9327_v28, %v7593_v30  ;;  %v7521_v26 = vld [vmem:[#allocation7 + $0x838] sm:$0xf0]  ;;  %v9231_v27 = vld [vmem:[#allocation7 + $0x5b4] sm:$0xf]  ;;  %v7209_v28 = vld [vmem:[#allocation7 + $0x5c8] sm:$0xf0]  ;;  %v6948_v30 = vor.u32 %v9165_v17, %v6945_v18 }
 0x113   :  { %v7332_v32 = vor.u32 %v9261_v21, %v7329_v22  ;;  %v7212_v43 = vor.u32 %v9231_v27, %v7209_v28  ;;  %v7161_v17 = vld [vmem:[#allocation7 + $0x568] sm:$0xf0]  ;;  %v9243_v22 = vld [vmem:[#allocation7 + $0x614] sm:$0xf] }
 0x114   :  { %2587 = vmatpush.bf16.msrb.mxu2 %v6516_v42  ;;  %v6993_v42 = vld [vmem:[#allocation7 + $0x418] sm:$0xf0]  ;;  %2568 = vmatpush.bf16.msrb.mxu1 %v7472_v48  ;;  %v6873_v21 = vld [vmem:[#allocation7 + $0x328] sm:$0xf0]  ;;  %v9291_v27 = vld [vmem:[#allocation7 + $0x794] sm:$0xf] }
 0x115   :  { %2606 = vmatpush.bf16.msrb.mxu3 %v6708_v40  ;;  %v7569_v40 = vld [vmem:[#allocation7 + $0x898] sm:$0xf0]  ;;  %v6996_v49 = vor.u32 %v9177_v35, %v6993_v42  ;;  %v10044_v56 = vpop.f32.mrf.mxu2  ;;  %v10049_v7 = vpop.f32.mrf.mxu0  ;;  %v7524_v35 = vor.u32 %v9309_v10, %v7521_v26  ;;  %v7305_v42 = vld [vmem:[#allocation7 + $0x688] sm:$0xf0] }
 0x116   :  { %2550 = vmatpush.bf16.msrb.mxu0 %v7256_v63  ;;  %v7572_v46 = vor.u32 %v9321_v45, %v7569_v40  ;;  %v10047_v61 = vpop.f32.mrf.mxu3  ;;  %v7353_v63 = vld [vmem:[#allocation7 + $0x6e8] sm:$0xf0]  ;;  %v9303_v45 = vld [vmem:[#allocation7 + $0x7f4] sm:$0xf] }
 0x117   :  { %v7497_v40 = vld [vmem:[#allocation7 + $0x808] sm:$0xf0] }
 0x118   :  { %2588 = vmatpush.bf16.msrb.mxu2 %v6492_v47  ;;  %v10053_v11 = vpop.f32.mrf.mxu1  ;;  %v7233_v47 = vld [vmem:[#allocation7 + $0x5f8] sm:$0xf0]  ;;  %v7257_v10 = vld [vmem:[#allocation7 + $0x628] sm:$0xf0] }
 0x119   :  { %2607 = vmatpush.bf16.msrb.mxu3 %v6684_v14  ;;  %v7448_v14 = vor.u32 %v9294_v6, %v7447_v2  ;;  %v7236_v24 = vor.u32 %v9237_v13, %v7233_v47  ;;  %v7185_v2 = vld [vmem:[#allocation7 + $0x598] sm:$0xf0]  ;;  %v7500_v6 = vor.u32 %v9303_v45, %v7497_v40  ;;  %2551 = vmatmul.bf16.vlgmr.msrb.gmra.mxu0 %v9958_v0  ;;  %v7449_v28 = vld [vmem:[#allocation7 + $0x7a8] sm:$0xf0]  ;;  %v9207_v40 = vld [vmem:[#allocation7 + $0x4f4] sm:$0xf] }
 0x11a   :  { %2619 = vmatpush.bf16.msra.mxu0 %v7044_v15  ;;  %v6972_v15 = vor.u32 %v9171_v36, %v6969_v1  ;;  %v9225_v1 = vld [vmem:[#allocation7 + $0x584] sm:$0xf] }
 0x11b   :  { %2569 = vmatpush.bf16.msrb.mxu1 %v7448_v14  ;;  %v7188_v13 = vor.u32 %v9225_v1, %v7185_v2  ;;  %2589 = vmatmul.bf16.vlgmr.msrb.gmra.mxu2 %v9934_v54  ;;  %v7452_v54 = vor.u32 %v9291_v27, %v7449_v28  ;;  %v9011_v1 = vld [vmem:[%s11003_s4 + $0xb0] sm:$0xff]  ;;  %v9195_v27 = vld [vmem:[#allocation7 + $0x494] sm:$0xf]  ;;  %v7065_v28 = vld [vmem:[#allocation7 + $0x4a8] sm:$0xf0] }
 0x11c   :  { %2657 = vmatpush.bf16.msra.mxu2 %v7428_v16  ;;  %v7356_v16 = vor.u32 %v9267_v8, %v7353_v63  ;;  %v9249_v8 = vld [vmem:[#allocation7 + $0x644] sm:$0xf]  ;;  %v7281_v63 = vld [vmem:[#allocation7 + $0x658] sm:$0xf0]  ;;  %2608 = vmatmul.bf16.vlgmr.msrb.gmra.mxu3 %v9936_v55  ;;  %v9012_v55 = vld [vmem:[%s11003_s4 + $0xb8] sm:$0xff] }
 0x11d   :  { %2676 = vmatpush.bf16.msra.mxu3 %v7620_v20  ;;  %v7548_v20 = vor.u32 %v9315_v9, %v7545_v12  ;;  %v10060_v31 = vpop.f32.mrf.mxu0  ;;  %v9297_v9 = vld [vmem:[#allocation7 + $0x7c4] sm:$0xf]  ;;  %v7473_v12 = vld [vmem:[#allocation7 + $0x7d8] sm:$0xf0]  ;;  %v7284_v14 = vor.u32 %v9249_v8, %v7281_v63 }
 0x11e   :  { %2620 = vmatpush.bf16.msra.mxu0 %v7020_v33  ;;  %v10056_v33 = vpop.f32.mrf.mxu2  ;;  %v10058_v37 = vpop.f32.mrf.mxu3  ;;  %v7476_v18 = vor.u32 %v9297_v9, %v7473_v12  ;;  %2570 = vmatmul.bf16.vlgmr.msrb.gmra.mxu1 %v9960_v4  ;;  %v9019_v2 = vld [vmem:[%s11003_s4 + $0xf0] sm:$0xff]  ;;  %v8994_v9 = vld [vmem:[%s11003_s4 + $0x28] sm:$0xff] }
 0x11f   :  { %2638 = vmatpush.bf16.msra.mxu1 %v7236_v24  ;;  %v9010_v12 = vld [vmem:[%s11003_s4 + $0xa8] sm:$0xff] }
 0x120   :  { %2658 = vmatpush.bf16.msra.mxu2 %v7404_v34  ;;  %v9159_v34 = vld [vmem:[#allocation7 + $0x374] sm:$0xf]  ;;  %v10062_v36 = vpop.f32.mrf.mxu1 }
 0x121   :  { %2677 = vmatpush.bf16.msra.mxu3 %v7596_v41  ;;  %v9255_v41 = vld [vmem:[#allocation7 + $0x674] sm:$0xf]  ;;  %v6924_v48 = vor.u32 %v9159_v34, %v6921_v38  ;;  %v9213_v38 = vld [vmem:[#allocation7 + $0x524] sm:$0xf] }
 0x122   :  { %2621 = vmatpush.bf16.msra.mxu0 %v6996_v49  ;;  %v7308_v49 = vor.u32 %v9255_v41, %v7305_v42  ;;  %v7137_v41 = vld [vmem:[#allocation7 + $0x538] sm:$0xf0]  ;;  %v10079_v42 = vld [vmem:[%s11003_s4 + $0x38] sm:$0xff] }
 0x123   :  { %2639 = vmatpush.bf16.msra.mxu1 %v7212_v43  ;;  %v9020_v43 = vld [vmem:[%s11003_s4 + $0xf8] sm:$0xff]  ;;  %v7140_v45 = vor.u32 %v9213_v38, %v7137_v41  ;;  %v2161_v38 = vadd.f32 %v10030_v5, %v10028_v53  ;;  %v8991_v53 = vld [vmem:[%s11003_s4 + $0x10] sm:$0xff] }
 0x124   :  { %2659 = vmatpush.bf16.msra.mxu2 %v7380_v52  ;;  %v9153_v52 = vld [vmem:[#allocation7 + $0x344] sm:$0xf]  ;;  %v9008_v41 = vld [vmem:[%s11003_s4 + $0x98] sm:$0xff] }
 0x125   :  { %2678 = vmatpush.bf16.msra.mxu3 %v7572_v46  ;;  %v6897_v46 = vld [vmem:[#allocation7 + $0x358] sm:$0xf0]  ;;  %v10071_v26 = vpop.f32.mrf.mxu0 }
 0x126   :  { %2622 = vmatpush.bf16.msra.mxu0 %v6972_v15  ;;  %v6900_v47 = vor.u32 %v9153_v52, %v6897_v46  ;;  %v9147_v15 = vld [vmem:[#allocation7 + $0x314] sm:$0xf]  ;;  %v10069_v24 = vpop.f32.mrf.mxu3 }
 0x127   :  { %2640 = vmatpush.bf16.msra.mxu1 %v7188_v13  ;;  %v6876_v34 = vor.u32 %v9147_v15, %v6873_v21  ;;  %v9018_v13 = vld [vmem:[%s11003_s4 + $0xe8] sm:$0xff]  ;;  %v8993_v15 = vld [vmem:[%s11003_s4 + $0x20] sm:$0xff] }
 0x128   :  { %2660 = vmatpush.bf16.msra.mxu2 %v7356_v16  ;;  %v9219_v16 = vld [vmem:[#allocation7 + $0x554] sm:$0xf] }
 0x129   :  { %2679 = vmatpush.bf16.msra.mxu3 %v7548_v20  ;;  %v10065_v20 = vpop.f32.mrf.mxu2  ;;  %v9017_v21 = vld [vmem:[%s11003_s4 + $0xe0] sm:$0xff]  ;;  %2556 = vmatmul.bf16.gmra.mxu0 %v9966_v62 }
 0x12a   :  { %2623 = vmatpush.bf16.msra.mxu0 %v6948_v30  ;;  %v10074_v30 = vpop.f32.mrf.mxu1 }
 0x12b   :  { %2594 = vmatmul.bf16.gmra.mxu2 %v9946_v50  ;;  %v9016_v50 = vld [vmem:[%s11003_s4 + $0xd8] sm:$0xff] }
 0x12c   :  { %2661 = vmatpush.bf16.msra.mxu2 %v7332_v32  ;;  %v7164_v32 = vor.u32 %v9219_v16, %v7161_v17  ;;  %v10123_v16 = vld [vmem:[%s11003_s4 + $0xa0] sm:$0xff]  ;;  %2613 = vmatmul.bf16.gmra.mxu3 %v9948_v51  ;;  %v10155_v51 = vld [vmem:[%s11003_s4 + $0x78] sm:$0xff] }
 0x12d   :  { %2680 = vmatpush.bf16.msra.mxu3 %v7524_v35  ;;  %v7260_v35 = vor.u32 %v9243_v22, %v7257_v10  ;;  %v10103_v46 = vpop.f32.mrf.mxu0 }
 0x12e   :  { %2624 = vmatpush.bf16.msra.mxu0 %v6924_v48  ;;  %2641 = vmatpush.bf16.msra.mxu1 %v7164_v32  ;;  %v7113_v48 = vld [vmem:[#allocation7 + $0x508] sm:$0xf0] }
 0x12f   :  { %v7116_v63 = vor.u32 %v9207_v40, %v7113_v48  ;;  %2575 = vmatmul.bf16.gmra.mxu1 %v9968_v3  ;;  %v10179_v40 = vld [vmem:[%s11003_s4 + $0x70] sm:$0xff] }
 0x130   :  { %2662 = vmatpush.bf16.msra.mxu2 %v7308_v49  ;;  %v10091_v49 = vld [vmem:[%s11003_s4 + $0x30] sm:$0xff] }
 0x131   :  { %2681 = vmatpush.bf16.msra.mxu3 %v7500_v6  ;;  %v10093_v52 = vpop.f32.mrf.mxu2  ;;  %v10101_v6 = vpop.f32.mrf.mxu3 }
 0x132   :  { %2625 = vmatpush.bf16.msra.mxu0 %v6900_v47  ;;  %v10105_v8 = vpop.f32.mrf.mxu1  ;;  %2642 = vmatpush.bf16.msra.mxu1 %v7140_v45  ;;  %v9201_v47 = vld [vmem:[#allocation7 + $0x4c4] sm:$0xf] }
 0x134   :  { %2663 = vmatpush.bf16.msra.mxu2 %v7284_v14  ;;  %v7089_v14 = vld [vmem:[#allocation7 + $0x4d8] sm:$0xf0] }
 0x135   :  { %2682 = vmatpush.bf16.msra.mxu3 %v7476_v18  ;;  %v7092_v18 = vor.u32 %v9201_v47, %v7089_v14  ;;  %v10132_v10 = vpop.f32.mrf.mxu0  ;;  %v10212_v47 = vld [vmem:[%s11003_s4 + $0x80] sm:$0xff] }
 0x136   :  { %2626 = vmatpush.bf16.msra.mxu0 %v6876_v34  ;;  %2643 = vmatpush.bf16.msra.mxu1 %v7116_v63  ;;  %v8992_v34 = vld [vmem:[%s11003_s4 + $0x18] sm:$0xff] }
 0x138   :  { %2664 = vmatpush.bf16.msra.mxu2 %v7260_v35  ;;  %v7068_v35 = vor.u32 %v9195_v27, %v7065_v28 }
 0x139   :  { %2683 = vmatpush.bf16.msra.mxu3 %v7452_v54  ;;  %v10125_v17 = vpop.f32.mrf.mxu2  ;;  %v10130_v22 = vpop.f32.mrf.mxu3  ;;  %v2180_v54 = vadd.f32 %v10049_v7, %v2161_v38  ;;  %v10171_v7 = vld [vmem:[%s11003_s4 + $0xd0] sm:$0xff]  ;;  %2627 = vmatmul.bf16.vlgmr.msra.gmra.mxu0 %v9938_v59  ;;  %v10235_v59 = vld [vmem:[%s11003_s4 + $0x60] sm:$0xff] }
 0x13a   :  { %2995 = vmatpush.bf16.msrb.mxu0 %v10079_v42  ;;  %v10136_v32 = vpop.f32.mrf.mxu1  ;;  %2644 = vmatpush.bf16.msra.mxu1 %v7092_v18  ;;  %v10266_v38 = vld [vmem:[%s11003_s4 + $0x50] sm:$0xff] }
 0x13b   :  { %2665 = vmatmul.bf16.vlgmr.msra.gmra.mxu2 %v9958_v0  ;;  %v9027_v0 = vld [vmem:[%s11003_s4 + $0x130] sm:$0xff] }
 0x13c   :  { %3033 = vmatpush.bf16.msrb.mxu2 %v9012_v55  ;;  %v2178_v55 = vadd.f32 %v10038_v23, %v10023_v25  ;;  %v2199_v25 = vadd.f32 %v10053_v11, %v2180_v54  ;;  %v9006_v11 = vld [vmem:[%s11003_s4 + $0x88] sm:$0xff]  ;;  %2684 = vmatmul.bf16.vlgmr.msra.gmra.mxu3 %v9960_v4  ;;  %v10249_v4 = vld [vmem:[%s11003_s4 + $0x58] sm:$0xff] }
 0x13d   :  { %3052 = vmatpush.bf16.msrb.mxu3 %v9020_v43  ;;  %v9007_v43 = vld [vmem:[%s11003_s4 + $0x90] sm:$0xff]  ;;  %v10182_v23 = vpop.f32.mrf.mxu0  ;;  %v10276_v54 = vld [vmem:[%s11003_s4 + $0x48] sm:$0xff] }
 0x13e   :  { %2996 = vmatpush.bf16.msrb.mxu0 %v10091_v49  ;;  %2645 = vmatpush.bf16.msra.mxu1 %v7068_v35  ;;  %v2218_v63 = vadd.f32 %v10056_v33, %v2199_v25  ;;  %v10206_v33 = vld [vmem:[%s11003_s4 + $0x68] sm:$0xff]  ;;  %v2268_v25 = vadd.f32 %v10062_v36, %v10060_v31  ;;  %v10309_v36 = vld [vmem:[%s11003_s4 + $0x178] sm:$0xff] }
 0x140   :  { %3034 = vmatpush.bf16.msrb.mxu2 %v9011_v1  ;;  %v8990_v1 = vld [vmem:[%s11003_s4 + $0x8] sm:$0xff] }
 0x141   :  { %3053 = vmatpush.bf16.msrb.mxu3 %v9019_v2  ;;  %v10161_v5 = vpop.f32.mrf.mxu2  ;;  %v10173_v45 = vpop.f32.mrf.mxu3  ;;  %v2197_v2 = vadd.f32 %v10040_v19, %v2178_v55  ;;  %v8989_v19 = vld [vmem:[%s11003_s4] sm:$0xff]  ;;  %2646 = vmatmul.bf16.vlgmr.msra.gmra.mxu1 %v9940_v60  ;;  %v2275_v55 = vadd.f32 %v10136_v32, %v10132_v10 }
 0x142   :  { %2997 = vmatpush.bf16.msrb.mxu0 %v8994_v9  ;;  %3014 = vmatpush.bf16.msrb.mxu1 %v10155_v51  ;;  %v10184_v48 = vpop.f32.mrf.mxu1  ;;  %v9014_v9 = vld [vmem:[%s11003_s4 + $0xc8] sm:$0xff] }
 0x144   :  { %3035 = vmatpush.bf16.msrb.mxu2 %v9010_v12  ;;  %v2216_v12 = vadd.f32 %v10044_v56, %v2197_v2  ;;  %v9013_v56 = vld [vmem:[%s11003_s4 + $0xc0] sm:$0xff] }
 0x145   :  { %3054 = vmatpush.bf16.msrb.mxu3 %v9018_v13  ;;  %v2237_v13 = vadd.f32 %v10058_v37, %v2218_v63  ;;  %v9028_v37 = vld [vmem:[%s11003_s4 + $0x138] sm:$0xff] }
 0x146   :  { %2998 = vmatpush.bf16.msrb.mxu0 %v8993_v15  ;;  %3015 = vmatpush.bf16.msrb.mxu1 %v10179_v40  ;;  %v2235_v18 = vadd.f32 %v10047_v61, %v2216_v12 }
 0x148   :  { %3036 = vmatpush.bf16.msrb.mxu2 %v10123_v16  ;;  %v10237_v60 = vpack.c.bf16 %v2237_v13, %v2235_v18 }
 0x149   :  { %3055 = vmatpush.bf16.msrb.mxu3 %v9017_v21  ;;  %v10219_v14 = vpop.f32.mrf.mxu2  ;;  %v10221_v15 = vpop.f32.mrf.mxu3  ;;  %2632 = vmatmul.bf16.gmra.mxu0 %v9950_v57  ;;  %v10303_v57 = vld [vmem:[%s11003_s4 + $0x40] sm:$0xff] }
 0x14a   :  { %2999 = vmatpush.bf16.msrb.mxu0 %v8992_v34  ;;  %v2326_v21 = vpop.f32.mrf.mxu0  ;;  %v10229_v27 = vpop.f32.mrf.mxu1  ;;  %3016 = vmatpush.bf16.msrb.mxu1 %v10206_v33  ;;  %v10259_v34 = vld [vmem:[%s11003_s4 + $0x128] sm:$0xff] }
 0x14b   :  { %2670 = vmatmul.bf16.gmra.mxu2 %v9966_v62  ;;  %v2287_v62 = vadd.f32 %v10065_v20, %v2268_v25 }
 0x14c   :  { %3037 = vmatpush.bf16.msrb.mxu2 %v9008_v41  ;;  %2689 = vmatmul.bf16.gmra.mxu3 %v9968_v3 }
 0x14d   :  { %3056 = vmatpush.bf16.msrb.mxu3 %v9016_v50  ;;  %v9025_v50 = vld [vmem:[%s11003_s4 + $0x120] sm:$0xff]  ;;  %v2306_v20 = vadd.f32 %v10069_v24, %v2287_v62  ;;  %v10360_v62 = vld [vmem:[%s11003_s4 + $0x148] sm:$0xff] }
 0x14e   :  { %3000 = vmatpush.bf16.msrb.mxu0 %v8991_v53  ;;  %3017 = vmatpush.bf16.msrb.mxu1 %v10235_v59  ;;  %v2270_v53 = vadd.f32 %v10074_v30, %v10071_v26  ;;  %v2273_v30 = vadd.f32 %v10105_v8, %v10103_v46 }
 0x150   :  { %3038 = vmatpush.bf16.msrb.mxu2 %v9007_v43  ;;  %v9024_v43 = vld [vmem:[%s11003_s4 + $0x118] sm:$0xff]  ;;  %v2292_v3 = vadd.f32 %v10125_v17, %v2273_v30  ;;  %v9035_v17 = vld [vmem:[%s11003_s4 + $0x170] sm:$0xff] }
 0x151   :  { %3057 = vmatpush.bf16.msrb.mxu3 %v10171_v7  ;;  %v10252_v61 = vpop.f32.mrf.mxu2  ;;  %v10254_v28 = vpop.f32.mrf.mxu3  ;;  %2651 = vmatmul.bf16.gmra.mxu1 %v9952_v58  ;;  %v2294_v58 = vadd.f32 %v10161_v5, %v2275_v55 }
 0x152   :  { %3001 = vmatpush.bf16.msrb.mxu0 %v8990_v1  ;;  %v2329_v35 = vpop.f32.mrf.mxu0  ;;  %3018 = vmatpush.bf16.msrb.mxu1 %v10249_v4  ;;  %v2348_v41 = vpop.f32.mrf.mxu1  ;;  %v2289_v1 = vadd.f32 %v10093_v52, %v2270_v53  ;;  %v10315_v52 = vld [vmem:[%s11003_s4 + $0x110] sm:$0xff]  ;;  %v2311_v2 = vadd.f32 %v10130_v22, %v2292_v3  ;;  %v9034_v22 = vld [vmem:[%s11003_s4 + $0x168] sm:$0xff] }
 0x153   :  { %v2313_v8 = vadd.f32 %v10173_v45, %v2294_v58  ;;  %v2325_v45 = vadd.f32 %v10182_v23, %v2306_v20 }
 0x154   :  { %3039 = vmatpush.bf16.msrb.mxu2 %v9006_v11  ;;  %v2308_v46 = vadd.f32 %v10101_v6, %v2289_v1  ;;  %v9022_v6 = vld [vmem:[%s11003_s4 + $0x108] sm:$0xff]  ;;  %v2330_v24 = vadd.f32 %v2329_v35, %v2311_v2 }
 0x155   :  { %3058 = vmatpush.bf16.msrb.mxu3 %v9014_v9  ;;  %v2344_v23 = vadd.f32 %v10184_v48, %v2325_v45  ;;  %v2384_v48 = vadd.f32 %v10254_v28, %v10252_v61 }
 0x156   :  { %3002 = vmatpush.bf16.msrb.mxu0 %v8989_v19  ;;  %3019 = vmatpush.bf16.msrb.mxu1 %v10266_v38  ;;  %v2327_v5 = vadd.f32 %v2326_v21, %v2308_v46  ;;  %v2349_v18 = vadd.f32 %v2348_v41, %v2330_v24 }
 0x158   :  { %3040 = vmatpush.bf16.msrb.mxu2 %v10212_v47  ;;  %v2346_v19 = vadd.f32 %v10229_v27, %v2327_v5  ;;  %v10342_v27 = vld [vmem:[%s11003_s4 + $0x160] sm:$0xff] }
 0x159   :  { %3059 = vmatpush.bf16.msrb.mxu3 %v9013_v56  ;;  %v10291_v26 = vpop.f32.mrf.mxu2  ;;  %v10297_v10 = vpop.f32.mrf.mxu3  ;;  %3003 = vmatmul.bf16.vlgmr.msrb.gmra.mxu0 %v10014_v29 }
 0x15a   :  { %3071 = vmatpush.bf16.msra.mxu0 %v9028_v37  ;;  %v2331_v32 = vpop.f32.mrf.mxu0  ;;  %3020 = vmatpush.bf16.msrb.mxu1 %v10276_v54  ;;  %v2350_v31 = vpop.f32.mrf.mxu1  ;;  %v9021_v37 = vld [vmem:[%s11003_s4 + $0x100] sm:$0xff]  ;;  %v2697_v21 = vpack.c.bf16 %v2346_v19, %v2344_v23  ;;  %v2387_v20 = vadd.f32 %v10297_v10, %v10291_v26 }
 0x15b   :  { %v2332_v63 = vadd.f32 %v2331_v32, %v2313_v8  ;;  %v9029_v8 = vld [vmem:[%s11003_s4 + $0x140] sm:$0xff] }
 0x15c   :  { %3277 = vmatpush.bf16.msra.mxu2 %v10026_v44 }
 0x15d   :  { %3296 = vmatpush.bf16.msra.mxu3 %v10237_v60  ;;  %v2351_v56 = vadd.f32 %v2350_v31, %v2332_v63  ;;  %3041 = vmatmul.bf16.vlgmr.msrb.gmra.mxu2 %v2697_v21 }
 0x15e   :  { %3072 = vmatpush.bf16.msra.mxu0 %v9027_v0  ;;  %3021 = vmatpush.bf16.msrb.mxu1 %v10303_v57  ;;  %v2382_v0 = vadd.f32 %v10221_v15, %v10219_v14  ;;  %v9032_v14 = vld [vmem:[%s11003_s4 + $0x158] sm:$0xff] }
 0x15f   :  { %v2703_v35 = vpack.c.bf16 %v2351_v56, %v2349_v18 }
 0x160   :  { %3278 = vmatpush.bf16.msra.mxu2 %v10014_v29  ;;  %v9031_v29 = vld [vmem:[%s11003_s4 + $0x150] sm:$0xff] }
 0x161   :  { %3297 = vmatpush.bf16.msra.mxu3 %v10042_v39  ;;  %v2369_v11 = vpop.f32.mrf.mxu2  ;;  %v2388_v9 = vpop.f32.mrf.mxu3  ;;  %3022 = vmatmul.bf16.vlgmr.msrb.gmra.mxu1 %v10042_v39 }
 0x162   :  { %3073 = vmatpush.bf16.msra.mxu0 %v10259_v34  ;;  %3090 = vmatpush.bf16.msra.mxu1 %v10309_v36  ;;  %v2400_v12 = vpop.f32.mrf.mxu0  ;;  %v2419_v13 = vpop.f32.mrf.mxu1 }
 0x163   :  { %v2401_v41 = vadd.f32 %v2400_v12, %v2382_v0 }
 0x165   :  { %v2420_v39 = vadd.f32 %v2419_v13, %v2401_v41 }
 0x166   :  { %3074 = vmatpush.bf16.msra.mxu0 %v9025_v50  ;;  %3091 = vmatpush.bf16.msra.mxu1 %v9035_v17  ;;  %v2389_v17 = vadd.f32 %v2388_v9, %v2369_v11 }
 0x169   :  { %v2438_v50 = vpop.f32.mrf.mxu2  ;;  %v2457_v53 = vpop.f32.mrf.mxu3  ;;  %3008 = vmatmul.bf16.gmra.mxu0 %v10026_v44 }
 0x16a   :  { %3075 = vmatpush.bf16.msra.mxu0 %v9024_v43  ;;  %3092 = vmatpush.bf16.msra.mxu1 %v9034_v22  ;;  %v2402_v55 = vpop.f32.mrf.mxu0  ;;  %v2421_v43 = vpop.f32.mrf.mxu1  ;;  %v2439_v61 = vadd.f32 %v2438_v50, %v2420_v39 }
 0x16b   :  { %v2403_v15 = vadd.f32 %v2402_v55, %v2384_v48 }
 0x16c   :  { %v2458_v31 = vadd.f32 %v2457_v53, %v2439_v61 }
 0x16d   :  { %v2422_v28 = vadd.f32 %v2421_v43, %v2403_v15  ;;  %3046 = vmatmul.bf16.gmra.mxu2 %v2703_v35 }
 0x16e   :  { %3076 = vmatpush.bf16.msra.mxu0 %v10315_v52  ;;  %3093 = vmatpush.bf16.msra.mxu1 %v10342_v27 }
 0x171   :  { %v2440_v25 = vpop.f32.mrf.mxu2  ;;  %v2459_v30 = vpop.f32.mrf.mxu3  ;;  %3027 = vmatmul.bf16.gmra.mxu1 %v10237_v60 }
 0x172   :  { %3077 = vmatpush.bf16.msra.mxu0 %v9022_v6  ;;  %3094 = vmatpush.bf16.msra.mxu1 %v9032_v14  ;;  %v2441_v1 = vadd.f32 %v2440_v25, %v2422_v28  ;;  %v2405_v58 = vpop.f32.mrf.mxu0  ;;  %v2424_v32 = vpop.f32.mrf.mxu1 }
 0x173   :  { %v2406_v2 = vadd.f32 %v2405_v58, %v2387_v20 }
 0x174   :  { %v2460_v3 = vadd.f32 %v2459_v30, %v2441_v1 }
 0x175   :  { %v2425_v12 = vadd.f32 %v2424_v32, %v2406_v2 }
 0x176   :  { %3078 = vmatpush.bf16.msra.mxu0 %v9021_v37  ;;  %3095 = vmatpush.bf16.msra.mxu1 %v9031_v29  ;;  %v2698_v46 = vpack.c.bf16 %v2460_v3, %v2458_v31 }
 0x178   :  { %3060 = vmatmul.bf16.vlgmr.msrb.gmra.mxu3 %v2698_v46 }
 0x179   :  { %v2443_v5 = vpop.f32.mrf.mxu2  ;;  %v2462_v63 = vpop.f32.mrf.mxu3 }
 0x17a   :  { %3315 = vmatpush.bf16.msrb.mxu0 %v2703_v35  ;;  %3096 = vmatpush.bf16.msra.mxu1 %v10360_v62  ;;  %v2407_v6 = vpop.f32.mrf.mxu0  ;;  %v2426_v45 = vpop.f32.mrf.mxu1  ;;  %v2444_v19 = vadd.f32 %v2443_v5, %v2425_v12 }
 0x17b   :  { %v2408_v24 = vadd.f32 %v2407_v6, %v2389_v17 }
 0x17c   :  { %v2463_v37 = vadd.f32 %v2462_v63, %v2444_v19 }
 0x17d   :  { %v2427_v13 = vadd.f32 %v2426_v45, %v2408_v24 }
 0x17e   :  { %3316 = vmatpush.bf16.msrb.mxu0 %v2697_v21  ;;  %3097 = vmatpush.bf16.msra.mxu1 %v9029_v8 }
 0x181   :  { %v2445_v22 = vpop.f32.mrf.mxu2  ;;  %v2464_v26 = vpop.f32.mrf.mxu3 }
 0x182   :  { %v2446_v56 = vadd.f32 %v2445_v22, %v2427_v13  ;;  %v2476_v10 = vpop.f32.mrf.mxu0  ;;  %v2495_v60 = vpop.f32.mrf.mxu1 }
 0x183   :  { %v2496_v14 = vadd.f32 %v2495_v60, %v2476_v10 }
 0x184   :  { %v2465_v23 = vadd.f32 %v2464_v26, %v2446_v56 }
 0x186   :  { %v2704_v44 = vpack.c.bf16 %v2465_v23, %v2463_v37 }
 0x188   :  { %3065 = vmatmul.bf16.gmra.mxu3 %v2704_v44  ;;  %3334 = vmatpush.bf16.msrb.mxu1 %v2704_v44 }
 0x189   :  { %v2514_v11 = vpop.f32.mrf.mxu2  ;;  %v2533_v9 = vpop.f32.mrf.mxu3 }
 0x18a   :  { %v2478_v18 = vpop.f32.mrf.mxu0  ;;  %v2497_v21 = vpop.f32.mrf.mxu1  ;;  %v2515_v61 = vadd.f32 %v2514_v11, %v2496_v14 }
 0x18b   :  { %v2498_v28 = vadd.f32 %v2497_v21, %v2478_v18 }
 0x18c   :  { %3335 = vmatpush.bf16.msrb.mxu1 %v2698_v46  ;;  %v2534_v30 = vadd.f32 %v2533_v9, %v2515_v61 }
 0x191   :  { %v2516_v0 = vpop.f32.mrf.mxu2  ;;  %v2535_v35 = vpop.f32.mrf.mxu3 }
 0x192   :  { %v2481_v50 = vpop.f32.mrf.mxu0  ;;  %v2500_v48 = vpop.f32.mrf.mxu1  ;;  %v2517_v1 = vadd.f32 %v2516_v0, %v2498_v28 }
 0x193   :  { %v2501_v45 = vadd.f32 %v2500_v48, %v2481_v50 }
 0x194   :  { %v2536_v58 = vadd.f32 %v2535_v35, %v2517_v1 }
 0x199   :  { %v2519_v41 = vpop.f32.mrf.mxu2  ;;  %v2538_v53 = vpop.f32.mrf.mxu3 }
 0x19a   :  { %v2483_v55 = vpop.f32.mrf.mxu0  ;;  %v2502_v43 = vpop.f32.mrf.mxu1  ;;  %v2520_v19 = vadd.f32 %v2519_v41, %v2501_v45 }
 0x19b   :  { %v2503_v13 = vadd.f32 %v2502_v43, %v2483_v55 }
 0x19c   :  { %v2539_v56 = vadd.f32 %v2538_v53, %v2520_v19 }
 0x1a1   :  { %v2521_v15 = vpop.f32.mrf.mxu2  ;;  %v2540_v39 = vpop.f32.mrf.mxu3 }
 0x1a2   :  { %v2552_v29 = vpop.f32.mrf.mxu0  ;;  %v2571_v25 = vpop.f32.mrf.mxu1  ;;  %v2522_v22 = vadd.f32 %v2521_v15, %v2503_v13 }
 0x1a3   :  { %v2553_v32 = vadd.f32 %v2552_v29, %v2534_v30 }
 0x1a4   :  { %v2541_v26 = vadd.f32 %v2540_v39, %v2522_v22 }
 0x1a5   :  { %v2572_v5 = vadd.f32 %v2571_v25, %v2553_v32 }
 0x1a9   :  { %v2590_v31 = vpop.f32.mrf.mxu2  ;;  %v2609_v3 = vpop.f32.mrf.mxu3 }
 0x1aa   :  { %v2554_v46 = vpop.f32.mrf.mxu0  ;;  %v2573_v20 = vpop.f32.mrf.mxu1  ;;  %v2610_v41 = vadd.f32 %v2609_v3, %v2590_v31 }
 0x1ab   :  { %v2555_v8 = vadd.f32 %v2554_v46, %v2536_v58 }
 0x1ad   :  { %v2574_v17 = vadd.f32 %v2573_v20, %v2555_v8 }
 0x1af   :  { %v2699_v2 = vpack.c.bf16 %v2574_v17, %v2572_v5 }
 0x1b1   :  { %v2592_v63 = vpop.f32.mrf.mxu2  ;;  %3079 = vmatmul.bf16.vlgmr.msra.gmra.mxu0 %v2699_v2  ;;  %v2611_v6 = vpop.f32.mrf.mxu3 }
 0x1b2   :  { %v2557_v24 = vpop.f32.mrf.mxu0  ;;  %v2576_v12 = vpop.f32.mrf.mxu1  ;;  %v2612_v43 = vadd.f32 %v2611_v6, %v2592_v63 }
 0x1b3   :  { %v2558_v10 = vadd.f32 %v2557_v24, %v2539_v56 }
 0x1b5   :  { %v2577_v9 = vadd.f32 %v2576_v12, %v2558_v10 }
 0x1b9   :  { %v2595_v60 = vpop.f32.mrf.mxu2  ;;  %v2614_v37 = vpop.f32.mrf.mxu3 }
 0x1ba   :  { %v2559_v23 = vpop.f32.mrf.mxu0  ;;  %v2578_v44 = vpop.f32.mrf.mxu1  ;;  %v2615_v17 = vadd.f32 %v2614_v37, %v2595_v60 }
 0x1bb   :  { %v2560_v11 = vadd.f32 %v2559_v23, %v2541_v26 }
 0x1bd   :  { %v2579_v18 = vadd.f32 %v2578_v44, %v2560_v11 }
 0x1bf   :  { %v2705_v21 = vpack.c.bf16 %v2579_v18, %v2577_v9  ;;  %v9878_v9 = vmov 0  }
 0x1c0   :  { %9650 = vset.pattern.permute.xlu2 %v9878_v9  ;;  %9651 = vset.pattern.permute.xlu0 %v9878_v9 }
 0x1c1   :  { %v2597_v0 = vpop.f32.mrf.mxu2  ;;  %v2616_v35 = vpop.f32.mrf.mxu3  ;;  %3084 = vmatmul.bf16.gmra.mxu0 %v2705_v21  ;;  %3353 = vmatpush.bf16.msrb.mxu2 %v2705_v21 }
 0x1c2   :  { %v2628_v50 = vpop.f32.mrf.mxu0  ;;  %v2647_v48 = vpop.f32.mrf.mxu1  ;;  %v2617_v3 = vadd.f32 %v2616_v35, %v2597_v0  ;;  %9652 = vset.pattern.permute.xlu1 %v9878_v9 }
 0x1c3   :  { %v2629_v14 = vadd.f32 %v2628_v50, %v2610_v41 }
 0x1c5   :  { %3354 = vmatpush.bf16.msrb.mxu2 %v2699_v2  ;;  %v2648_v61 = vadd.f32 %v2647_v48, %v2629_v14 }
 0x1c9   :  { %v2666_v55 = vpop.f32.mrf.mxu2  ;;  %v2685_v53 = vpop.f32.mrf.mxu3 }
 0x1ca   :  { %v2630_v15 = vpop.f32.mrf.mxu0  ;;  %v2649_v39 = vpop.f32.mrf.mxu1  ;;  %v2667_v28 = vadd.f32 %v2666_v55, %v2648_v61 }
 0x1cb   :  { %v2631_v29 = vadd.f32 %v2630_v15, %v2612_v43 }
 0x1cc   :  { %v2686_v46 = vadd.f32 %v2685_v53, %v2667_v28 }
 0x1cd   :  { %v2650_v25 = vadd.f32 %v2649_v39, %v2631_v29 }
 0x1d1   :  { %v2668_v1 = vpop.f32.mrf.mxu2  ;;  %v2687_v30 = vpop.f32.mrf.mxu3 }
 0x1d2   :  { %v2669_v58 = vadd.f32 %v2668_v1, %v2650_v25  ;;  %v2633_v32 = vpop.f32.mrf.mxu0  ;;  %v2652_v20 = vpop.f32.mrf.mxu1 }
 0x1d3   :  { %v2634_v2 = vadd.f32 %v2633_v32, %v2615_v17 }
 0x1d4   :  { %v2688_v8 = vadd.f32 %v2687_v30, %v2669_v58 }
 0x1d5   :  { %v2653_v24 = vadd.f32 %v2652_v20, %v2634_v2 }
 0x1d6   :  { %v2700_v5 = vpack.c.bf16 %v2688_v8, %v2686_v46 }
 0x1d8   :  { %3098 = vmatmul.bf16.vlgmr.msra.gmra.mxu1 %v2700_v5 }
 0x1d9   :  { %v2671_v31 = vpop.f32.mrf.mxu2  ;;  %v2690_v63 = vpop.f32.mrf.mxu3 }
 0x1da   :  { %v2635_v6 = vpop.f32.mrf.mxu0  ;;  %v2654_v12 = vpop.f32.mrf.mxu1  ;;  %v2672_v19 = vadd.f32 %v2671_v31, %v2653_v24 }
 0x1db   :  { %v2636_v45 = vadd.f32 %v2635_v6, %v2617_v3 }
 0x1dc   :  { %v2691_v10 = vadd.f32 %v2690_v63, %v2672_v19 }
 0x1dd   :  { %v2655_v13 = vadd.f32 %v2654_v12, %v2636_v45 }
 0x1e1   :  { %v2673_v22 = vpop.f32.mrf.mxu2  ;;  %v2692_v26 = vpop.f32.mrf.mxu3 }
 0x1e2   :  { %v2674_v56 = vadd.f32 %v2673_v22, %v2655_v13  ;;  %v3004_v60 = vpop.f32.mrf.mxu0  ;;  %v3023_v37 = vpop.f32.mrf.mxu1 }
 0x1e3   :  { %v3024_v53 = vadd.f32 %v3023_v37, %v3004_v60 }
 0x1e4   :  { %v2693_v23 = vadd.f32 %v2692_v26, %v2674_v56 }
 0x1e6   :  { %v2706_v44 = vpack.c.bf16 %v2693_v23, %v2691_v10 }
 0x1e8   :  { %3103 = vmatmul.bf16.gmra.mxu1 %v2706_v44  ;;  %3372 = vmatpush.bf16.msrb.mxu3 %v2706_v44 }
 0x1e9   :  { %v3042_v50 = vpop.f32.mrf.mxu2 }
 0x1ea   :  { %v3006_v11 = vpop.f32.mrf.mxu0  ;;  %v3025_v18 = vpop.f32.mrf.mxu1  ;;  %v3043_v43 = vadd.f32 %v3042_v50, %v3024_v53 }
 0x1eb   :  { %v3026_v25 = vadd.f32 %v3025_v18, %v3006_v11 }
 0x1ec   :  { %3373 = vmatpush.bf16.msrb.mxu3 %v2700_v5 }
 0x1f1   :  { %v3044_v14 = vpop.f32.mrf.mxu2 }
 0x1f2   :  { %v3009_v21 = vpop.f32.mrf.mxu0  ;;  %v3028_v0 = vpop.f32.mrf.mxu1  ;;  %v3045_v30 = vadd.f32 %v3044_v14, %v3026_v25  ;;  %v9633_v14 = vld [vmem:[#allocation5 + $0x8] sm:$0xff]  }
 0x1f3   :  { %v3029_v5 = vadd.f32 %v3028_v0, %v3009_v21  ;;  %v9626_v21 = vld [vmem:[#allocation5] sm:$0xff]   ;;  %v10382_v25 = vunpack.c.l.bf16 %v9633_v14 }
 0x1f4   :  { %v10376_v50 = vunpack.c.l.bf16 %v9626_v21 }
 0x1f5   :  { %11023 = vst [vmem:[#allocation19_spill] sm:$0xff] %v10382_v25  ;;  %vm111_vm8 = vcmp.gt.f32.partialorder %v10382_v25, 0.0 }
 0x1f6   :  { %11021 = vst [vmem:[#allocation17_spill] sm:$0xff] %v10376_v50  ;;  %vm109_vm1 = vcmp.gt.f32.partialorder %v10376_v50, 0.0 }
 0x1f9   :  { %v3047_v32 = vpop.f32.mrf.mxu2 }
 0x1fa   :  { %v3011_v35 = vpop.f32.mrf.mxu0  ;;  %v3030_v55 = vpop.f32.mrf.mxu1  ;;  %v3048_v3 = vadd.f32 %v3047_v32, %v3029_v5 }
 0x1fb   :  { %v3061_v48 = vpop.f32.mrf.mxu3  ;;  %v3031_v24 = vadd.f32 %v3030_v55, %v3011_v35  ;;  %v10374_v35 = vunpack.c.h.bf16 %v9626_v21 }
 0x1fc   :  { %v3062_v15 = vadd.f32 %v3061_v48, %v3043_v43 }
 0x1fd   :  { %11020 = vst [vmem:[#allocation16_spill] sm:$0xff] %v10374_v35  ;;  %vm110_vm0 = vcmp.gt.f32.partialorder %v10374_v35, 0.0 }
 0x201   :  { %v3049_v6 = vpop.f32.mrf.mxu2 }
 0x202   :  { %v3050_v13 = vadd.f32 %v3049_v6, %v3031_v24 }
 0x203   :  { %v3063_v39 = vpop.f32.mrf.mxu3 }
 0x204   :  { %v3064_v58 = vadd.f32 %v3063_v39, %v3045_v30 }
 0x20b   :  { %v3066_v8 = vpop.f32.mrf.mxu3 }
 0x20c   :  { %v3067_v2 = vadd.f32 %v3066_v8, %v3048_v3 }
 0x213   :  { %v3068_v19 = vpop.f32.mrf.mxu3 }
 0x214   :  { %v3069_v56 = vadd.f32 %v3068_v19, %v3050_v13 }
 0x22e   :  { %v3080_v41 = vpop.f32.mrf.mxu0 }
 0x22f   :  { %v3081_v29 = vadd.f32 %v3080_v41, %v3062_v15 }
 0x236   :  { %v3082_v61 = vpop.f32.mrf.mxu0 }
 0x237   :  { %v3083_v46 = vadd.f32 %v3082_v61, %v3064_v58 }
 0x23e   :  { %v3085_v31 = vpop.f32.mrf.mxu0 }
 0x23f   :  { %v3086_v63 = vadd.f32 %v3085_v31, %v3067_v2 }
 0x246   :  { %v3087_v22 = vpop.f32.mrf.mxu0 }
 0x247   :  { %v3088_v26 = vadd.f32 %v3087_v22, %v3069_v56 }
 0x255   :  { %v3099_v28 = vpop.f32.mrf.mxu1 }
 0x256   :  { %v3100_v1 = vadd.f32 %v3099_v28, %v3081_v29  ;;  %v10380_v28 = vunpack.c.h.bf16 %v9633_v14 }
 0x258   :  { %3158 = vperm.xlu2 %9650, %v3100_v1   ;;  %3113 = vrot.lane.b32.xlu0 %v3100_v1, %s9879_s30  ;;  %11022 = vst [vmem:[#allocation18_spill] sm:$0xff] %v10380_v28  ;;  %vm112_vm7 = vcmp.gt.f32.partialorder %v10380_v28, 0.0 }
 0x25d   :  { %v3101_v20 = vpop.f32.mrf.mxu1 }
 0x25e   :  { %v3102_v17 = vadd.f32 %v3101_v20, %v3083_v46 }
 0x260   :  { %3162 = vperm.xlu2 %9650, %v3102_v17   ;;  %3115 = vrot.lane.b32.xlu0 %v3102_v17, %s9879_s30 }
 0x265   :  { %v3104_v45 = vpop.f32.mrf.mxu1 }
 0x266   :  { %v3105_v12 = vadd.f32 %v3104_v45, %v3086_v63 }
 0x268   :  { %3117 = vrot.lane.b32.xlu1 %v3105_v12, %s9879_s30  ;;  %3166 = vperm.xlu0 %9651, %v3105_v12  }
 0x26d   :  { %v3106_v10 = vpop.f32.mrf.mxu1 }
 0x26e   :  { %v3107_v23 = vadd.f32 %v3106_v10, %v3088_v26 }
 0x270   :  { %3119 = vrot.lane.b32.xlu1 %v3107_v23, %s9879_s30 }
 0x278   :  { %3170 = vperm.xlu1 %9652, %v3107_v23  }
 0x2b2   :  { %v3159_v9 = vpop.permute.xlu2 %3158 }
 0x2ba   :  { %v3163_v18 = vpop.permute.xlu2 %3162 }
 0x2ca   :  { %v3114_v44 = vpop.permute.xlu0 %3113 }
 0x2cb   :  { %3125 = vxpose.xlu2.b32.start [1/4] (short) (narrow) %v3114_v44, 8 }
 0x2d2   :  { %v3116_v60 = vpop.permute.xlu0 %3115 }
 0x2d3   :  { %3126 = vxpose.xlu2.b32.cont [2/4] (short) (narrow) %v3116_v60, 8 }
 0x2da   :  { %v3118_v37 = vpop.permute.xlu1 %3117  ;;  %v3167_v41 = vpop.permute.xlu0 %3166 }
 0x2db   :  { %3127 = vxpose.xlu2.b32.cont [3/4] (short) (narrow) %v3118_v37, 8 }
 0x2e2   :  { %v3120_v11 = vpop.permute.xlu1 %3119 }
 0x2e3   :  { %3128 = vxpose.xlu2.b32.end [4/4] (short) (narrow) %v3120_v11, 8 }
 0x2ea   :  { %v3171_v55 = vpop.permute.xlu1 %3170 }
 0x364   :  { %v3141_v0 = vpop.trf.xlu2 }
 0x365   :  { %v3173_v48 = vperm.slane %v3141_v0, 0 }
 0x367   :  { %v3175_v53 = vadd.f32 %v3173_v48, %v3163_v18  ;;  %v3174_v43 = vadd.f32 %v3173_v48, %v3159_v9  ;;  %v3177_v15 = vadd.f32 %v3173_v48, %v3171_v55  ;;  %v3176_v39 = vadd.f32 %v3173_v48, %v3167_v41 }
 0x369   :  { %vm3179_vm2 = vcmp.ge.f32.partialorder %v3175_v53, 0.0  ;;  %v3183_v29 = vmul.f32 0.2, %v3175_v53  ;;  %vm3178_vm3 = vcmp.ge.f32.partialorder %v3174_v43, 0.0  ;;  %v3182_v61 = vmul.f32 0.2, %v3174_v43 }
 0x36a   :  { %v3185_v58 = vmul.f32 0.2, %v3177_v15  ;;  %v3184_v32 = vmul.f32 0.2, %v3176_v39  ;;  %vm3181_vm5 = vcmp.ge.f32.partialorder %v3177_v15, 0.0  ;;  %vm3180_vm6 = vcmp.ge.f32.partialorder %v3176_v39, 0.0 }
 0x36b   :  { %v3187_v1 = vsel %vm3179_vm2, %v3175_v53, %v3183_v29  ;;  %v3186_v30 = vsel %vm3178_vm3, %v3174_v43, %v3182_v61 }
 0x36c   :  { %v3191_v46 = vsel %vm110_vm0, %v3187_v1, -1e+30  ;;  %v3190_v8 = vsel %vm109_vm1, %v3186_v30, -1e+30  ;;  %v3189_v17 = vsel %vm3181_vm5, %v3177_v15, %v3185_v58  ;;  %v3188_v31 = vsel %vm3180_vm6, %v3176_v39, %v3184_v32 }
 0x36d   :  { %v3198_v20 = vsel %vm3194_vm4, %v3191_v46, -inf  ;;  %v3195_v5 = vsel %vm3194_vm4, %v3190_v8, -inf  ;;  %v3193_v3 = vsel %vm112_vm7, %v3189_v17, -1e+30  ;;  %v3192_v2 = vsel %vm111_vm8, %v3188_v31, -1e+30 }
 0x36e   :  { %3199 = vmax.xlane.f32.xlu0 %v3198_v20  ;;  %3196 = vmax.xlane.f32.xlu1 %v3195_v5  ;;  %v3204_v63 = vsel %vm3194_vm4, %v3193_v3, -inf  ;;  %v3201_v6 = vsel %vm3194_vm4, %v3192_v2, -inf }
 0x376   :  { %3205 = vmax.xlane.f32.xlu0 %v3204_v63  ;;  %3202 = vmax.xlane.f32.xlu1 %v3201_v6  ;;  %v8571_v63 = vld [vmem:[#allocation8 + $0x5d0] sm:$0xf]  ;;  %v9472_v6 = vld [vmem:[#allocation8 + $0x434] sm:$0xf0] }
 0x3e1   :  { %v3200_v45 = vpop.xlane.xlu0 %3199  ;;  %v3197_v24 = vpop.xlane.xlu1 %3196 }
 0x3e2   :  { %v3208_v12 = vsub.f32 %v3191_v46, %v3200_v45  ;;  %v3207_v19 = vsub.f32 %v3190_v8, %v3197_v24  ;;  %v8547_v24 = vld [vmem:[#allocation8 + $0x5a0] sm:$0xf] }
 0x3e4   :  { %v3213_v13 = vmul.f32 1.442695, %v3208_v12  ;;  %v3211_v22 = vmul.f32 1.442695, %v3207_v19  ;;  %v9520_v12 = vld [vmem:[#allocation8 + $0x5b4] sm:$0xf0] }
 0x3e5   :  { %v7995_v19 = vld [vmem:[#allocation8 + $0x150] sm:$0xf] }
 0x3e6   :  { %9653 = vpow2.f32 %v3213_v13 }
 0x3e7   :  { %9655 = vpow2.f32 %v3211_v22  ;;  %v9382_v22 = vld [vmem:[#allocation8 + $0x164] sm:$0xf0] }
 0x3e9   :  { %v3206_v56 = vpop.xlane.xlu0 %3205  ;;  %v3203_v26 = vpop.xlane.xlu1 %3202 }
 0x3ea   :  { %v3210_v10 = vsub.f32 %v3193_v3, %v3206_v56  ;;  %v3209_v23 = vsub.f32 %v3192_v2, %v3203_v26  ;;  %v8379_v3 = vld [vmem:[#allocation8 + $0x450] sm:$0xf]  ;;  %v9478_v2 = vld [vmem:[#allocation8 + $0x464] sm:$0xf0] }
 0x3eb   :  { %v8331_v56 = vld [vmem:[#allocation8 + $0x3f0] sm:$0xf]  ;;  %v9466_v26 = vld [vmem:[#allocation8 + $0x404] sm:$0xf0] }
 0x3ec   :  { %v9654_v44 = vpop.eup %9653  ;;  %v3217_v60 = vmul.f32 1.442695, %v3210_v10  ;;  %v3215_v37 = vmul.f32 1.442695, %v3209_v23  ;;  %v8548_v10 = vor.u32 %v9520_v12, %v8547_v24  ;;  %v7996_v23 = vor.u32 %v9382_v22, %v7995_v19  ;;  %v8115_v12 = vld [vmem:[#allocation8 + $0x240] sm:$0xf] }
 0x3ed   :  { %v9656_v11 = vpop.eup %9655  ;;  %v3220_v9 = vmul.f32 %v9654_v44, %v10374_v35  ;;  %v8523_v44 = vld [vmem:[#allocation8 + $0x570] sm:$0xf]  ;;  %v9412_v19 = vld [vmem:[#allocation8 + $0x254] sm:$0xf0] }
 0x3ee   :  { %9657 = vpow2.f32 %v3217_v60  ;;  %v3219_v18 = vmul.f32 %v9656_v11, %v10376_v50  ;;  %v9514_v60 = vld [vmem:[#allocation8 + $0x584] sm:$0xf0]  ;;  %5149 = vmatpush.bf16.msra.mxu0 %v7996_v23  ;;  %v8116_v22 = vor.u32 %v9412_v19, %v8115_v12  ;;  %v7899_v23 = vld [vmem:[#allocation8 + $0x90] sm:$0xf] }
 0x3ef   :  { %9659 = vpow2.f32 %v3215_v37  ;;  %v3226_v21 = vsel %vm3194_vm4, %v3220_v9, 0.0  ;;  %v8187_v37 = vld [vmem:[#allocation8 + $0x2d0] sm:$0xf]  ;;  %v9430_v11 = vld [vmem:[#allocation8 + $0x2e4] sm:$0xf0] }
 0x3f0   :  { %3227 = vadd.xlane.f32.xlu2 %v3226_v21  ;;  %v3223_v0 = vsel %vm3194_vm4, %v3219_v18, 0.0  ;;  %v8332_v21 = vor.u32 %v9466_v26, %v8331_v56  ;;  %v8235_v56 = vld [vmem:[#allocation8 + $0x330] sm:$0xf]  ;;  %v9442_v26 = vld [vmem:[#allocation8 + $0x344] sm:$0xf0] }
 0x3f1   :  { %3224 = vadd.xlane.f32.xlu1 %v3223_v0  ;;  %v8307_v0 = vld [vmem:[#allocation8 + $0x3c0] sm:$0xf]  ;;  %v8763_v12 = vld [vmem:[#allocation8 + $0x750] sm:$0xf] }
 0x3f4   :  { %v9658_v48 = vpop.eup %9657 }
 0x3f5   :  { %v9660_v41 = vpop.eup %9659  ;;  %v3222_v55 = vmul.f32 %v9658_v48, %v10380_v28  ;;  %v8163_v48 = vld [vmem:[#allocation8 + $0x2a0] sm:$0xf]  ;;  %v9396_v28 = vld [vmem:[#allocation8 + $0x1d4] sm:$0xf0] }
 0x3f6   :  { %v3221_v53 = vmul.f32 %v9660_v41, %v10382_v25  ;;  %v9424_v41 = vld [vmem:[#allocation8 + $0x2b4] sm:$0xf0]  ;;  %v8059_v25 = vld [vmem:[#allocation8 + $0x1c0] sm:$0xf] }
 0x3f7   :  { %v3232_v43 = vsel %vm3194_vm4, %v3222_v55, 0.0 }
 0x3f8   :  { %v3229_v14 = vsel %vm3194_vm4, %v3221_v53, 0.0 }
 0x3f9   :  { %3233 = vadd.xlane.f32.xlu1 %v3232_v43  ;;  %3230 = vadd.xlane.f32.xlu0 %v3229_v14  ;;  %v7947_v43 = vld [vmem:[#allocation8 + $0xf0] sm:$0xf]  ;;  %v9370_v14 = vld [vmem:[#allocation8 + $0x104] sm:$0xf0] }
 0x408   :  { %5885 = vrot.lane.b32.xlu2 %v10123_v16, %s9880_s7  ;;  %v8355_v16 = vld [vmem:[#allocation8 + $0x420] sm:$0xf] }
 0x409   :  { %v8356_v13 = vor.u32 %v9472_v6, %v8355_v16  ;;  %v7923_v16 = vld [vmem:[#allocation8 + $0xc0] sm:$0xf]  ;;  %v9364_v6 = vld [vmem:[#allocation8 + $0xd4] sm:$0xf0] }
 0x40a   :  { %v7924_v24 = vor.u32 %v9364_v6, %v7923_v16  ;;  %v7949_v16 = vld [vmem:[#allocation8 + $0x108] sm:$0xf0] }
 0x40d   :  { %5859 = vrot.lane.b32.xlu0 %v10079_v42, %s9880_s7  ;;  %v8380_v42 = vor.u32 %v9478_v2, %v8379_v3  ;;  %v9502_v3 = vld [vmem:[#allocation8 + $0x524] sm:$0xf0] }
 0x410   :  { %5919 = vrot.lane.b32.xlu2 %v10259_v34, %s9880_s7  ;;  %v9460_v34 = vld [vmem:[#allocation8 + $0x3d4] sm:$0xf0] }
 0x412   :  { %5875 = vrot.lane.b32.xlu1 %v10155_v51, %s9880_s7  ;;  %v9526_v51 = vld [vmem:[#allocation8 + $0x5e4] sm:$0xf0] }
 0x413   :  { %v8572_v45 = vor.u32 %v9526_v51, %v8571_v63  ;;  %v9686_v63 = vld [vmem:[%s11003_s4 + $0x20] sm:$0xff]  ;;  %v8451_v51 = vld [vmem:[#allocation8 + $0x4e0] sm:$0xf] }
 0x415   :  { %5857 = vrot.lane.b32.xlu0 %v10091_v49, %s9880_s7  ;;  %v9376_v49 = vld [vmem:[#allocation8 + $0x134] sm:$0xf0] }
 0x418   :  { %5897 = vrot.lane.b32.xlu2 %v10171_v7, %s9880_s7  ;;  %v9687_v7 = vld [vmem:[%s11003_s4 + $0x18] sm:$0xff] }
 0x41a   :  { %5873 = vrot.lane.b32.xlu1 %v10179_v40, %s9880_s7 }
 0x420   :  { %5933 = vrot.lane.b32.xlu2 %v10342_v27, %s9880_s7  ;;  %v9693_v27 = vld [vmem:[%s11003_s4] sm:$0xff] }
 0x422   :  { %5871 = vrot.lane.b32.xlu1 %v10206_v33, %s9880_s7 }
 0x428   :  { %5877 = vrot.lane.b32.xlu2 %v10212_v47, %s9880_s7  ;;  %v9689_v47 = vld [vmem:[%s11003_s4 + $0xb8] sm:$0xff] }
 0x42a   :  { %5869 = vrot.lane.b32.xlu1 %v10235_v59, %s9880_s7  ;;  %v9688_v59 = vld [vmem:[%s11003_s4 + $0x10] sm:$0xff] }
 0x430   :  { %5913 = vrot.lane.b32.xlu2 %v10315_v52, %s9880_s7  ;;  %v9692_v52 = vld [vmem:[%s11003_s4 + $0xb0] sm:$0xff] }
 0x432   :  { %5867 = vrot.lane.b32.xlu1 %v10249_v4, %s9880_s7  ;;  %v9690_v4 = vld [vmem:[%s11003_s4 + $0x8] sm:$0xff] }
 0x438   :  { %5927 = vrot.lane.b32.xlu2 %v10360_v62, %s9880_s7  ;;  %v9694_v62 = vld [vmem:[%s11003_s4 + $0xf0] sm:$0xff] }
 0x43a   :  { %5865 = vrot.lane.b32.xlu1 %v10266_v38, %s9880_s7  ;;  %v9691_v38 = vld [vmem:[%s11003_s4 + $0xf8] sm:$0xff] }
 0x442   :  { %5847 = vrot.lane.b32.xlu1 %v9690_v4, %s9880_s7  ;;  %v9421_v4 = vld [vmem:[#allocation8 + $0x2a4] sm:$0xf] }
 0x44a   :  { %5863 = vrot.lane.b32.xlu1 %v10276_v54, %s9880_s7  ;;  %v9695_v54 = vld [vmem:[%s11003_s4 + $0xa8] sm:$0xff] }
 0x452   :  { %5845 = vrot.lane.b32.xlu1 %v9693_v27, %s9880_s7 }
 0x45a   :  { %5861 = vrot.lane.b32.xlu1 %v10303_v57, %s9880_s7  ;;  %v9496_v57 = vld [vmem:[#allocation8 + $0x4f4] sm:$0xf0] }
 0x463   :  { %v3228_v15 = vpop.xlane.xlu2 %3227 }
 0x464   :  { %9661 = vrcp.f32 %v3228_v15  ;;  %v3225_v39 = vpop.xlane.xlu1 %3224  ;;  %v8499_v15 = vld [vmem:[#allocation8 + $0x540] sm:$0xf] }
 0x465   :  { %9663 = vrcp.f32 %v3225_v39  ;;  %v9508_v39 = vld [vmem:[#allocation8 + $0x554] sm:$0xf0] }
 0x46a   :  { %v9662_v29 = vpop.eup %9661 }
 0x46b   :  { %v9664_v61 = vpop.eup %9663  ;;  %v3240_v1 = vmul.f32 %v9662_v29, %v3220_v9  ;;  %v7971_v9 = vld [vmem:[#allocation8 + $0x120] sm:$0xf]  ;;  %v7948_v29 = vor.u32 %v9370_v14, %v7947_v43  ;;  %v9484_v14 = vld [vmem:[#allocation8 + $0x494] sm:$0xf0] }
 0x46c   :  { %v3239_v30 = vmul.f32 %v9664_v61, %v3219_v18  ;;  %v3231_v58 = vpop.xlane.xlu0 %3230  ;;  %v3234_v46 = vpop.xlane.xlu1 %3233  ;;  %v8188_v18 = vor.u32 %v9430_v11, %v8187_v37  ;;  %v7972_v40 = vor.u32 %v9376_v49, %v7971_v9  ;;  %v8139_v61 = vld [vmem:[#allocation8 + $0x270] sm:$0xf]  ;;  %v9490_v37 = vld [vmem:[#allocation8 + $0x4c4] sm:$0xf0] }
 0x46d   :  { %9665 = vrcp.f32 %v3231_v58  ;;  %v8308_v58 = vor.u32 %v9460_v34, %v8307_v0  ;;  %v8091_v49 = vld [vmem:[#allocation8 + $0x210] sm:$0xf]  ;;  %v8211_v0 = vld [vmem:[#allocation8 + $0x300] sm:$0xf] }
 0x46e   :  { %v10406_v32 = vpack.c.bf16 %v3240_v1, %v3239_v30  ;;  %9667 = vrcp.f32 %v3234_v46  ;;  %5168 = vmatpush.bf16.msra.mxu1 %v8188_v18  ;;  %5150 = vmatpush.bf16.msra.mxu0 %v7972_v40  ;;  %v9418_v1 = vld [vmem:[#allocation8 + $0x284] sm:$0xf0]  ;;  %v9685_v30 = vld [vmem:[%s11003_s4 + $0x28] sm:$0xff]  ;;  %v8283_v46 = vld [vmem:[#allocation8 + $0x390] sm:$0xf] }
 0x46f   :  { %5855 = vrot.lane.b32.xlu0 %v9685_v30, %s9880_s7  ;;  %v9406_v18 = vld [vmem:[#allocation8 + $0x224] sm:$0xf0]  ;;  %v7997_v30 = vld [vmem:[#allocation8 + $0x168] sm:$0xf0] }
 0x470   :  { %7813 = vmatmul.msk.bf16.vlgmr.msra.gmra.mxu2 %vm3194_vm4, %v10406_v32  ;;  %7815 = vmatmul.msk.bf16.vlgmr.msra.gmra.mxu3 %vm3194_vm4, %v10406_v32  ;;  %v9697_v40 = vld [vmem:[%s11003_s4 + $0x138] sm:$0xff] }
 0x471   :  { %7817 = vmatmul.msk.bf16.vlgmr.msrb.gmra.mxu0 %vm3194_vm4, %v10406_v32  ;;  %7819 = vmatmul.msk.bf16.vlgmr.msrb.gmra.mxu1 %vm3194_vm4, %v10406_v32 }
 0x472   :  { %5187 = vmatpush.bf16.msra.mxu2 %v8380_v42  ;;  %5206 = vmatpush.bf16.msra.mxu3 %v8572_v45  ;;  %v9448_v42 = vld [vmem:[#allocation8 + $0x374] sm:$0xf0] }
 0x473   :  { %v9666_v8 = vpop.eup %9665  ;;  %5151 = vmatpush.bf16.msra.mxu0 %v7948_v29 }
 0x474   :  { %v9668_v20 = vpop.eup %9667  ;;  %v3241_v5 = vmul.f32 %v9666_v8, %v3221_v53  ;;  %v8164_v53 = vor.u32 %v9424_v41, %v8163_v48  ;;  %v9454_v8 = vld [vmem:[#allocation8 + $0x3a4] sm:$0xf0]  ;;  %v9436_v48 = vld [vmem:[#allocation8 + $0x314] sm:$0xf0]  ;;  %v7875_v41 = vld [vmem:[#allocation8 + $0x60] sm:$0xf] }
 0x475   :  { %v3242_v17 = vmul.f32 %v9668_v20, %v3222_v55  ;;  %v8524_v55 = vor.u32 %v9514_v60, %v8523_v44  ;;  %v8500_v20 = vor.u32 %v9508_v39, %v8499_v15  ;;  %v8284_v2 = vor.u32 %v9454_v8, %v8283_v46  ;;  %v9358_v44 = vld [vmem:[#allocation8 + $0xa4] sm:$0xf0]  ;;  %v8067_v15 = vld [vmem:[#allocation8 + $0x1e0] sm:$0xf]  ;;  %v9400_v39 = vld [vmem:[#allocation8 + $0x1f4] sm:$0xf0] }
 0x476   :  { %5188 = vmatpush.bf16.msra.mxu2 %v8356_v13  ;;  %5207 = vmatpush.bf16.msra.mxu3 %v8548_v10  ;;  %v8452_v13 = vor.u32 %v9496_v57, %v8451_v51  ;;  %v8427_v10 = vld [vmem:[#allocation8 + $0x4b0] sm:$0xf]  ;;  %v8236_v60 = vor.u32 %v9442_v26, %v8235_v56  ;;  %v7900_v11 = vor.u32 %v9358_v44, %v7899_v23  ;;  %v8189_v46 = vld [vmem:[#allocation8 + $0x2e8] sm:$0xf0]  ;;  %v9367_v51 = vld [vmem:[#allocation8 + $0xf4] sm:$0xf] }
 0x477   :  { %v10422_v31 = vpack.c.bf16 %v3242_v17, %v3241_v5  ;;  %5169 = vmatpush.bf16.msra.mxu1 %v8164_v53  ;;  %v8140_v5 = vor.u32 %v9418_v1, %v8139_v61  ;;  %v8475_v17 = vld [vmem:[#allocation8 + $0x510] sm:$0xf]  ;;  %5853 = vrot.lane.b32.xlu0 %v9686_v63, %s9880_s7  ;;  %v8428_v9 = vor.u32 %v9490_v37, %v8427_v10  ;;  %v8403_v53 = vld [vmem:[#allocation8 + $0x480] sm:$0xf]  ;;  %v9379_v1 = vld [vmem:[#allocation8 + $0x154] sm:$0xf] }
 0x478   :  { %v8476_v33 = vor.u32 %v9502_v3, %v8475_v17  ;;  %5152 = vmatpush.bf16.msra.mxu0 %v7924_v24  ;;  %v8212_v34 = vor.u32 %v9436_v48, %v8211_v0  ;;  %v8404_v29 = vor.u32 %v9484_v14, %v8403_v53  ;;  %v8068_v61 = vor.u32 %v9400_v39, %v8067_v15  ;;  %v8043_v17 = vld [vmem:[#allocation8 + $0x1b0] sm:$0xf]  ;;  %v7973_v63 = vld [vmem:[#allocation8 + $0x138] sm:$0xf0]  ;;  %v9415_v24 = vld [vmem:[#allocation8 + $0x274] sm:$0xf] }
 0x479   :  { %v8141_v57 = vld [vmem:[#allocation8 + $0x288] sm:$0xf0]  ;;  %v8955_v56 = vld [vmem:[#allocation8 + $0x8d0] sm:$0xf]  ;;  %v9622_v26 = vld [vmem:[#allocation8 + $0x8e4] sm:$0xf0] }
 0x47a   :  { %5189 = vmatpush.bf16.msra.mxu2 %v8332_v21  ;;  %5208 = vmatpush.bf16.msra.mxu3 %v8524_v55  ;;  %v8092_v21 = vor.u32 %v9406_v18, %v8091_v49  ;;  %v9352_v55 = vld [vmem:[#allocation8 + $0x74] sm:$0xf0]  ;;  %v8144_v19 = vor.u32 %v9415_v24, %v8141_v57  ;;  %v9361_v10 = vld [vmem:[#allocation8 + $0xc4] sm:$0xf]  ;;  %v8956_v23 = vor.u32 %v9622_v26, %v8955_v56  ;;  %v7925_v44 = vld [vmem:[#allocation8 + $0xd8] sm:$0xf0] }
 0x47b   :  { %5170 = vmatpush.bf16.msra.mxu1 %v8140_v5  ;;  %v7876_v43 = vor.u32 %v9352_v55, %v7875_v41  ;;  %v9346_v5 = vld [vmem:[#allocation8 + $0x44] sm:$0xf0]  ;;  %v8117_v37 = vld [vmem:[#allocation8 + $0x258] sm:$0xf0]  ;;  %v8739_v18 = vld [vmem:[#allocation8 + $0x720] sm:$0xf] }
 0x47c   :  { %5153 = vmatpush.bf16.msra.mxu0 %v7900_v11  ;;  %v9700_v11 = vld [vmem:[%s11003_s4 + $0x98] sm:$0xff]  ;;  %v9701_v0 = vld [vmem:[%s11003_s4 + $0x170] sm:$0xff]  ;;  %v9616_v41 = vld [vmem:[#allocation8 + $0x8b4] sm:$0xf0] }
 0x47d   :  { %v8931_v48 = vld [vmem:[#allocation8 + $0x8a0] sm:$0xf]  ;;  %v9355_v55 = vld [vmem:[#allocation8 + $0x94] sm:$0xf]  ;;  %v7901_v53 = vld [vmem:[#allocation8 + $0xa8] sm:$0xf0] }
 0x47e   :  { %5190 = vmatpush.bf16.msra.mxu2 %v8308_v58  ;;  %5209 = vmatpush.bf16.msra.mxu3 %v8500_v20  ;;  %v9427_v58 = vld [vmem:[#allocation8 + $0x2d4] sm:$0xf]  ;;  %v7851_v20 = vld [vmem:[#allocation8 + $0x30] sm:$0xf]  ;;  %v8093_v14 = vld [vmem:[#allocation8 + $0x228] sm:$0xf0]  ;;  %v7904_v15 = vor.u32 %v9355_v55, %v7901_v53 }
 0x47f   :  { %5851 = vrot.lane.b32.xlu0 %v9687_v7, %s9880_s7  ;;  %5171 = vmatpush.bf16.msra.mxu1 %v8116_v22  ;;  %v8192_v8 = vor.u32 %v9427_v58, %v8189_v46  ;;  %v7852_v3 = vor.u32 %v9346_v5, %v7851_v20  ;;  %v9698_v7 = vld [vmem:[%s11003_s4 + $0xe0] sm:$0xff]  ;;  %v9349_v46 = vld [vmem:[#allocation8 + $0x64] sm:$0xf]  ;;  %v7877_v20 = vld [vmem:[#allocation8 + $0x78] sm:$0xf0] }
 0x480   :  { %7814 = vmatmul.msk.bf16.gmra.mxu2 %vm3194_vm4, %v10422_v31  ;;  %7816 = vmatmul.msk.bf16.gmra.mxu3 %vm3194_vm4, %v10422_v31  ;;  %v8907_v58 = vld [vmem:[#allocation8 + $0x870] sm:$0xf]  ;;  %v9397_v5 = vld [vmem:[#allocation8 + $0x1e4] sm:$0xf]  ;;  %v9550_v24 = vld [vmem:[#allocation8 + $0x6a4] sm:$0xf0] }
 0x481   :  { %7818 = vmatmul.msk.bf16.gmra.mxu0 %vm3194_vm4, %v10422_v31  ;;  %7820 = vmatmul.msk.bf16.gmra.mxu1 %vm3194_vm4, %v10422_v31  ;;  %v8859_v26 = vld [vmem:[#allocation8 + $0x810] sm:$0xf]  ;;  %v9544_v55 = vld [vmem:[#allocation8 + $0x674] sm:$0xf0] }
 0x482   :  { %5191 = vmatpush.bf16.msra.mxu2 %v8284_v2  ;;  %5210 = vmatpush.bf16.msra.mxu3 %v8476_v33  ;;  %v9394_v2 = vld [vmem:[#allocation8 + $0x1c4] sm:$0xf0]  ;;  %v9373_v33 = vld [vmem:[#allocation8 + $0x124] sm:$0xf] }
 0x483   :  { %5172 = vmatpush.bf16.msra.mxu1 %v8092_v21  ;;  %5154 = vmatpush.bf16.msra.mxu0 %v7876_v43  ;;  %v9403_v43 = vld [vmem:[#allocation8 + $0x214] sm:$0xf] }
 0x484   :  { %v8096_v39 = vor.u32 %v9403_v43, %v8093_v14 }
 0x486   :  { %5211 = vmatpush.bf16.msra.mxu3 %v8452_v13  ;;  %v9574_v13 = vld [vmem:[#allocation8 + $0x764] sm:$0xf0] }
 0x487   :  { %5849 = vrot.lane.b32.xlu0 %v9688_v59, %s9880_s7  ;;  %5173 = vmatpush.bf16.msra.mxu1 %v8068_v61  ;;  %v8044_v59 = vor.u32 %v9394_v2, %v8043_v17  ;;  %v8764_v22 = vor.u32 %v9574_v13, %v8763_v12  ;;  %v9562_v61 = vld [vmem:[#allocation8 + $0x704] sm:$0xf0]  ;;  %v8069_v17 = vld [vmem:[#allocation8 + $0x1f8] sm:$0xf0]  ;;  %v7880_v2 = vor.u32 %v9349_v46, %v7877_v20 }
 0x488   :  { %5155 = vmatpush.bf16.msra.mxu0 %v7852_v3  ;;  %v9702_v3 = vld [vmem:[%s11003_s4 + $0xd8] sm:$0xff] }
 0x48a   :  { %5212 = vmatpush.bf16.msra.mxu3 %v8428_v9  ;;  %v7928_v9 = vor.u32 %v9361_v10, %v7925_v44  ;;  %v9598_v10 = vld [vmem:[#allocation8 + $0x824] sm:$0xf0]  ;;  %v7829_v44 = vld [vmem:[#allocation8 + $0x18] sm:$0xf0] }
 0x48b   :  { %5174 = vmatpush.bf16.msra.mxu1 %v8044_v59 }
 0x48e   :  { %5213 = vmatpush.bf16.msra.mxu3 %v8404_v29  ;;  %v8715_v29 = vld [vmem:[#allocation8 + $0x6f0] sm:$0xf] }
 0x48f   :  { %5891 = vrot.lane.b32.xlu0 %v9689_v47, %s9880_s7  ;;  %v7976_v47 = vor.u32 %v9373_v33, %v7973_v63  ;;  %v8072_v33 = vor.u32 %v9397_v5, %v8069_v17  ;;  %v8691_v63 = vld [vmem:[#allocation8 + $0x6c0] sm:$0xf]  ;;  %v8619_v5 = vld [vmem:[#allocation8 + $0x630] sm:$0xf]  ;;  %v9538_v17 = vld [vmem:[#allocation8 + $0x644] sm:$0xf0] }
 0x490   :  { %7821 = vmatmul.msk.bf16.vlgmr.msrb.gmra.mxu2 %vm3194_vm4, %v10406_v32  ;;  %7823 = vmatmul.msk.bf16.vlgmr.msrb.gmra.mxu3 %vm3194_vm4, %v10406_v32  ;;  %v9696_v32 = vld [vmem:[%s11003_s4 + $0xe8] sm:$0xff] }
 0x491   :  { %5903 = vrot.lane.b32.xlu1 %v9696_v32, %s9880_s7  ;;  %v8019_v32 = vld [vmem:[#allocation8 + $0x180] sm:$0xf] }
 0x492   :  { %5282 = vmatpush.bf16.msrb.mxu3 %v8192_v8 }
 0x497   :  { %5907 = vrot.lane.b32.xlu0 %v9691_v38, %s9880_s7  ;;  %v8165_v38 = vld [vmem:[#allocation8 + $0x2b8] sm:$0xf0] }
 0x498   :  { %v8168_v27 = vor.u32 %v9421_v4, %v8165_v38  ;;  %v9703_v38 = vld [vmem:[%s11003_s4 + $0x90] sm:$0xff] }
 0x499   :  { %5939 = vrot.lane.b32.xlu1 %v10309_v36, %s9880_s7  ;;  %v8000_v36 = vor.u32 %v9379_v1, %v7997_v30  ;;  %v10538_v1 = vld [vmem:[#allocation10] sm:$0xff]  ;;  %v8716_v30 = vor.u32 %v9562_v61, %v8715_v29 }
 0x49a   :  { %5283 = vmatpush.bf16.msrb.mxu3 %v8168_v27  ;;  %v3249_v59 = vperm.slane %v10538_v1, 4  ;;  %v9604_v27 = vld [vmem:[#allocation8 + $0x854] sm:$0xf0]  ;;  %v3248_v56 = vperm.slane %v10538_v1, 2 }
 0x49c   :  { %v10550_v57 = vperm.slane %v3249_v59, 0  ;;  %v10568_v43 = vperm.slane %v3248_v56, 0  ;;  %v8811_v59 = vld [vmem:[#allocation8 + $0x7b0] sm:$0xf]  ;;  %v9613_v56 = vld [vmem:[#allocation8 + $0x8a4] sm:$0xf] }
 0x49e   :  { %5284 = vmatpush.bf16.msrb.mxu3 %v8144_v19 }
 0x49f   :  { %5889 = vrot.lane.b32.xlu0 %v9692_v52, %s9880_s7  ;;  %v9699_v52 = vld [vmem:[%s11003_s4 + $0x130] sm:$0xff] }
 0x4a0   :  { %7822 = vmatmul.msk.bf16.gmra.mxu2 %vm3194_vm4, %v10422_v31  ;;  %7824 = vmatmul.msk.bf16.gmra.mxu3 %vm3194_vm4, %v10422_v31  ;;  %v8259_v31 = vld [vmem:[#allocation8 + $0x360] sm:$0xf] }
 0x4a1   :  { %v8260_v45 = vor.u32 %v9448_v42, %v8259_v31  ;;  %5921 = vrot.lane.b32.xlu1 %v9699_v52, %s9880_s7  ;;  %v9388_v42 = vld [vmem:[#allocation8 + $0x194] sm:$0xf0]  ;;  %v8883_v52 = vld [vmem:[#allocation8 + $0x840] sm:$0xf] }
 0x4a2   :  { %v8020_v6 = vor.u32 %v9388_v42, %v8019_v32  ;;  %v7853_v42 = vld [vmem:[#allocation8 + $0x48] sm:$0xf0] }
 0x4a3   :  { %5192 = vmatpush.bf16.msra.mxu2 %v8260_v45  ;;  %v7952_v45 = vor.u32 %v9367_v51, %v7949_v16  ;;  %v9391_v51 = vld [vmem:[#allocation8 + $0x1b4] sm:$0xf]  ;;  %v8045_v16 = vld [vmem:[#allocation8 + $0x1c8] sm:$0xf0] }
 0x4a4   :  { %5175 = vmatpush.bf16.msra.mxu1 %v8020_v6  ;;  %v8048_v19 = vor.u32 %v9391_v51, %v8045_v16 }
 0x4a7   :  { %5905 = vrot.lane.b32.xlu0 %v9694_v62, %s9880_s7  ;;  %5193 = vmatpush.bf16.msra.mxu2 %v8236_v60  ;;  %v7827_v62 = vld [vmem:[#allocation8] sm:$0xf]  ;;  %v9409_v60 = vld [vmem:[#allocation8 + $0x244] sm:$0xf] }
 0x4a8   :  { %v8120_v49 = vor.u32 %v9409_v60, %v8117_v37  ;;  %5244 = vmatpush.bf16.msrb.mxu1 %v8956_v23  ;;  %v9337_v23 = vld [vmem:[#allocation8 + $0x4] sm:$0xf]  ;;  %v9704_v60 = vld [vmem:[%s11003_s4 + $0x168] sm:$0xff] }
 0x4a9   :  { %5937 = vrot.lane.b32.xlu1 %v9701_v0, %s9880_s7 }
 0x4aa   :  { %5285 = vmatpush.bf16.msrb.mxu3 %v8120_v49  ;;  %v7832_v49 = vor.u32 %v9337_v23, %v7829_v44  ;;  %v9707_v23 = vld [vmem:[%s11003_s4 + $0xc8] sm:$0xff]  ;;  %v8381_v44 = vld [vmem:[#allocation8 + $0x468] sm:$0xf0] }
 0x4ab   :  { %5194 = vmatpush.bf16.msra.mxu2 %v8212_v34  ;;  %v8932_v34 = vor.u32 %v9616_v41, %v8931_v48  ;;  %v8643_v41 = vld [vmem:[#allocation8 + $0x660] sm:$0xf] }
 0x4ac   :  { %v8644_v14 = vor.u32 %v9544_v55, %v8643_v41  ;;  %v9559_v41 = vld [vmem:[#allocation8 + $0x6f4] sm:$0xf]  ;;  %v8717_v55 = vld [vmem:[#allocation8 + $0x708] sm:$0xf0] }
 0x4ad   :  { %5245 = vmatpush.bf16.msrb.mxu1 %v8932_v34  ;;  %v9705_v34 = vld [vmem:[%s11003_s4 + $0x120] sm:$0xff] }
 0x4ae   :  { %5286 = vmatpush.bf16.msrb.mxu3 %v8096_v39  ;;  %v8765_v39 = vld [vmem:[#allocation8 + $0x768] sm:$0xf0] }
 0x4af   :  { %5887 = vrot.lane.b32.xlu0 %v9695_v54, %s9880_s7  ;;  %5263 = vmatpush.bf16.msrb.mxu2 %v8000_v36  ;;  %v9340_v54 = vld [vmem:[#allocation8 + $0x14] sm:$0xf0]  ;;  %v9610_v36 = vld [vmem:[#allocation8 + $0x884] sm:$0xf0] }
 0x4b0   :  { %v7828_v31 = vor.u32 %v9340_v54, %v7827_v62  ;;  %v8908_v8 = vor.u32 %v9610_v36, %v8907_v58  ;;  %v9343_v62 = vld [vmem:[#allocation8 + $0x34] sm:$0xf]  ;;  %v9592_v58 = vld [vmem:[#allocation8 + $0x7f4] sm:$0xf0] }
 0x4b1   :  { %5881 = vrot.lane.b32.xlu1 %v9703_v38, %s9880_s7  ;;  %v7856_v6 = vor.u32 %v9343_v62, %v7853_v42  ;;  %v8595_v62 = vld [vmem:[#allocation8 + $0x600] sm:$0xf] }
 0x4b2   :  { %5156 = vmatpush.bf16.msra.mxu0 %v7828_v31  ;;  %5246 = vmatpush.bf16.msrb.mxu1 %v8908_v8  ;;  %v8884_v31 = vor.u32 %v9604_v27, %v8883_v52  ;;  %v8957_v8 = vld [vmem:[#allocation8 + $0x8e8] sm:$0xf0] }
 0x4b3   :  { %5264 = vmatpush.bf16.msrb.mxu2 %v7976_v47  ;;  %v3250_v47 = vperm.slane %v10538_v1, 6  ;;  %5287 = vmatpush.bf16.msrb.mxu3 %v8072_v33  ;;  %v8620_v33 = vor.u32 %v9538_v17, %v8619_v5 }
 0x4b5   :  { %v10552_v12 = vperm.slane %v3250_v47, 0  ;;  %v9586_v47 = vld [vmem:[#allocation8 + $0x7c4] sm:$0xf0] }
 0x4b6   :  { %5225 = vmatpush.bf16.msrb.mxu0 %v8764_v22  ;;  %5247 = vmatpush.bf16.msrb.mxu1 %v8884_v31  ;;  %v3247_v22 = vperm.slane %v10538_v1, 0  ;;  %v9619_v1 = vld [vmem:[#allocation8 + $0x8d4] sm:$0xf] }
 0x4b7   :  { %5923 = vrot.lane.b32.xlu0 %v9697_v40, %s9880_s7  ;;  %5265 = vmatpush.bf16.msrb.mxu2 %v7952_v45  ;;  %v9568_v40 = vld [vmem:[#allocation8 + $0x734] sm:$0xf0]  ;;  %v8667_v45 = vld [vmem:[#allocation8 + $0x690] sm:$0xf]  ;;  %v8960_v27 = vor.u32 %v9619_v1, %v8957_v8  ;;  %v9469_v1 = vld [vmem:[#allocation8 + $0x424] sm:$0xf] }
 0x4b8   :  { %v8740_v21 = vor.u32 %v9568_v40, %v8739_v18  ;;  %v8668_v13 = vor.u32 %v9550_v24, %v8667_v45  ;;  %5288 = vmatpush.bf16.msrb.mxu3 %v8048_v19  ;;  %v9385_v18 = vld [vmem:[#allocation8 + $0x184] sm:$0xf]  ;;  %v8021_v40 = vld [vmem:[#allocation8 + $0x198] sm:$0xf0]  ;;  %v10566_v53 = vperm.slane %v3247_v22, 0  ;;  %v8812_v24 = vor.u32 %v9586_v47, %v8811_v59 }
 0x4b9   :  { %v8024_v48 = vor.u32 %v9385_v18, %v8021_v40  ;;  %5917 = vrot.lane.b32.xlu1 %v9705_v34, %s9880_s7  ;;  %v8741_v45 = vld [vmem:[#allocation8 + $0x738] sm:$0xf0] }
 0x4ba   :  { %5226 = vmatpush.bf16.msrb.mxu0 %v8740_v21  ;;  %v8885_v59 = vld [vmem:[#allocation8 + $0x858] sm:$0xf0] }
 0x4bb   :  { %5266 = vmatpush.bf16.msrb.mxu2 %v7928_v9  ;;  %v8860_v9 = vor.u32 %v9598_v10, %v8859_v26  ;;  %v8933_v26 = vld [vmem:[#allocation8 + $0x8b8] sm:$0xf0]  ;;  %v9475_v10 = vld [vmem:[#allocation8 + $0x454] sm:$0xf] }
 0x4bc   :  { %5289 = vmatpush.bf16.msrb.mxu3 %v8024_v48  ;;  %v8936_v48 = vor.u32 %v9613_v56, %v8933_v26  ;;  %v9547_v56 = vld [vmem:[#allocation8 + $0x694] sm:$0xf]  ;;  %v8669_v26 = vld [vmem:[#allocation8 + $0x6a8] sm:$0xf0] }
 0x4bd   :  { %5248 = vmatpush.bf16.msrb.mxu1 %v8860_v9 }
 0x4be   :  { %5227 = vmatpush.bf16.msrb.mxu0 %v8716_v30  ;;  %v8835_v30 = vld [vmem:[#allocation8 + $0x7e0] sm:$0xf] }
 0x4bf   :  { %5901 = vrot.lane.b32.xlu0 %v9698_v7, %s9880_s7  ;;  %5267 = vmatpush.bf16.msrb.mxu2 %v7904_v15  ;;  %v9556_v7 = vld [vmem:[#allocation8 + $0x6d4] sm:$0xf0]  ;;  %v9571_v15 = vld [vmem:[#allocation8 + $0x754] sm:$0xf]  ;;  %v8836_v20 = vor.u32 %v9592_v58, %v8835_v30  ;;  %v8357_v30 = vld [vmem:[#allocation8 + $0x438] sm:$0xf0] }
 0x4c0   :  { %v8692_v4 = vor.u32 %v9556_v7, %v8691_v63  ;;  %v8768_v52 = vor.u32 %v9571_v15, %v8765_v39  ;;  %v9607_v15 = vld [vmem:[#allocation8 + $0x874] sm:$0xf]  ;;  %v8909_v39 = vld [vmem:[#allocation8 + $0x888] sm:$0xf0]  ;;  %v8360_v47 = vor.u32 %v9469_v1, %v8357_v30 }
 0x4c1   :  { %5249 = vmatpush.bf16.msrb.mxu1 %v8836_v20  ;;  %5895 = vrot.lane.b32.xlu1 %v9707_v23, %s9880_s7  ;;  %v9523_v58 = vld [vmem:[#allocation8 + $0x5d4] sm:$0xf]  ;;  %v8861_v23 = vld [vmem:[#allocation8 + $0x828] sm:$0xf0] }
 0x4c2   :  { %5228 = vmatpush.bf16.msrb.mxu0 %v8692_v4 }
 0x4c3   :  { %5268 = vmatpush.bf16.msrb.mxu2 %v7880_v2 }
 0x4c5   :  { %5250 = vmatpush.bf16.msrb.mxu1 %v8812_v24  ;;  %v9709_v24 = vld [vmem:[%s11003_s4 + $0x158] sm:$0xff] }
 0x4c6   :  { %5229 = vmatpush.bf16.msrb.mxu0 %v8668_v13 }
 0x4c7   :  { %5883 = vrot.lane.b32.xlu0 %v9700_v11, %s9880_s7  ;;  %5269 = vmatpush.bf16.msrb.mxu2 %v7856_v6  ;;  %v9565_v6 = vld [vmem:[#allocation8 + $0x724] sm:$0xf] }
 0x4c9   :  { %5931 = vrot.lane.b32.xlu1 %v9709_v24, %s9880_s7 }
 0x4ca   :  { %5230 = vmatpush.bf16.msrb.mxu0 %v8644_v14 }
 0x4cb   :  { %5270 = vmatpush.bf16.msrb.mxu2 %v7832_v49 }
 0x4ce   :  { %5231 = vmatpush.bf16.msrb.mxu0 %v8620_v33  ;;  %v9553_v33 = vld [vmem:[#allocation8 + $0x6c4] sm:$0xf] }
 0x4cf   :  { %5899 = vrot.lane.b32.xlu0 %v9702_v3, %s9880_s7 }
 0x4d7   :  { %5935 = vrot.lane.b32.xlu0 %v9704_v60, %s9880_s7  ;;  %v8787_v60 = vld [vmem:[#allocation8 + $0x780] sm:$0xf] }
 0x4ee   :  { %v3318_v54 = vpop.f32.mrf.mxu0  ;;  %v3337_v32 = vpop.f32.mrf.mxu1 }
 0x4ef   :  { %v3319_v21 = vadd.f32 %v3318_v54, %v10550_v57  ;;  %v3338_v0 = vadd.f32 %v3337_v32, %v10552_v12  ;;  %v9532_v54 = vld [vmem:[#allocation8 + $0x614] sm:$0xf0] }
 0x4f0   :  { %v9706_v32 = vld [vmem:[%s11003_s4 + $0x88] sm:$0xff]  ;;  %v8596_v19 = vor.u32 %v9532_v54, %v8595_v62  ;;  %v9708_v62 = vld [vmem:[%s11003_s4 + $0x118] sm:$0xff] }
 0x4f1   :  { %v3387_v3 = vmax.f32 %v3319_v21, 0.0  ;;  %v3388_v2 = vmax.f32 %v3338_v0, 0.0  ;;  %5879 = vrot.lane.b32.xlu0 %v9706_v32, %s9880_s7  ;;  %v8744_v0 = vor.u32 %v9565_v6, %v8741_v45 }
 0x4f2   :  { %5232 = vmatpush.bf16.msrb.mxu0 %v8596_v19 }
 0x4f3   :  { %v3280_v37 = vpop.f32.mrf.mxu2  ;;  %v3299_v11 = vpop.f32.mrf.mxu3 }
 0x4f4   :  { %v3281_v4 = vadd.f32 %v3280_v37, %v10566_v53  ;;  %v3300_v38 = vadd.f32 %v3299_v11, %v10568_v43  ;;  %v9580_v37 = vld [vmem:[#allocation8 + $0x794] sm:$0xf0] }
 0x4f6   :  { %v3320_v29 = vpop.f32.mrf.mxu0  ;;  %v3339_v61 = vpop.f32.mrf.mxu1  ;;  %v3385_v11 = vmax.f32 %v3281_v4, 0.0  ;;  %v3386_v9 = vmax.f32 %v3300_v38, 0.0  ;;  %v9463_v4 = vld [vmem:[#allocation8 + $0x3f4] sm:$0xf]  ;;  %v8333_v38 = vld [vmem:[#allocation8 + $0x408] sm:$0xf0] }
 0x4f7   :  { %v3321_v36 = vadd.f32 %v3320_v29, %v10550_v57  ;;  %v3340_v46 = vadd.f32 %v3339_v61, %v10552_v12  ;;  %v8384_v29 = vor.u32 %v9475_v10, %v8381_v44  ;;  %v8788_v61 = vor.u32 %v9580_v37, %v8787_v60  ;;  %v9595_v10 = vld [vmem:[#allocation8 + $0x814] sm:$0xf]  ;;  %v9457_v60 = vld [vmem:[#allocation8 + $0x3c4] sm:$0xf]  ;;  %v8309_v37 = vld [vmem:[#allocation8 + $0x3d8] sm:$0xf0] }
 0x4f8   :  { %v8336_v44 = vor.u32 %v9463_v4, %v8333_v38 }
 0x4f9   :  { %v3393_v63 = vmax.f32 %v3321_v36, 0.0  ;;  %v3394_v7 = vmax.f32 %v3340_v46, 0.0  ;;  %v8573_v36 = vld [vmem:[#allocation8 + $0x5e8] sm:$0xf0]  ;;  %5251 = vmatpush.bf16.msrb.mxu1 %v8788_v61  ;;  %5915 = vrot.lane.b32.xlu0 %v9708_v62, %s9880_s7  ;;  %v9589_v61 = vld [vmem:[#allocation8 + $0x7e4] sm:$0xf] }
 0x4fa   :  { %v8576_v20 = vor.u32 %v9523_v58, %v8573_v36  ;;  %v8837_v58 = vld [vmem:[#allocation8 + $0x7f8] sm:$0xf0]  ;;  %v8312_v36 = vor.u32 %v9457_v60, %v8309_v37  ;;  %v8813_v62 = vld [vmem:[#allocation8 + $0x7c8] sm:$0xf0] }
 0x4fb   :  { %v10578_v31 = vpack.c.bf16 %v3393_v63, %v3387_v3  ;;  %v10580_v42 = vpack.c.bf16 %v3394_v7, %v3388_v2  ;;  %v3282_v51 = vpop.f32.mrf.mxu2  ;;  %v3301_v16 = vpop.f32.mrf.mxu3  ;;  %v8720_v3 = vor.u32 %v9559_v41, %v8717_v55  ;;  %v8912_v2 = vor.u32 %v9607_v15, %v8909_v39  ;;  %v8693_v63 = vld [vmem:[#allocation8 + $0x6d8] sm:$0xf0]  ;;  %v9601_v7 = vld [vmem:[#allocation8 + $0x844] sm:$0xf] }
 0x4fc   :  { %v3283_v13 = vadd.f32 %v3282_v51, %v10566_v53  ;;  %v3302_v22 = vadd.f32 %v3301_v16, %v10568_v43  ;;  %v8696_v6 = vor.u32 %v9553_v33, %v8693_v63  ;;  %v8864_v15 = vor.u32 %v9595_v10, %v8861_v23  ;;  %v9541_v39 = vld [vmem:[#allocation8 + $0x664] sm:$0xf]  ;;  %v8597_v23 = vld [vmem:[#allocation8 + $0x618] sm:$0xf0] }
 0x4fd   :  { %11024 = vst [vmem:[#allocation20_spill] sm:$0xff] %v10578_v31  ;;  %5195 = vmatmul.bf16.vlgmr.msra.gmra.mxu2 %v10578_v31  ;;  %5214 = vmatmul.bf16.vlgmr.msra.gmra.mxu3 %v10580_v42  ;;  %v9529_v10 = vld [vmem:[#allocation8 + $0x604] sm:$0xf]  ;;  %v8789_v60 = vld [vmem:[#allocation8 + $0x798] sm:$0xf0] }
 0x4fe   :  { %11025 = vst [vmem:[#allocation21_spill] sm:$0xff] %v10580_v42  ;;  %v3391_v49 = vmax.f32 %v3283_v13, 0.0  ;;  %v3392_v18 = vmax.f32 %v3302_v22, 0.0  ;;  %v3323_v40 = vpop.f32.mrf.mxu0  ;;  %v3342_v21 = vpop.f32.mrf.mxu1  ;;  %5339 = vmatpush.bf16.msra.mxu2 %v8768_v52  ;;  %5358 = vmatpush.bf16.msra.mxu3 %v8960_v27  ;;  %v9517_v52 = vld [vmem:[#allocation8 + $0x5a4] sm:$0xf]  ;;  %v8888_v22 = vor.u32 %v9601_v7, %v8885_v59  ;;  %v8840_v7 = vor.u32 %v9589_v61, %v8837_v58 }
 0x4ff   :  { %v3324_v46 = vadd.f32 %v3323_v40, %v10550_v57  ;;  %v3343_v8 = vadd.f32 %v3342_v21, %v10552_v12  ;;  %v8549_v27 = vld [vmem:[#allocation8 + $0x5b8] sm:$0xf0]  ;;  %v8672_v40 = vor.u32 %v9547_v56, %v8669_v26  ;;  %v9535_v59 = vld [vmem:[#allocation8 + $0x634] sm:$0xf]  ;;  %v9527_v61 = vld [vmem:[#allocation8 + $0x5ec] sm:$0xf0] }
 0x500   :  { %v10590_v34 = vpack.c.bf16 %v3391_v49, %v3385_v11  ;;  %v10592_v14 = vpack.c.bf16 %v3392_v18, %v3386_v9  ;;  %v8552_v45 = vor.u32 %v9517_v52, %v8549_v27  ;;  %v9511_v49 = vld [vmem:[#allocation8 + $0x574] sm:$0xf]  ;;  %v8525_v18 = vld [vmem:[#allocation8 + $0x588] sm:$0xf0]  ;;  %v9433_v58 = vld [vmem:[#allocation8 + $0x304] sm:$0xf] }
 0x501   :  { %v3399_v54 = vmax.f32 %v3324_v46, 0.0  ;;  %v3400_v32 = vmax.f32 %v3343_v8, 0.0  ;;  %v8528_v21 = vor.u32 %v9511_v49, %v8525_v18  ;;  %v9451_v46 = vld [vmem:[#allocation8 + $0x394] sm:$0xf]  ;;  %v8285_v8 = vld [vmem:[#allocation8 + $0x3a8] sm:$0xf0] }
 0x502   :  { %5157 = vmatmul.bf16.vlgmr.msra.gmra.mxu0 %v10590_v34  ;;  %5176 = vmatmul.bf16.vlgmr.msra.gmra.mxu1 %v10592_v14  ;;  %v8621_v52 = vld [vmem:[#allocation8 + $0x648] sm:$0xf0]  ;;  %v9583_v27 = vld [vmem:[#allocation8 + $0x7b4] sm:$0xf]  ;;  %v9493_v18 = vld [vmem:[#allocation8 + $0x4e4] sm:$0xf] }
 0x503   :  { %v3285_v5 = vpop.f32.mrf.mxu2  ;;  %v3304_v17 = vpop.f32.mrf.mxu3  ;;  %5340 = vmatpush.bf16.msra.mxu2 %v8744_v0  ;;  %5359 = vmatpush.bf16.msra.mxu3 %v8936_v48  ;;  %v8624_v56 = vor.u32 %v9535_v59, %v8621_v52  ;;  %v8816_v26 = vor.u32 %v9583_v27, %v8813_v62  ;;  %v8237_v49 = vld [vmem:[#allocation8 + $0x348] sm:$0xf0]  ;;  %v9521_v27 = vld [vmem:[#allocation8 + $0x5bc] sm:$0xf0]  ;;  %v8003_v62 = vld [vmem:[#allocation8 + $0x158] sm:$0xf] }
 0x504   :  { %5301 = vmatpush.bf16.msra.mxu0 %v8384_v29  ;;  %5320 = vmatpush.bf16.msra.mxu1 %v8576_v20  ;;  %v8645_v29 = vld [vmem:[#allocation8 + $0x678] sm:$0xf0]  ;;  %v9505_v20 = vld [vmem:[#allocation8 + $0x544] sm:$0xf] }
 0x505   :  { %v8648_v63 = vor.u32 %v9541_v39, %v8645_v29  ;;  %v9479_v39 = vld [vmem:[#allocation8 + $0x46c] sm:$0xf0]  ;;  %v8579_v29 = vld [vmem:[#allocation8 + $0x5d8] sm:$0xf] }
 0x506   :  { %v3325_v51 = vpop.f32.mrf.mxu0  ;;  %v3344_v16 = vpop.f32.mrf.mxu1 }
 0x507   :  { %v3326_v19 = vadd.f32 %v3325_v51, %v10550_v57  ;;  %v3345_v13 = vadd.f32 %v3344_v16, %v10552_v12  ;;  %5341 = vmatpush.bf16.msra.mxu2 %v8720_v3  ;;  %5360 = vmatpush.bf16.msra.mxu3 %v8912_v2  ;;  %v3286_v57 = vadd.f32 %v3285_v5, %v10566_v53  ;;  %v8501_v5 = vld [vmem:[#allocation8 + $0x558] sm:$0xf0]  ;;  %v9445_v51 = vld [vmem:[#allocation8 + $0x364] sm:$0xf] }
 0x508   :  { %5302 = vmatpush.bf16.msra.mxu0 %v8360_v47  ;;  %5321 = vmatpush.bf16.msra.mxu1 %v8552_v45  ;;  %v3305_v12 = vadd.f32 %v3304_v17, %v10568_v43  ;;  %v8288_v47 = vor.u32 %v9451_v46, %v8285_v8  ;;  %v8261_v16 = vld [vmem:[#allocation8 + $0x378] sm:$0xf0]  ;;  %v9487_v46 = vld [vmem:[#allocation8 + $0x4b4] sm:$0xf]  ;;  %v8429_v8 = vld [vmem:[#allocation8 + $0x4c8] sm:$0xf0] }
 0x509   :  { %v3405_v11 = vmax.f32 %v3326_v19, 0.0  ;;  %v3406_v9 = vmax.f32 %v3345_v13, 0.0  ;;  %v3397_v17 = vmax.f32 %v3286_v57, 0.0  ;;  %v8477_v19 = vld [vmem:[#allocation8 + $0x528] sm:$0xf0]  ;;  %v8264_v37 = vor.u32 %v9445_v51, %v8261_v16 }
 0x50a   :  { %v3398_v3 = vmax.f32 %v3305_v12, 0.0  ;;  %v8453_v57 = vld [vmem:[#allocation8 + $0x4f8] sm:$0xf0]  ;;  %v9481_v51 = vld [vmem:[#allocation8 + $0x484] sm:$0xf] }
 0x50b   :  { %v10610_v0 = vpack.c.bf16 %v3405_v11, %v3399_v54  ;;  %v10612_v48 = vpack.c.bf16 %v3406_v9, %v3400_v32  ;;  %v3287_v41 = vpop.f32.mrf.mxu2  ;;  %v3306_v55 = vpop.f32.mrf.mxu3  ;;  %5342 = vmatpush.bf16.msra.mxu2 %v8696_v6  ;;  %5361 = vmatpush.bf16.msra.mxu3 %v8888_v22  ;;  %v8504_v54 = vor.u32 %v9505_v20, %v8501_v5  ;;  %v9711_v32 = vld [vmem:[%s11003_s4 + $0x150] sm:$0xff]  ;;  %v9499_v6 = vld [vmem:[#allocation8 + $0x514] sm:$0xf]  ;;  %v8405_v16 = vld [vmem:[#allocation8 + $0x498] sm:$0xf0] }
 0x50c   :  { %v3288_v1 = vadd.f32 %v3287_v41, %v10566_v53  ;;  %v3307_v30 = vadd.f32 %v3306_v55, %v10568_v43  ;;  %5303 = vmatpush.bf16.msra.mxu0 %v8336_v44  ;;  %5322 = vmatpush.bf16.msra.mxu1 %v8528_v21  ;;  %v9710_v53 = vld [vmem:[%s11003_s4 + $0xc0] sm:$0xff]  ;;  %v210_v43 = vld [vmem:[#allocation10 + $0x8] sm:$0xf]  ;;  %v9577_v44 = vld [vmem:[#allocation8 + $0x784] sm:$0xf]  ;;  %v8480_v11 = vor.u32 %v9499_v6, %v8477_v19 }
 0x50d   :  { %11026 = vst [vmem:[#allocation22_spill] sm:$0xff] %v10610_v0  ;;  %5200 = vmatmul.bf16.gmra.mxu2 %v10610_v0  ;;  %5219 = vmatmul.bf16.gmra.mxu3 %v10612_v48  ;;  %v3251_v45 = vperm.slane %v210_v43, 0  ;;  %v3252_v24 = vperm.slane %v210_v43, 2  ;;  %v9439_v9 = vld [vmem:[#allocation8 + $0x334] sm:$0xf]  ;;  %v9712_v41 = vld [vmem:[%s11003_s4 + $0x108] sm:$0xff]  ;;  %v8600_v55 = vor.u32 %v9529_v10, %v8597_v23 }
 0x50e   :  { %11027 = vst [vmem:[#allocation23_spill] sm:$0xff] %v10612_v48  ;;  %v3403_v2 = vmax.f32 %v3288_v1, 0.0  ;;  %v3404_v33 = vmax.f32 %v3307_v30, 0.0  ;;  %5893 = vrot.lane.b32.xlu0 %v9710_v53, %s9880_s7  ;;  %5929 = vrot.lane.b32.xlu1 %v9711_v32, %s9880_s7  ;;  %v8387_v21 = vld [vmem:[#allocation8 + $0x458] sm:$0xf]  ;;  %v8240_v1 = vor.u32 %v9439_v9, %v8237_v49  ;;  %v8456_v30 = vor.u32 %v9493_v18, %v8453_v57  ;;  %v9713_v20 = vld [vmem:[%s11003_s4 + $0x100] sm:$0xff] }
 0x50f   :  { %5343 = vmatpush.bf16.msra.mxu2 %v8672_v40  ;;  %5362 = vmatpush.bf16.msra.mxu3 %v8864_v15  ;;  %v10632_v12 = vperm.slane %v3251_v45, 0  ;;  %v10634_v40 = vperm.slane %v3252_v24, 0  ;;  %v8792_v15 = vor.u32 %v9577_v44, %v8789_v60  ;;  %v8363_v43 = vld [vmem:[#allocation8 + $0x428] sm:$0xf]  ;;  %v8432_v32 = vor.u32 %v9487_v46, %v8429_v8  ;;  %v9714_v23 = vld [vmem:[%s11003_s4 + $0x140] sm:$0xff]  ;;  %s9881_s4 = smov [#allocation11]  }
 0x510   :  { %v10622_v4 = vpack.c.bf16 %v3403_v2, %v3397_v17  ;;  %v10624_v38 = vpack.c.bf16 %v3404_v33, %v3398_v3  ;;  %5304 = vmatpush.bf16.msra.mxu0 %v8312_v36  ;;  %5323 = vmatpush.bf16.msra.mxu1 %v8504_v54  ;;  %v8213_v36 = vld [vmem:[#allocation8 + $0x318] sm:$0xf0]  ;;  %v8388_v3 = vor.u32 %v9479_v39, %v8387_v21  ;;  %v9383_v54 = vld [vmem:[#allocation8 + $0x16c] sm:$0xf0]  ;;  %v7979_v9 = vld [vmem:[#allocation8 + $0x128] sm:$0xf] }
 0x511   :  { %v8580_v2 = vor.u32 %v9527_v61, %v8579_v29  ;;  %v8216_v59 = vor.u32 %v9433_v58, %v8213_v36  ;;  %v8004_v10 = vor.u32 %v9383_v54, %v8003_v62  ;;  %v8408_v49 = vor.u32 %v9481_v51, %v8405_v16  ;;  %v9377_v18 = vld [vmem:[#allocation8 + $0x13c] sm:$0xf0]  ;;  %v8195_v57 = vld [vmem:[#allocation8 + $0x2d8] sm:$0xf]  ;;  %v9431_v21 = vld [vmem:[#allocation8 + $0x2ec] sm:$0xf0] }
 0x512   :  { %5162 = vmatmul.bf16.gmra.mxu0 %v10622_v4  ;;  %5181 = vmatmul.bf16.gmra.mxu1 %v10624_v38  ;;  %v8315_v61 = vld [vmem:[#allocation8 + $0x3c8] sm:$0xf]  ;;  %v9509_v58 = vld [vmem:[#allocation8 + $0x55c] sm:$0xf0]  ;;  %v7980_v36 = vor.u32 %v9377_v18, %v7979_v9 }
 0x513   :  { %v3356_v13 = vpop.f32.mrf.mxu2  ;;  %v3375_v22 = vpop.f32.mrf.mxu3  ;;  %5344 = vmatpush.bf16.msra.mxu2 %v8648_v63  ;;  %5363 = vmatpush.bf16.msra.mxu3 %v8840_v7  ;;  %v9473_v63 = vld [vmem:[#allocation8 + $0x43c] sm:$0xf0]  ;;  %v8555_v7 = vld [vmem:[#allocation8 + $0x5a8] sm:$0xf] }
 0x514   :  { %5305 = vmatpush.bf16.msra.mxu0 %v8288_v47  ;;  %5324 = vmatpush.bf16.msra.mxu1 %v8480_v11  ;;  %v3357_v5 = vadd.f32 %v3356_v13, %v10632_v12  ;;  %v3376_v17 = vadd.f32 %v3375_v22, %v10634_v40  ;;  %v8364_v13 = vor.u32 %v9473_v63, %v8363_v43  ;;  %v9515_v11 = vld [vmem:[#allocation8 + $0x58c] sm:$0xf0]  ;;  %v8171_v46 = vld [vmem:[#allocation8 + $0x2a8] sm:$0xf]  ;;  %v9425_v8 = vld [vmem:[#allocation8 + $0x2bc] sm:$0xf0] }
 0x515   :  { %v8556_v22 = vor.u32 %v9521_v27, %v8555_v7  ;;  %v9419_v43 = vld [vmem:[#allocation8 + $0x28c] sm:$0xf0]  ;;  %v8483_v7 = vld [vmem:[#allocation8 + $0x518] sm:$0xf]  ;;  %v9365_v27 = vld [vmem:[#allocation8 + $0xdc] sm:$0xf0] }
 0x516   :  { %5911 = vrot.lane.b32.xlu0 %v9712_v41, %s9880_s7  ;;  %5909 = vrot.lane.b32.xlu1 %v9713_v20, %s9880_s7  ;;  %v3389_v6 = vmax.f32 %v3357_v5, 0.0  ;;  %v3390_v45 = vmax.f32 %v3376_v17, 0.0  ;;  %v8196_v41 = vor.u32 %v9431_v21, %v8195_v57  ;;  %v7955_v20 = vld [vmem:[#allocation8 + $0xf8] sm:$0xf]  ;;  %v9371_v5 = vld [vmem:[#allocation8 + $0x10c] sm:$0xf0]  ;;  %v8172_v17 = vor.u32 %v9425_v8, %v8171_v46 }
 0x517   :  { %5345 = vmatpush.bf16.msra.mxu2 %v8624_v56  ;;  %5364 = vmatpush.bf16.msra.mxu3 %v8816_v26  ;;  %v8339_v56 = vld [vmem:[#allocation8 + $0x3f8] sm:$0xf]  ;;  %v9467_v26 = vld [vmem:[#allocation8 + $0x40c] sm:$0xf0]  ;;  %v8123_v57 = vld [vmem:[#allocation8 + $0x248] sm:$0xf] }
 0x518   :  { %5306 = vmatpush.bf16.msra.mxu0 %v8264_v37  ;;  %5325 = vmatpush.bf16.msra.mxu1 %v8456_v30  ;;  %v8531_v37 = vld [vmem:[#allocation8 + $0x578] sm:$0xf]  ;;  %v8340_v39 = vor.u32 %v9467_v26, %v8339_v56  ;;  %v8507_v30 = vld [vmem:[#allocation8 + $0x548] sm:$0xf]  ;;  %v9455_v63 = vld [vmem:[#allocation8 + $0x3ac] sm:$0xf0] }
 0x519   :  { %v8532_v29 = vor.u32 %v9515_v11, %v8531_v37  ;;  %v8459_v56 = vld [vmem:[#allocation8 + $0x4e8] sm:$0xf]  ;;  %v9497_v26 = vld [vmem:[#allocation8 + $0x4fc] sm:$0xf0]  ;;  %v9359_v37 = vld [vmem:[#allocation8 + $0xac] sm:$0xf0] }
 0x51a   :  { %v8243_v21 = vld [vmem:[#allocation8 + $0x338] sm:$0xf]  ;;  %v9407_v8 = vld [vmem:[#allocation8 + $0x22c] sm:$0xf0] }
 0x51b   :  { %v3358_v33 = vpop.f32.mrf.mxu2  ;;  %v3377_v53 = vpop.f32.mrf.mxu3  ;;  %5346 = vmatpush.bf16.msra.mxu2 %v8600_v55  ;;  %5365 = vmatpush.bf16.msra.mxu3 %v8792_v15  ;;  %v8099_v46 = vld [vmem:[#allocation8 + $0x218] sm:$0xf] }
 0x51c   :  { %v3359_v47 = vadd.f32 %v3358_v33, %v10632_v12  ;;  %v3378_v52 = vadd.f32 %v3377_v53, %v10634_v40  ;;  %5307 = vmatpush.bf16.msra.mxu0 %v8240_v1  ;;  %5326 = vmatpush.bf16.msra.mxu1 %v8432_v32  ;;  %v9461_v1 = vld [vmem:[#allocation8 + $0x3dc] sm:$0xf0]  ;;  %v8291_v33 = vld [vmem:[#allocation8 + $0x398] sm:$0xf] }
 0x51d   :  { %5271 = vmatmul.bf16.vlgmr.msrb.gmra.mxu2 %v10590_v34  ;;  %5290 = vmatmul.bf16.vlgmr.msrb.gmra.mxu3 %v10592_v14  ;;  %v8147_v53 = vld [vmem:[#allocation8 + $0x278] sm:$0xf] }
 0x51e   :  { %v3395_v24 = vmax.f32 %v3359_v47, 0.0  ;;  %v3396_v19 = vmax.f32 %v3378_v52, 0.0  ;;  %5925 = vrot.lane.b32.xlu0 %v9714_v23, %s9880_s7  ;;  %v7956_v47 = vor.u32 %v9371_v5, %v7955_v20  ;;  %v7931_v52 = vld [vmem:[#allocation8 + $0xc8] sm:$0xf]  ;;  %v8148_v32 = vor.u32 %v9419_v43, %v8147_v53  ;;  %v7907_v23 = vld [vmem:[#allocation8 + $0x98] sm:$0xf] }
 0x51f   :  { %5415 = vmatpush.bf16.msrb.mxu2 %v8388_v3  ;;  %5434 = vmatpush.bf16.msrb.mxu3 %v8580_v2  ;;  %v8316_v3 = vor.u32 %v9461_v1, %v8315_v61  ;;  %v8508_v2 = vor.u32 %v9509_v58, %v8507_v30  ;;  %v9491_v61 = vld [vmem:[#allocation8 + $0x4cc] sm:$0xf0]  ;;  %v7908_v1 = vor.u32 %v9359_v37, %v7907_v23  ;;  %v7883_v58 = vld [vmem:[#allocation8 + $0x68] sm:$0xf]  ;;  %v7859_v43 = vld [vmem:[#allocation8 + $0x38] sm:$0xf] }
 0x520   :  { %v10654_v44 = vpack.c.bf16 %v3395_v24, %v3389_v6  ;;  %v10656_v60 = vpack.c.bf16 %v3396_v19, %v3390_v45  ;;  %5308 = vmatpush.bf16.msra.mxu0 %v8216_v59  ;;  %5327 = vmatpush.bf16.msra.mxu1 %v8408_v49  ;;  %v9503_v59 = vld [vmem:[#allocation8 + $0x52c] sm:$0xf0]  ;;  %v8292_v6 = vor.u32 %v9455_v63, %v8291_v33  ;;  %v8267_v24 = vld [vmem:[#allocation8 + $0x368] sm:$0xf]  ;;  %v9485_v33 = vld [vmem:[#allocation8 + $0x49c] sm:$0xf0] }
 0x521   :  { %v8484_v45 = vor.u32 %v9503_v59, %v8483_v7  ;;  %v8100_v63 = vor.u32 %v9407_v8, %v8099_v46  ;;  %v9347_v7 = vld [vmem:[#allocation8 + $0x4c] sm:$0xf0]  ;;  %v8075_v59 = vld [vmem:[#allocation8 + $0x1e8] sm:$0xf]  ;;  %v9422_v23 = vld [vmem:[#allocation8 + $0x2ac] sm:$0xf] }
 0x522   :  { %5233 = vmatmul.bf16.vlgmr.msrb.gmra.mxu0 %v10654_v44  ;;  %5252 = vmatmul.bf16.vlgmr.msrb.gmra.mxu1 %v10656_v60  ;;  %v8173_v37 = vld [vmem:[#allocation8 + $0x2c0] sm:$0xf0]  ;;  %v8963_v46 = vld [vmem:[#allocation8 + $0x8d8] sm:$0xf]  ;;  %v9623_v8 = vld [vmem:[#allocation8 + $0x8ec] sm:$0xf0] }
 0x523   :  { %v3361_v55 = vpop.f32.mrf.mxu2  ;;  %v3380_v15 = vpop.f32.mrf.mxu3  ;;  %5416 = vmatpush.bf16.msrb.mxu2 %v8364_v13  ;;  %5435 = vmatpush.bf16.msrb.mxu3 %v8556_v22  ;;  %v9449_v22 = vld [vmem:[#allocation8 + $0x37c] sm:$0xf0] }
 0x524   :  { %5377 = vmatpush.bf16.msrb.mxu0 %v8004_v10  ;;  %5396 = vmatpush.bf16.msrb.mxu1 %v8196_v41  ;;  %v3362_v62 = vadd.f32 %v3361_v55, %v10632_v12  ;;  %v3381_v54 = vadd.f32 %v3380_v15, %v10634_v40  ;;  %v7932_v10 = vor.u32 %v9365_v27, %v7931_v52  ;;  %v9413_v41 = vld [vmem:[#allocation8 + $0x25c] sm:$0xf0]  ;;  %v9380_v52 = vld [vmem:[#allocation8 + $0x15c] sm:$0xf] }
 0x525   :  { %v8124_v30 = vor.u32 %v9413_v41, %v8123_v57  ;;  %v8027_v57 = vld [vmem:[#allocation8 + $0x188] sm:$0xf]  ;;  %v9368_v41 = vld [vmem:[#allocation8 + $0xfc] sm:$0xf] }
 0x526   :  { %v3401_v11 = vmax.f32 %v3362_v62, 0.0  ;;  %v3402_v9 = vmax.f32 %v3381_v54, 0.0  ;;  %v8005_v54 = vld [vmem:[#allocation8 + $0x170] sm:$0xf0] }
 0x527   :  { %5417 = vmatpush.bf16.msrb.mxu2 %v8340_v39  ;;  %5436 = vmatpush.bf16.msrb.mxu3 %v8532_v29  ;;  %v9443_v39 = vld [vmem:[#allocation8 + $0x34c] sm:$0xf0]  ;;  %v8435_v29 = vld [vmem:[#allocation8 + $0x4b8] sm:$0xf] }
 0x528   :  { %5378 = vmatpush.bf16.msrb.mxu0 %v7980_v36  ;;  %5397 = vmatpush.bf16.msrb.mxu1 %v8172_v17  ;;  %v9353_v36 = vld [vmem:[#allocation8 + $0x7c] sm:$0xf0]  ;;  %v8244_v20 = vor.u32 %v9443_v39, %v8243_v21  ;;  %v8436_v5 = vor.u32 %v9491_v61, %v8435_v29  ;;  %v8219_v17 = vld [vmem:[#allocation8 + $0x308] sm:$0xf]  ;;  %v8176_v21 = vor.u32 %v9422_v23, %v8173_v37  ;;  %v7957_v39 = vld [vmem:[#allocation8 + $0x110] sm:$0xf0] }
 0x529   :  { %v7884_v53 = vor.u32 %v9353_v36, %v7883_v58  ;;  %v9416_v29 = vld [vmem:[#allocation8 + $0x27c] sm:$0xf]  ;;  %v8149_v61 = vld [vmem:[#allocation8 + $0x290] sm:$0xf0]  ;;  %v8747_v58 = vld [vmem:[#allocation8 + $0x728] sm:$0xf] }
 0x52a   :  { %v9569_v36 = vld [vmem:[#allocation8 + $0x73c] sm:$0xf0]  ;;  %v9350_v23 = vld [vmem:[#allocation8 + $0x6c] sm:$0xf]  ;;  %v7885_v37 = vld [vmem:[#allocation8 + $0x80] sm:$0xf0] }
 0x52b   :  { %v3363_v51 = vpop.f32.mrf.mxu2  ;;  %v3382_v16 = vpop.f32.mrf.mxu3  ;;  %5418 = vmatpush.bf16.msrb.mxu2 %v8316_v3  ;;  %5437 = vmatpush.bf16.msrb.mxu3 %v8508_v2  ;;  %v9437_v3 = vld [vmem:[#allocation8 + $0x31c] sm:$0xf0]  ;;  %v8411_v2 = vld [vmem:[#allocation8 + $0x488] sm:$0xf] }
 0x52c   :  { %v3364_v19 = vadd.f32 %v3363_v51, %v10632_v12  ;;  %v3383_v13 = vadd.f32 %v3382_v16, %v10634_v40  ;;  %5379 = vmatpush.bf16.msrb.mxu0 %v7956_v47  ;;  %5398 = vmatpush.bf16.msrb.mxu1 %v8148_v32  ;;  %v8268_v12 = vor.u32 %v9449_v22, %v8267_v24  ;;  %v9401_v47 = vld [vmem:[#allocation8 + $0x1fc] sm:$0xf0]  ;;  %v9428_v32 = vld [vmem:[#allocation8 + $0x2dc] sm:$0xf]  ;;  %v8197_v51 = vld [vmem:[#allocation8 + $0x2f0] sm:$0xf0] }
 0x52d   :  { %5276 = vmatmul.bf16.gmra.mxu2 %v10622_v4  ;;  %5295 = vmatmul.bf16.gmra.mxu3 %v10624_v38  ;;  %v8460_v40 = vor.u32 %v9497_v26, %v8459_v56  ;;  %v8220_v27 = vor.u32 %v9437_v3, %v8219_v17  ;;  %v8412_v62 = vor.u32 %v9485_v33, %v8411_v2  ;;  %v9341_v24 = vld [vmem:[#allocation8 + $0x1c] sm:$0xf0]  ;;  %v9374_v26 = vld [vmem:[#allocation8 + $0x12c] sm:$0xf]  ;;  %v7933_v3 = vld [vmem:[#allocation8 + $0xe0] sm:$0xf0] }
 0x52e   :  { %v3407_v49 = vmax.f32 %v3364_v19, 0.0  ;;  %v3408_v18 = vmax.f32 %v3383_v13, 0.0  ;;  %v7860_v16 = vor.u32 %v9347_v7, %v7859_v43  ;;  %v8051_v19 = vld [vmem:[#allocation8 + $0x1b8] sm:$0xf]  ;;  %v9395_v13 = vld [vmem:[#allocation8 + $0x1cc] sm:$0xf0]  ;;  %v8008_v22 = vor.u32 %v9380_v52, %v8005_v54  ;;  %v10676_v52 = vpop.permute.xlu0 %5859 }
 0x52f   :  { %5419 = vmatpush.bf16.msrb.mxu2 %v8292_v6  ;;  %5438 = vmatpush.bf16.msrb.mxu3 %v8484_v45  ;;  %v7835_v6 = vld [vmem:[#allocation8 + $0x8] sm:$0xf]  ;;  %v8076_v45 = vor.u32 %v9401_v47, %v8075_v59  ;;  %v8200_v56 = vor.u32 %v9428_v32, %v8197_v51  ;;  %v9362_v17 = vld [vmem:[#allocation8 + $0xcc] sm:$0xf]  ;;  %v8964_v2 = vor.u32 %v9623_v8, %v8963_v46  ;;  %v8723_v7 = vld [vmem:[#allocation8 + $0x6f8] sm:$0xf] }
 0x530   :  { %v10666_v55 = vpack.c.bf16 %v3407_v49, %v3401_v11  ;;  %v10668_v15 = vpack.c.bf16 %v3408_v18, %v3402_v9  ;;  %5380 = vmatpush.bf16.msrb.mxu0 %v7932_v10  ;;  %5399 = vmatpush.bf16.msrb.mxu1 %v8124_v30  ;;  %v7981_v10 = vld [vmem:[#allocation8 + $0x140] sm:$0xf0]  ;;  %v7836_v11 = vor.u32 %v9341_v24, %v7835_v6  ;;  %v8771_v9 = vld [vmem:[#allocation8 + $0x758] sm:$0xf]  ;;  %v9575_v18 = vld [vmem:[#allocation8 + $0x76c] sm:$0xf0] }
 0x531   :  { %v8052_v49 = vor.u32 %v9395_v13, %v8051_v19  ;;  %v9410_v33 = vld [vmem:[#allocation8 + $0x24c] sm:$0xf]  ;;  %v8748_v43 = vor.u32 %v9569_v36, %v8747_v58  ;;  %v9563_v59 = vld [vmem:[#allocation8 + $0x70c] sm:$0xf0]  ;;  %v9617_v47 = vld [vmem:[#allocation8 + $0x8bc] sm:$0xf0] }
 0x532   :  { %5238 = vmatmul.bf16.gmra.mxu0 %v10666_v55  ;;  %5257 = vmatmul.bf16.gmra.mxu1 %v10668_v15  ;;  %v9356_v32 = vld [vmem:[#allocation8 + $0x9c] sm:$0xf]  ;;  %v8915_v51 = vld [vmem:[#allocation8 + $0x878] sm:$0xf]  ;;  %v7909_v6 = vld [vmem:[#allocation8 + $0xb0] sm:$0xf0]  ;;  %v8724_v19 = vor.u32 %v9563_v59, %v8723_v7 }
 0x533   :  { %5420 = vmatpush.bf16.msrb.mxu2 %v8268_v12  ;;  %5439 = vmatpush.bf16.msrb.mxu3 %v8460_v40  ;;  %v9389_v12 = vld [vmem:[#allocation8 + $0x19c] sm:$0xf0]  ;;  %v7984_v40 = vor.u32 %v9374_v26, %v7981_v10  ;;  %v8101_v24 = vld [vmem:[#allocation8 + $0x230] sm:$0xf0]  ;;  %v8699_v13 = vld [vmem:[#allocation8 + $0x6c8] sm:$0xf]  ;;  %v7912_v26 = vor.u32 %v9356_v32, %v7909_v6 }
 0x534   :  { %5381 = vmatpush.bf16.msrb.mxu0 %v7908_v1  ;;  %5400 = vmatpush.bf16.msrb.mxu1 %v8100_v63  ;;  %v8772_v1 = vor.u32 %v9575_v18, %v8771_v9  ;;  %v8028_v30 = vor.u32 %v9389_v12, %v8027_v57  ;;  %v8939_v63 = vld [vmem:[#allocation8 + $0x8a8] sm:$0xf]  ;;  %v8077_v9 = vld [vmem:[#allocation8 + $0x200] sm:$0xf0]  ;;  %v8675_v18 = vld [vmem:[#allocation8 + $0x698] sm:$0xf] }
 0x535   :  { %v9551_v57 = vld [vmem:[#allocation8 + $0x6ac] sm:$0xf0]  ;;  %v8891_v12 = vld [vmem:[#allocation8 + $0x848] sm:$0xf]  ;;  %v9545_v8 = vld [vmem:[#allocation8 + $0x67c] sm:$0xf0] }
 0x536   :  { %v8676_v58 = vor.u32 %v9551_v57, %v8675_v18  ;;  %v8651_v46 = vld [vmem:[#allocation8 + $0x668] sm:$0xf]  ;;  %v8627_v59 = vld [vmem:[#allocation8 + $0x638] sm:$0xf]  ;;  %v9572_v32 = vld [vmem:[#allocation8 + $0x75c] sm:$0xf] }
 0x537   :  { %5421 = vmatpush.bf16.msrb.mxu2 %v8244_v20  ;;  %5440 = vmatpush.bf16.msrb.mxu3 %v8436_v5  ;;  %v7960_v20 = vor.u32 %v9368_v41, %v7957_v39  ;;  %v8152_v5 = vor.u32 %v9416_v29, %v8149_v61  ;;  %v9344_v39 = vld [vmem:[#allocation8 + $0x3c] sm:$0xf]  ;;  %v10680_v29 = vpop.permute.xlu0 %5857  ;;  %v7861_v61 = vld [vmem:[#allocation8 + $0x50] sm:$0xf0]  ;;  %v8652_v7 = vor.u32 %v9545_v8, %v8651_v46  ;;  %v9614_v18 = vld [vmem:[#allocation8 + $0x8ac] sm:$0xf] }
 0x538   :  { %5382 = vmatpush.bf16.msrb.mxu0 %v7884_v53  ;;  %5401 = vmatpush.bf16.msrb.mxu1 %v8076_v45  ;;  %v8125_v53 = vld [vmem:[#allocation8 + $0x260] sm:$0xf0]  ;;  %v9404_v45 = vld [vmem:[#allocation8 + $0x21c] sm:$0xf]  ;;  %v8773_v6 = vld [vmem:[#allocation8 + $0x770] sm:$0xf0] }
 0x539   :  { %v8128_v54 = vor.u32 %v9410_v33, %v8125_v53  ;;  %v8104_v10 = vor.u32 %v9404_v45, %v8101_v24  ;;  %v7837_v33 = vld [vmem:[#allocation8 + $0x20] sm:$0xf0]  ;;  %v10684_v53 = vpop.permute.xlu1 %5875  ;;  %v9620_v45 = vld [vmem:[#allocation8 + $0x8dc] sm:$0xf]  ;;  %v8965_v24 = vld [vmem:[#allocation8 + $0x8f0] sm:$0xf0] }
 0x53a   :  { %v8941_v57 = vld [vmem:[#allocation8 + $0x8c0] sm:$0xf0]  ;;  %v8725_v46 = vld [vmem:[#allocation8 + $0x710] sm:$0xf0]  ;;  %v9524_v8 = vld [vmem:[#allocation8 + $0x5dc] sm:$0xf] }
 0x53b   :  { %5422 = vmatpush.bf16.msrb.mxu2 %v8220_v27  ;;  %5441 = vmatpush.bf16.msrb.mxu3 %v8412_v62  ;;  %v8940_v27 = vor.u32 %v9617_v47, %v8939_v63  ;;  %v7936_v62 = vor.u32 %v9362_v17, %v7933_v3  ;;  %v7864_v17 = vor.u32 %v9344_v39, %v7861_v61  ;;  %v8029_v63 = vld [vmem:[#allocation8 + $0x1a0] sm:$0xf0]  ;;  %v8795_v61 = vld [vmem:[#allocation8 + $0x788] sm:$0xf] }
 0x53c   :  { %5383 = vmatpush.bf16.msrb.mxu0 %v7860_v16  ;;  %5402 = vmatpush.bf16.msrb.mxu1 %v8052_v49  ;;  %v9611_v16 = vld [vmem:[#allocation8 + $0x88c] sm:$0xf0] }
 0x53d   :  { %5347 = vmatmul.bf16.vlgmr.msra.gmra.mxu2 %v10654_v44  ;;  %5366 = vmatmul.bf16.vlgmr.msra.gmra.mxu3 %v10656_v60 }
 0x53f   :  { %5491 = vmatpush.bf16.msra.mxu2 %v8008_v22  ;;  %5510 = vmatpush.bf16.msra.mxu3 %v8200_v56  ;;  %v9557_v22 = vld [vmem:[#allocation8 + $0x6dc] sm:$0xf0]  ;;  %v8916_v56 = vor.u32 %v9611_v16, %v8915_v51 }
 0x540   :  { %5384 = vmatpush.bf16.msrb.mxu0 %v7836_v11  ;;  %5403 = vmatpush.bf16.msrb.mxu1 %v8028_v30  ;;  %v9398_v11 = vld [vmem:[#allocation8 + $0x1ec] sm:$0xf]  ;;  %v8700_v49 = vor.u32 %v9557_v22, %v8699_v13  ;;  %v8053_v30 = vld [vmem:[#allocation8 + $0x1d0] sm:$0xf0]  ;;  %v8603_v13 = vld [vmem:[#allocation8 + $0x608] sm:$0xf] }
 0x541   :  { %v8080_v41 = vor.u32 %v9398_v11, %v8077_v9  ;;  %v8968_v11 = vor.u32 %v9620_v45, %v8965_v24  ;;  %v9566_v9 = vld [vmem:[#allocation8 + $0x72c] sm:$0xf]  ;;  %v10690_v39 = vpop.permute.xlu1 %5873  ;;  %v9464_v45 = vld [vmem:[#allocation8 + $0x3fc] sm:$0xf]  ;;  %v8341_v24 = vld [vmem:[#allocation8 + $0x410] sm:$0xf0] }
 0x542   :  { %5309 = vmatmul.bf16.vlgmr.msra.gmra.mxu0 %v10578_v31  ;;  %5328 = vmatmul.bf16.vlgmr.msra.gmra.mxu1 %v10580_v42 }
 0x543   :  { %5492 = vmatpush.bf16.msra.mxu2 %v7984_v40  ;;  %5511 = vmatpush.bf16.msra.mxu3 %v8176_v21  ;;  %v9605_v40 = vld [vmem:[#allocation8 + $0x85c] sm:$0xf0]  ;;  %v7888_v21 = vor.u32 %v9350_v23, %v7885_v37  ;;  %v9587_v23 = vld [vmem:[#allocation8 + $0x7cc] sm:$0xf0]  ;;  %v8776_v37 = vor.u32 %v9572_v32, %v8773_v6  ;;  %v8701_v32 = vld [vmem:[#allocation8 + $0x6e0] sm:$0xf0] }
 0x544   :  { %5453 = vmatpush.bf16.msra.mxu0 %v8772_v1  ;;  %5472 = vmatpush.bf16.msra.mxu1 %v8964_v2  ;;  %v9392_v1 = vld [vmem:[#allocation8 + $0x1bc] sm:$0xf]  ;;  %v8892_v36 = vor.u32 %v9605_v40, %v8891_v12  ;;  %v9338_v2 = vld [vmem:[#allocation8 + $0xc] sm:$0xf] }
 0x545   :  { %v8056_v3 = vor.u32 %v9392_v1, %v8053_v30  ;;  %v7840_v51 = vor.u32 %v9338_v2, %v7837_v33  ;;  %v9476_v40 = vld [vmem:[#allocation8 + $0x45c] sm:$0xf]  ;;  %v9581_v1 = vld [vmem:[#allocation8 + $0x79c] sm:$0xf0]  ;;  %v8581_v2 = vld [vmem:[#allocation8 + $0x5f0] sm:$0xf0] }
 0x546   :  { %v9470_v33 = vld [vmem:[#allocation8 + $0x42c] sm:$0xf] }
 0x547   :  { %5493 = vmatpush.bf16.msra.mxu2 %v7960_v20  ;;  %5512 = vmatpush.bf16.msra.mxu3 %v8152_v5  ;;  %v8867_v20 = vld [vmem:[#allocation8 + $0x818] sm:$0xf]  ;;  %v9599_v5 = vld [vmem:[#allocation8 + $0x82c] sm:$0xf0] }
 0x548   :  { %5454 = vmatpush.bf16.msra.mxu0 %v8748_v43  ;;  %5473 = vmatpush.bf16.msra.mxu1 %v8940_v27  ;;  %v9386_v43 = vld [vmem:[#allocation8 + $0x18c] sm:$0xf]  ;;  %v8868_v47 = vor.u32 %v9599_v5, %v8867_v20  ;;  %v9539_v27 = vld [vmem:[#allocation8 + $0x64c] sm:$0xf0]  ;;  %v9608_v20 = vld [vmem:[#allocation8 + $0x87c] sm:$0xf] }
 0x549   :  { %v8032_v16 = vor.u32 %v9386_v43, %v8029_v63  ;;  %v8917_v5 = vld [vmem:[#allocation8 + $0x890] sm:$0xf0]  ;;  %v8365_v43 = vld [vmem:[#allocation8 + $0x440] sm:$0xf0]  ;;  %v8584_v63 = vor.u32 %v9524_v8, %v8581_v2  ;;  %v9452_v8 = vld [vmem:[#allocation8 + $0x39c] sm:$0xf] }
 0x54a   :  { %v8368_v6 = vor.u32 %v9470_v33, %v8365_v43  ;;  %v9536_v43 = vld [vmem:[#allocation8 + $0x63c] sm:$0xf] }
 0x54b   :  { %5494 = vmatpush.bf16.msra.mxu2 %v7936_v62  ;;  %5513 = vmatpush.bf16.msra.mxu3 %v8128_v54  ;;  %v8843_v62 = vld [vmem:[#allocation8 + $0x7e8] sm:$0xf]  ;;  %v9593_v54 = vld [vmem:[#allocation8 + $0x7fc] sm:$0xf0] }
 0x54c   :  { %5455 = vmatpush.bf16.msra.mxu0 %v8724_v19  ;;  %5474 = vmatpush.bf16.msra.mxu1 %v8916_v56  ;;  %v8628_v19 = vor.u32 %v9539_v27, %v8627_v59  ;;  %v8844_v22 = vor.u32 %v9593_v54, %v8843_v62  ;;  %v9533_v56 = vld [vmem:[#allocation8 + $0x61c] sm:$0xf0]  ;;  %v8920_v59 = vor.u32 %v9608_v20, %v8917_v5  ;;  %v9518_v62 = vld [vmem:[#allocation8 + $0x5ac] sm:$0xf]  ;;  %v8557_v54 = vld [vmem:[#allocation8 + $0x5c0] sm:$0xf0] }
 0x54d   :  { %5352 = vmatmul.bf16.gmra.mxu2 %v10666_v55  ;;  %5371 = vmatmul.bf16.gmra.mxu3 %v10668_v15  ;;  %v8604_v12 = vor.u32 %v9533_v56, %v8603_v13  ;;  %v10696_v13 = vpop.permute.xlu1 %5871  ;;  %v8293_v20 = vld [vmem:[#allocation8 + $0x3b0] sm:$0xf0]  ;;  %v9506_v5 = vld [vmem:[#allocation8 + $0x54c] sm:$0xf] }
 0x54f   :  { %5495 = vmatpush.bf16.msra.mxu2 %v7912_v26  ;;  %5514 = vmatpush.bf16.msra.mxu3 %v8104_v10  ;;  %v10686_v26 = vpop.permute.xlu0 %5855  ;;  %v8819_v10 = vld [vmem:[#allocation8 + $0x7b8] sm:$0xf] }
 0x550   :  { %5456 = vmatpush.bf16.msra.mxu0 %v8700_v49  ;;  %5475 = vmatpush.bf16.msra.mxu1 %v8892_v36  ;;  %v8749_v49 = vld [vmem:[#allocation8 + $0x740] sm:$0xf0]  ;;  %v9560_v36 = vld [vmem:[#allocation8 + $0x6fc] sm:$0xf] }
 0x551   :  { %v8752_v30 = vor.u32 %v9566_v9, %v8749_v49  ;;  %v9596_v9 = vld [vmem:[#allocation8 + $0x81c] sm:$0xf]  ;;  %v8869_v49 = vld [vmem:[#allocation8 + $0x830] sm:$0xf0] }
 0x552   :  { %5314 = vmatmul.bf16.gmra.mxu0 %v10610_v0  ;;  %5333 = vmatmul.bf16.gmra.mxu1 %v10612_v48 }
 0x553   :  { %5496 = vmatpush.bf16.msra.mxu2 %v7888_v21  ;;  %5515 = vmatpush.bf16.msra.mxu3 %v8080_v41  ;;  %v8820_v21 = vor.u32 %v9587_v23, %v8819_v10  ;;  %v8389_v41 = vld [vmem:[#allocation8 + $0x470] sm:$0xf0]  ;;  %v9548_v10 = vld [vmem:[#allocation8 + $0x69c] sm:$0xf] }
 0x554   :  { %5457 = vmatpush.bf16.msra.mxu0 %v8676_v58  ;;  %5476 = vmatpush.bf16.msra.mxu1 %v8868_v47  ;;  %v8944_v58 = vor.u32 %v9614_v18, %v8941_v57  ;;  %v9554_v47 = vld [vmem:[#allocation8 + $0x6cc] sm:$0xf]  ;;  %v9512_v23 = vld [vmem:[#allocation8 + $0x57c] sm:$0xf]  ;;  %v8344_v18 = vor.u32 %v9464_v45, %v8341_v24 }
 0x555   :  { %v9458_v57 = vld [vmem:[#allocation8 + $0x3cc] sm:$0xf] }
 0x556   :  { %v9530_v24 = vld [vmem:[#allocation8 + $0x60c] sm:$0xf] }
 0x557   :  { %5497 = vmatpush.bf16.msra.mxu2 %v7864_v17  ;;  %5516 = vmatpush.bf16.msra.mxu3 %v8056_v3  ;;  %v8392_v17 = vor.u32 %v9476_v40, %v8389_v41  ;;  %v8796_v3 = vor.u32 %v9581_v1, %v8795_v61  ;;  %v10694_v27 = vpop.permute.xlu0 %5853  ;;  %v8872_v41 = vor.u32 %v9596_v9, %v8869_v49  ;;  %v9542_v61 = vld [vmem:[#allocation8 + $0x66c] sm:$0xf]  ;;  %v8653_v1 = vld [vmem:[#allocation8 + $0x680] sm:$0xf0]  ;;  %v8245_v9 = vld [vmem:[#allocation8 + $0x350] sm:$0xf0] }
 0x558   :  { %5458 = vmatpush.bf16.msra.mxu0 %v8652_v7  ;;  %5477 = vmatpush.bf16.msra.mxu1 %v8844_v22  ;;  %v8728_v7 = vor.u32 %v9560_v36, %v8725_v46  ;;  %v8704_v22 = vor.u32 %v9554_v47, %v8701_v32  ;;  %v8845_v36 = vld [vmem:[#allocation8 + $0x800] sm:$0xf0]  ;;  %v8656_v2 = vor.u32 %v9542_v61, %v8653_v1  ;;  %v9494_v49 = vld [vmem:[#allocation8 + $0x4ec] sm:$0xf]  ;;  %v8587_v61 = vld [vmem:[#allocation8 + $0x5e0] sm:$0xf] }
 0x559   :  { %v8296_v47 = vor.u32 %v9452_v8, %v8293_v20  ;;  %v8269_v32 = vld [vmem:[#allocation8 + $0x380] sm:$0xf0]  ;;  %v9528_v1 = vld [vmem:[#allocation8 + $0x5f4] sm:$0xf0]  ;;  %v9488_v20 = vld [vmem:[#allocation8 + $0x4bc] sm:$0xf] }
 0x55a   :  { %v8221_v8 = vld [vmem:[#allocation8 + $0x320] sm:$0xf0] }
 0x55b   :  { %5498 = vmatpush.bf16.msra.mxu2 %v7840_v51  ;;  %5517 = vmatpush.bf16.msra.mxu3 %v8032_v16  ;;  %v9602_v51 = vld [vmem:[#allocation8 + $0x84c] sm:$0xf]  ;;  %v8893_v16 = vld [vmem:[#allocation8 + $0x860] sm:$0xf0] }
 0x55c   :  { %5459 = vmatpush.bf16.msra.mxu0 %v8628_v19  ;;  %5478 = vmatpush.bf16.msra.mxu1 %v8820_v21  ;;  %v8560_v19 = vor.u32 %v9518_v62, %v8557_v54  ;;  %v8896_v56 = vor.u32 %v9602_v51, %v8893_v16  ;;  %v9446_v62 = vld [vmem:[#allocation8 + $0x36c] sm:$0xf]  ;;  %v9500_v51 = vld [vmem:[#allocation8 + $0x51c] sm:$0xf]  ;;  %v8485_v16 = vld [vmem:[#allocation8 + $0x530] sm:$0xf0] }
 0x55d   :  { %5423 = vmatmul.bf16.vlgmr.msrb.gmra.mxu2 %v10578_v31  ;;  %5442 = vmatmul.bf16.vlgmr.msrb.gmra.mxu3 %v10580_v42 }
 0x55f   :  { %5567 = vmatpush.bf16.msrb.mxu2 %v8776_v37  ;;  %5586 = vmatpush.bf16.msrb.mxu3 %v8968_v11  ;;  %v8533_v37 = vld [vmem:[#allocation8 + $0x590] sm:$0xf0] }
 0x560   :  { %5460 = vmatpush.bf16.msra.mxu0 %v8604_v12  ;;  %5479 = vmatpush.bf16.msra.mxu1 %v8796_v3  ;;  %v8677_v11 = vld [vmem:[#allocation8 + $0x6b0] sm:$0xf0]  ;;  %v8317_v12 = vld [vmem:[#allocation8 + $0x3e0] sm:$0xf0]  ;;  %v8536_v40 = vor.u32 %v9512_v23, %v8533_v37  ;;  %v10702_v3 = vpop.permute.xlu1 %5869  ;;  %v8272_v23 = vor.u32 %v9446_v62, %v8269_v32  ;;  %v9440_v37 = vld [vmem:[#allocation8 + $0x33c] sm:$0xf] }
 0x561   :  { %v8680_v21 = vor.u32 %v9548_v10, %v8677_v11  ;;  %v8320_v46 = vor.u32 %v9458_v57, %v8317_v12  ;;  %v8797_v10 = vld [vmem:[#allocation8 + $0x7a0] sm:$0xf0]  ;;  %v8488_v11 = vor.u32 %v9500_v51, %v8485_v16  ;;  %v8395_v12 = vld [vmem:[#allocation8 + $0x460] sm:$0xf]  ;;  %v9384_v32 = vld [vmem:[#allocation8 + $0x174] sm:$0xf0] }
 0x562   :  { %5385 = vmatmul.bf16.vlgmr.msrb.gmra.mxu0 %v10590_v34  ;;  %5404 = vmatmul.bf16.vlgmr.msrb.gmra.mxu1 %v10592_v14  ;;  %v8011_v62 = vld [vmem:[#allocation8 + $0x160] sm:$0xf]  ;;  %v9482_v51 = vld [vmem:[#allocation8 + $0x48c] sm:$0xf]  ;;  %v8413_v16 = vld [vmem:[#allocation8 + $0x4a0] sm:$0xf0] }
 0x563   :  { %5568 = vmatpush.bf16.msrb.mxu2 %v8752_v30  ;;  %5587 = vmatpush.bf16.msrb.mxu3 %v8944_v58  ;;  %v10698_v30 = vpop.permute.xlu0 %5851  ;;  %v9590_v58 = vld [vmem:[#allocation8 + $0x7ec] sm:$0xf] }
 0x564   :  { %5529 = vmatpush.bf16.msrb.mxu0 %v8392_v17  ;;  %5548 = vmatpush.bf16.msrb.mxu1 %v8584_v63  ;;  %v8509_v17 = vld [vmem:[#allocation8 + $0x560] sm:$0xf0]  ;;  %v8848_v33 = vor.u32 %v9590_v58, %v8845_v36  ;;  %v8629_v63 = vld [vmem:[#allocation8 + $0x650] sm:$0xf0]  ;;  %v8248_v58 = vor.u32 %v9440_v37, %v8245_v9  ;;  %v9434_v36 = vld [vmem:[#allocation8 + $0x30c] sm:$0xf] }
 0x565   :  { %v8512_v54 = vor.u32 %v9506_v5, %v8509_v17  ;;  %v8437_v5 = vld [vmem:[#allocation8 + $0x4d0] sm:$0xf0]  ;;  %v8347_v37 = vld [vmem:[#allocation8 + $0x400] sm:$0xf] }
 0x567   :  { %5569 = vmatpush.bf16.msrb.mxu2 %v8728_v7  ;;  %5588 = vmatpush.bf16.msrb.mxu3 %v8920_v59  ;;  %v9584_v7 = vld [vmem:[#allocation8 + $0x7bc] sm:$0xf]  ;;  %v8821_v59 = vld [vmem:[#allocation8 + $0x7d0] sm:$0xf0] }
 0x568   :  { %5530 = vmatpush.bf16.msrb.mxu0 %v8368_v6  ;;  %5549 = vmatpush.bf16.msrb.mxu1 %v8560_v19  ;;  %v8632_v6 = vor.u32 %v9536_v43, %v8629_v63  ;;  %v8824_v45 = vor.u32 %v9584_v7, %v8821_v59  ;;  %v8605_v19 = vld [vmem:[#allocation8 + $0x620] sm:$0xf0]  ;;  %v10708_v57 = vpop.permute.xlu1 %5867  ;;  %v9474_v43 = vld [vmem:[#allocation8 + $0x444] sm:$0xf0]  ;;  %v8563_v7 = vld [vmem:[#allocation8 + $0x5b0] sm:$0xf] }
 0x569   :  { %11029 = vst [vmem:[#allocation25_spill] sm:$0xff] %v10708_v57  ;;  %v9522_v59 = vld [vmem:[#allocation8 + $0x5c4] sm:$0xf0]  ;;  %v8949_v57 = vld [vmem:[#allocation8 + $0x8c8] sm:$0xf0] }
 0x56b   :  { %5570 = vmatpush.bf16.msrb.mxu2 %v8704_v22  ;;  %5589 = vmatpush.bf16.msrb.mxu3 %v8896_v56  ;;  %v10706_v22 = vpop.permute.xlu0 %5849  ;;  %v9578_v56 = vld [vmem:[#allocation8 + $0x78c] sm:$0xf] }
 0x56c   :  { %5531 = vmatpush.bf16.msrb.mxu0 %v8344_v18  ;;  %5550 = vmatpush.bf16.msrb.mxu1 %v8536_v40  ;;  %11028 = vst [vmem:[#allocation24_spill] sm:$0xff] %v10706_v22  ;;  %v8461_v18 = vld [vmem:[#allocation8 + $0x500] sm:$0xf0]  ;;  %v8608_v40 = vor.u32 %v9530_v24, %v8605_v19 }
 0x56d   :  { %5428 = vmatmul.bf16.gmra.mxu2 %v10610_v0  ;;  %5447 = vmatmul.bf16.gmra.mxu3 %v10612_v48 }
 0x56f   :  { %5571 = vmatpush.bf16.msrb.mxu2 %v8680_v21  ;;  %5590 = vmatpush.bf16.msrb.mxu3 %v8872_v41  ;;  %v8800_v21 = vor.u32 %v9578_v56, %v8797_v10  ;;  %v9480_v41 = vld [vmem:[#allocation8 + $0x474] sm:$0xf0] }
 0x570   :  { %5532 = vmatpush.bf16.msrb.mxu0 %v8320_v46  ;;  %5551 = vmatpush.bf16.msrb.mxu1 %v8512_v54  ;;  %v8464_v46 = vor.u32 %v9494_v49, %v8461_v18  ;;  %v8396_v17 = vor.u32 %v9480_v41, %v8395_v12  ;;  %v8440_v54 = vor.u32 %v9488_v20, %v8437_v5  ;;  %v10714_v24 = vpop.permute.xlu1 %5865  ;;  %v9468_v18 = vld [vmem:[#allocation8 + $0x414] sm:$0xf0]  ;;  %v8539_v12 = vld [vmem:[#allocation8 + $0x580] sm:$0xf] }
 0x571   :  { %11030 = vst [vmem:[#allocation26_spill] sm:$0xff] %v10714_v24  ;;  %v8416_v41 = vor.u32 %v9482_v51, %v8413_v16  ;;  %v8348_v20 = vor.u32 %v9468_v18, %v8347_v37  ;;  %v9504_v18 = vld [vmem:[#allocation8 + $0x534] sm:$0xf0]  ;;  %v9534_v24 = vld [vmem:[#allocation8 + $0x624] sm:$0xf0] }
 0x572   :  { %5390 = vmatmul.bf16.gmra.mxu0 %v10622_v4  ;;  %5409 = vmatmul.bf16.gmra.mxu1 %v10624_v38 }
 0x573   :  { %5572 = vmatpush.bf16.msrb.mxu2 %v8656_v2  ;;  %5591 = vmatpush.bf16.msrb.mxu3 %v8848_v33  ;;  %v8588_v2 = vor.u32 %v9528_v1, %v8587_v61  ;;  %v8371_v33 = vld [vmem:[#allocation8 + $0x430] sm:$0xf]  ;;  %v10710_v63 = vpop.permute.xlu0 %5891  ;;  %v9378_v1 = vld [vmem:[#allocation8 + $0x144] sm:$0xf0] }
 0x574   :  { %5533 = vmatpush.bf16.msrb.mxu0 %v8296_v47  ;;  %5552 = vmatpush.bf16.msrb.mxu1 %v8488_v11  ;;  %v8224_v47 = vor.u32 %v9434_v36, %v8221_v8  ;;  %v8372_v10 = vor.u32 %v9474_v43, %v8371_v33  ;;  %v7987_v61 = vld [vmem:[#allocation8 + $0x130] sm:$0xf]  ;;  %v9426_v8 = vld [vmem:[#allocation8 + $0x2c4] sm:$0xf0] }
 0x575   :  { %v9462_v43 = vld [vmem:[#allocation8 + $0x3e4] sm:$0xf0] }
 0x577   :  { %5573 = vmatpush.bf16.msrb.mxu2 %v8632_v6  ;;  %5592 = vmatpush.bf16.msrb.mxu3 %v8824_v45  ;;  %v8203_v6 = vld [vmem:[#allocation8 + $0x2e0] sm:$0xf]  ;;  %v9432_v45 = vld [vmem:[#allocation8 + $0x2f4] sm:$0xf0] }
 0x578   :  { %5534 = vmatpush.bf16.msrb.mxu0 %v8272_v23  ;;  %5553 = vmatpush.bf16.msrb.mxu1 %v8464_v46  ;;  %v8564_v23 = vor.u32 %v9522_v59, %v8563_v7  ;;  %v8179_v46 = vld [vmem:[#allocation8 + $0x2b0] sm:$0xf]  ;;  %v9510_v59 = vld [vmem:[#allocation8 + $0x564] sm:$0xf0] }
 0x579   :  { %v8515_v7 = vld [vmem:[#allocation8 + $0x550] sm:$0xf] }
 0x57b   :  { %5574 = vmatpush.bf16.msrb.mxu2 %v8608_v40  ;;  %5593 = vmatpush.bf16.msrb.mxu3 %v8800_v21  ;;  %v9516_v40 = vld [vmem:[#allocation8 + $0x594] sm:$0xf0]  ;;  %v8012_v21 = vor.u32 %v9384_v32, %v8011_v62  ;;  %v7963_v62 = vld [vmem:[#allocation8 + $0x100] sm:$0xf]  ;;  %v8180_v32 = vor.u32 %v9426_v8, %v8179_v46  ;;  %v8275_v46 = vld [vmem:[#allocation8 + $0x370] sm:$0xf] }
 0x57c   :  { %5535 = vmatpush.bf16.msrb.mxu0 %v8248_v58  ;;  %5554 = vmatpush.bf16.msrb.mxu1 %v8440_v54  ;;  %v8204_v58 = vor.u32 %v9432_v45, %v8203_v6  ;;  %v8540_v5 = vor.u32 %v9516_v40, %v8539_v12  ;;  %v9372_v54 = vld [vmem:[#allocation8 + $0x114] sm:$0xf0]  ;;  %v8516_v45 = vor.u32 %v9510_v59, %v8515_v7  ;;  %v7939_v40 = vld [vmem:[#allocation8 + $0xd0] sm:$0xf]  ;;  %v9450_v8 = vld [vmem:[#allocation8 + $0x384] sm:$0xf0] }
 0x57d   :  { %5499 = vmatmul.bf16.vlgmr.msra.gmra.mxu2 %v10590_v34  ;;  %5518 = vmatmul.bf16.vlgmr.msra.gmra.mxu3 %v10592_v14  ;;  %v7964_v12 = vor.u32 %v9372_v54, %v7963_v62  ;;  %v7915_v7 = vld [vmem:[#allocation8 + $0xa0] sm:$0xf]  ;;  %v8131_v62 = vld [vmem:[#allocation8 + $0x250] sm:$0xf]  ;;  %v9414_v54 = vld [vmem:[#allocation8 + $0x264] sm:$0xf0] }
 0x57f   :  { %5643 = vmatpush.bf16.msra.mxu2 %v8396_v17  ;;  %5662 = vmatpush.bf16.msra.mxu3 %v8588_v2  ;;  %v5158_v19 = vpop.f32.mrf.mxu0  ;;  %v5177_v56 = vpop.f32.mrf.mxu1  ;;  %v8323_v17 = vld [vmem:[#allocation8 + $0x3d0] sm:$0xf] }
 0x580   :  { %v5178_v11 = vadd.f32 %v5177_v56, %v5158_v19  ;;  %v5196_v9 = vpop.f32.mrf.mxu2  ;;  %v5215_v49 = vpop.f32.mrf.mxu3  ;;  %5536 = vmatpush.bf16.msrb.mxu0 %v8224_v47  ;;  %v7988_v47 = vor.u32 %v9378_v1, %v7987_v61  ;;  %5555 = vmatpush.bf16.msrb.mxu1 %v8416_v41  ;;  %v8324_v6 = vor.u32 %v9462_v43, %v8323_v17  ;;  %v8299_v19 = vld [vmem:[#allocation8 + $0x3a0] sm:$0xf]  ;;  %v9498_v17 = vld [vmem:[#allocation8 + $0x504] sm:$0xf0] }
 0x581   :  { %v10718_v2 = vpop.permute.xlu0 %5907  ;;  %v8155_v56 = vld [vmem:[#allocation8 + $0x280] sm:$0xf]  ;;  %v10722_v1 = vpop.permute.xlu1 %5847 }
 0x582   :  { %v5197_v36 = vadd.f32 %v5196_v9, %v5178_v11  ;;  %5461 = vmatmul.bf16.vlgmr.msra.gmra.mxu0 %v10654_v44  ;;  %5480 = vmatmul.bf16.vlgmr.msra.gmra.mxu1 %v10656_v60  ;;  %v9456_v9 = vld [vmem:[#allocation8 + $0x3b4] sm:$0xf0]  ;;  %11031 = vst [vmem:[#allocation27_spill] sm:$0xff] %v10722_v1  ;;  %v8827_v1 = vld [vmem:[#allocation8 + $0x7c0] sm:$0xf] }
 0x583   :  { %5644 = vmatpush.bf16.msra.mxu2 %v8372_v10  ;;  %5663 = vmatpush.bf16.msra.mxu3 %v8564_v23  ;;  %v9420_v10 = vld [vmem:[#allocation8 + $0x294] sm:$0xf0] }
 0x584   :  { %v10720_v33 = vadd.f32 %v5215_v49, %v5197_v36  ;;  %5605 = vmatpush.bf16.msra.mxu0 %v8012_v21  ;;  %5624 = vmatpush.bf16.msra.mxu1 %v8204_v58  ;;  %v8491_v49 = vld [vmem:[#allocation8 + $0x520] sm:$0xf]  ;;  %v9366_v21 = vld [vmem:[#allocation8 + $0xe4] sm:$0xf0]  ;;  %v8156_v61 = vor.u32 %v9420_v10, %v8155_v56  ;;  %v8300_v58 = vor.u32 %v9456_v9, %v8299_v19  ;;  %v9444_v19 = vld [vmem:[#allocation8 + $0x354] sm:$0xf0] }
 0x585   :  { %v8492_v36 = vor.u32 %v9504_v18, %v8491_v49  ;;  %v7940_v43 = vor.u32 %v9366_v21, %v7939_v40  ;;  %v7891_v49 = vld [vmem:[#allocation8 + $0x70] sm:$0xf]  ;;  %v8132_v18 = vor.u32 %v9414_v54, %v8131_v62  ;;  %v8107_v40 = vld [vmem:[#allocation8 + $0x220] sm:$0xf]  ;;  %v9408_v21 = vld [vmem:[#allocation8 + $0x234] sm:$0xf0] }
 0x586   :  { %v9348_v54 = vld [vmem:[#allocation8 + $0x54] sm:$0xf0] }
 0x587   :  { %v5160_v51 = vpop.f32.mrf.mxu0  ;;  %v5179_v16 = vpop.f32.mrf.mxu1  ;;  %5645 = vmatpush.bf16.msra.mxu2 %v8348_v20  ;;  %5664 = vmatpush.bf16.msra.mxu3 %v8540_v5  ;;  %v8467_v5 = vld [vmem:[#allocation8 + $0x4f0] sm:$0xf] }
 0x588   :  { %v5180_v23 = vadd.f32 %v5179_v16, %v5160_v51  ;;  %v5198_v37 = vpop.f32.mrf.mxu2  ;;  %v5217_v11 = vpop.f32.mrf.mxu3  ;;  %5606 = vmatpush.bf16.msra.mxu0 %v7988_v47  ;;  %5625 = vmatpush.bf16.msra.mxu1 %v8180_v32  ;;  %v9360_v47 = vld [vmem:[#allocation8 + $0xb4] sm:$0xf0]  ;;  %v8276_v16 = vor.u32 %v9450_v8, %v8275_v46  ;;  %v9438_v46 = vld [vmem:[#allocation8 + $0x324] sm:$0xf0] }
 0x589   :  { %v10726_v59 = vpop.permute.xlu0 %5889  ;;  %v7916_v9 = vor.u32 %v9360_v47, %v7915_v7  ;;  %v7867_v7 = vld [vmem:[#allocation8 + $0x40] sm:$0xf]  ;;  %v8108_v47 = vor.u32 %v9408_v21, %v8107_v40  ;;  %v10734_v62 = vpop.permute.xlu1 %5863  ;;  %v7843_v40 = vld [vmem:[#allocation8 + $0x10] sm:$0xf] }
 0x58a   :  { %v5199_v41 = vadd.f32 %v5198_v37, %v5180_v23  ;;  %v8443_v37 = vld [vmem:[#allocation8 + $0x4c0] sm:$0xf]  ;;  %11032 = vst [vmem:[#allocation28_spill] sm:$0xff] %v10734_v62 }
 0x58b   :  { %5646 = vmatpush.bf16.msra.mxu2 %v8324_v6  ;;  %5665 = vmatpush.bf16.msra.mxu3 %v8516_v45  ;;  %v8468_v6 = vor.u32 %v9498_v17, %v8467_v5  ;;  %v8251_v45 = vld [vmem:[#allocation8 + $0x340] sm:$0xf]  ;;  %v8419_v5 = vld [vmem:[#allocation8 + $0x490] sm:$0xf]  ;;  %v9486_v17 = vld [vmem:[#allocation8 + $0x4a4] sm:$0xf0] }
 0x58c   :  { %v10724_v20 = vadd.f32 %v5217_v11, %v5199_v41  ;;  %5607 = vmatpush.bf16.msra.mxu0 %v7964_v12  ;;  %5626 = vmatpush.bf16.msra.mxu1 %v8156_v61  ;;  %v9492_v11 = vld [vmem:[#allocation8 + $0x4d4] sm:$0xf0]  ;;  %v9354_v12 = vld [vmem:[#allocation8 + $0x84] sm:$0xf0]  ;;  %v8252_v61 = vor.u32 %v9444_v19, %v8251_v45 }
 0x58d   :  { %5504 = vmatmul.bf16.gmra.mxu2 %v10622_v4  ;;  %5523 = vmatmul.bf16.gmra.mxu3 %v10624_v38 }
 0x58f   :  { %v5163_v32 = vpop.f32.mrf.mxu0  ;;  %v5182_v51 = vpop.f32.mrf.mxu1  ;;  %5647 = vmatpush.bf16.msra.mxu2 %v8300_v58  ;;  %5666 = vmatpush.bf16.msra.mxu3 %v8492_v36  ;;  %v8444_v58 = vor.u32 %v9492_v11, %v8443_v37  ;;  %v8227_v36 = vld [vmem:[#allocation8 + $0x310] sm:$0xf]  ;;  %v9429_v37 = vld [vmem:[#allocation8 + $0x2e4] sm:$0xf]  ;;  %v8205_v11 = vld [vmem:[#allocation8 + $0x2f8] sm:$0xf0] }
 0x590   :  { %v5183_v56 = vadd.f32 %v5182_v51, %v5163_v32  ;;  %v5201_v10 = vpop.f32.mrf.mxu2  ;;  %v5220_v23 = vpop.f32.mrf.mxu3  ;;  %5608 = vmatpush.bf16.msra.mxu0 %v7940_v43  ;;  %v7892_v43 = vor.u32 %v9354_v12, %v7891_v49  ;;  %5627 = vmatpush.bf16.msra.mxu1 %v8132_v18  ;;  %v8083_v32 = vld [vmem:[#allocation8 + $0x1f0] sm:$0xf]  ;;  %v9402_v51 = vld [vmem:[#allocation8 + $0x204] sm:$0xf0]  ;;  %v7868_v12 = vor.u32 %v9348_v54, %v7867_v7  ;;  %v8779_v7 = vld [vmem:[#allocation8 + $0x760] sm:$0xf] }
 0x591   :  { %v8084_v21 = vor.u32 %v9402_v51, %v8083_v32  ;;  %v9576_v54 = vld [vmem:[#allocation8 + $0x774] sm:$0xf0]  ;;  %v8035_v32 = vld [vmem:[#allocation8 + $0x190] sm:$0xf]  ;;  %v9390_v51 = vld [vmem:[#allocation8 + $0x1a4] sm:$0xf0] }
 0x592   :  { %v5202_v41 = vadd.f32 %v5201_v10, %v5183_v56  ;;  %5466 = vmatmul.bf16.gmra.mxu0 %v10666_v55  ;;  %5485 = vmatmul.bf16.gmra.mxu1 %v10668_v15  ;;  %v8228_v56 = vor.u32 %v9438_v46, %v8227_v36  ;;  %v8420_v10 = vor.u32 %v9486_v17, %v8419_v5  ;;  %v7989_v36 = vld [vmem:[#allocation8 + $0x148] sm:$0xf0]  ;;  %v9423_v5 = vld [vmem:[#allocation8 + $0x2b4] sm:$0xf] }
 0x593   :  { %5648 = vmatpush.bf16.msra.mxu2 %v8276_v16  ;;  %5667 = vmatpush.bf16.msra.mxu3 %v8468_v6  ;;  %v9381_v16 = vld [vmem:[#allocation8 + $0x164] sm:$0xf]  ;;  %v10736_v6 = vpop.permute.xlu0 %5905  ;;  %v8181_v17 = vld [vmem:[#allocation8 + $0x2c8] sm:$0xf0] }
 0x594   :  { %v10732_v8 = vadd.f32 %v5220_v23, %v5202_v41  ;;  %5609 = vmatpush.bf16.msra.mxu0 %v7916_v9  ;;  %v8013_v23 = vld [vmem:[#allocation8 + $0x178] sm:$0xf0]  ;;  %5628 = vmatpush.bf16.msra.mxu1 %v8108_v47  ;;  %v9342_v41 = vld [vmem:[#allocation8 + $0x24] sm:$0xf0]  ;;  %v8060_v47 = vor.u32 %v9396_v28, %v8059_v25 }
 0x595   :  { %v8016_v35 = vor.u32 %v9381_v16, %v8013_v23  ;;  %v10742_v16 = vpop.permute.xlu1 %5845  ;;  %v8184_v23 = vor.u32 %v9423_v5, %v8181_v17 }
 0x596   :  { %11033 = vst [vmem:[#allocation29_spill] sm:$0xff] %v10742_v16 }
 0x597   :  { %v5165_v45 = vpop.f32.mrf.mxu0  ;;  %v5184_v19 = vpop.f32.mrf.mxu1  ;;  %5649 = vmatpush.bf16.msra.mxu2 %v8252_v61  ;;  %5668 = vmatpush.bf16.msra.mxu3 %v8444_v58  ;;  %v8208_v61 = vor.u32 %v9429_v37, %v8205_v11  ;;  %v9375_v58 = vld [vmem:[#allocation8 + $0x134] sm:$0xf]  ;;  %v9369_v37 = vld [vmem:[#allocation8 + $0x104] sm:$0xf] }
 0x598   :  { %v5185_v9 = vadd.f32 %v5184_v19, %v5165_v45  ;;  %v5203_v49 = vpop.f32.mrf.mxu2  ;;  %v5222_v18 = vpop.f32.mrf.mxu3  ;;  %5610 = vmatpush.bf16.msra.mxu0 %v7892_v43  ;;  %v7844_v43 = vor.u32 %v9342_v41, %v7843_v40  ;;  %5629 = vmatpush.bf16.msra.mxu1 %v8084_v21  ;;  %v9624_v45 = vld [vmem:[#allocation8 + $0x8f4] sm:$0xf0]  ;;  %v8755_v21 = vld [vmem:[#allocation8 + $0x730] sm:$0xf]  ;;  %v9570_v41 = vld [vmem:[#allocation8 + $0x744] sm:$0xf0] }
 0x59a   :  { %v5204_v50 = vadd.f32 %v5203_v49, %v5185_v9  ;;  %v7965_v9 = vld [vmem:[#allocation8 + $0x118] sm:$0xf0]  ;;  %v9417_v49 = vld [vmem:[#allocation8 + $0x284] sm:$0xf] }
 0x59b   :  { %5650 = vmatpush.bf16.msra.mxu2 %v8228_v56  ;;  %5669 = vmatpush.bf16.msra.mxu3 %v8420_v10  ;;  %v7992_v10 = vor.u32 %v9375_v58, %v7989_v36  ;;  %v8947_v58 = vld [vmem:[#allocation8 + $0x8b0] sm:$0xf]  ;;  %v9618_v36 = vld [vmem:[#allocation8 + $0x8c4] sm:$0xf0]  ;;  %v7968_v5 = vor.u32 %v9369_v37, %v7965_v9  ;;  %v8923_v37 = vld [vmem:[#allocation8 + $0x880] sm:$0xf] }
 0x59c   :  { %v10738_v46 = vadd.f32 %v5222_v18, %v5204_v50  ;;  %5611 = vmatpush.bf16.msra.mxu0 %v7868_v12  ;;  %v8971_v50 = vld [vmem:[#allocation8 + $0x8e0] sm:$0xf]  ;;  %v8157_v18 = vld [vmem:[#allocation8 + $0x298] sm:$0xf0]  ;;  %v8780_v12 = vor.u32 %v9576_v54, %v8779_v7  ;;  %5630 = vmatpush.bf16.msra.mxu1 %v8060_v47  ;;  %v7941_v7 = vld [vmem:[#allocation8 + $0xe8] sm:$0xf0] }
 0x59d   :  { %5575 = vmatmul.bf16.vlgmr.msrb.gmra.mxu2 %v10654_v44  ;;  %5594 = vmatmul.bf16.vlgmr.msrb.gmra.mxu3 %v10656_v60  ;;  %v8160_v17 = vor.u32 %v9417_v49, %v8157_v18  ;;  %v9411_v47 = vld [vmem:[#allocation8 + $0x254] sm:$0xf]  ;;  %v8133_v54 = vld [vmem:[#allocation8 + $0x268] sm:$0xf0]  ;;  %v7917_v18 = vld [vmem:[#allocation8 + $0xb8] sm:$0xf0] }
 0x59f   :  { %5719 = vmatpush.bf16.msrb.mxu2 %v8016_v35  ;;  %5738 = vmatpush.bf16.msrb.mxu3 %v8208_v61  ;;  %v5234_v19 = vpop.f32.mrf.mxu0  ;;  %v5253_v56 = vpop.f32.mrf.mxu1  ;;  %v8036_v35 = vor.u32 %v9390_v51, %v8035_v32  ;;  %v8972_v61 = vor.u32 %v9624_v45, %v8971_v50  ;;  %v8756_v32 = vor.u32 %v9570_v41, %v8755_v21  ;;  %v8731_v51 = vld [vmem:[#allocation8 + $0x700] sm:$0xf]  ;;  %v9564_v50 = vld [vmem:[#allocation8 + $0x714] sm:$0xf0] }
 0x5a0   :  { %v5235_v28 = vadd.f32 %v5234_v19, %v10720_v33  ;;  %v5272_v25 = vpop.f32.mrf.mxu2  ;;  %v5291_v11 = vpop.f32.mrf.mxu3  ;;  %5612 = vmatpush.bf16.msra.mxu0 %v7844_v43  ;;  %v9363_v43 = vld [vmem:[#allocation8 + $0xd4] sm:$0xf]  ;;  %v8948_v45 = vor.u32 %v9618_v36, %v8947_v58  ;;  %v8732_v21 = vor.u32 %v9564_v50, %v8731_v51  ;;  %v9558_v58 = vld [vmem:[#allocation8 + $0x6e4] sm:$0xf0]  ;;  %v8085_v51 = vld [vmem:[#allocation8 + $0x208] sm:$0xf0] }
 0x5a1   :  { %v10745_v40 = vadd.f32 %v5291_v11, %v5272_v25  ;;  %v10749_v33 = vpop.permute.xlu0 %5887  ;;  %5631 = vmatpush.bf16.msra.mxu1 %v8036_v35  ;;  %v9612_v25 = vld [vmem:[#allocation8 + $0x894] sm:$0xf0]  ;;  %v8109_v35 = vld [vmem:[#allocation8 + $0x238] sm:$0xf0] }
 0x5a2   :  { %v5254_v62 = vadd.f32 %v5253_v56, %v5235_v28  ;;  %5537 = vmatmul.bf16.vlgmr.msrb.gmra.mxu0 %v10578_v31  ;;  %5556 = vmatmul.bf16.vlgmr.msrb.gmra.mxu1 %v10580_v42  ;;  %v7944_v28 = vor.u32 %v9363_v43, %v7941_v7  ;;  %v9351_v7 = vld [vmem:[#allocation8 + $0x74] sm:$0xf] }
 0x5a3   :  { %5720 = vmatpush.bf16.msrb.mxu2 %v7992_v10  ;;  %5739 = vmatpush.bf16.msrb.mxu3 %v8184_v23  ;;  %v8136_v10 = vor.u32 %v9411_v47, %v8133_v54  ;;  %v9357_v23 = vld [vmem:[#allocation8 + $0xa4] sm:$0xf]  ;;  %v7893_v47 = vld [vmem:[#allocation8 + $0x88] sm:$0xf0] }
 0x5a4   :  { %5681 = vmatpush.bf16.msrb.mxu0 %v8780_v12  ;;  %v9405_v12 = vld [vmem:[#allocation8 + $0x224] sm:$0xf]  ;;  %v7920_v43 = vor.u32 %v9357_v23, %v7917_v18 }
 0x5a5   :  { %5700 = vmatpush.bf16.msrb.mxu1 %v8972_v61  ;;  %v8707_v61 = vld [vmem:[#allocation8 + $0x6d0] sm:$0xf] }
 0x5a6   :  { %v8708_v50 = vor.u32 %v9558_v58, %v8707_v61  ;;  %v8659_v58 = vld [vmem:[#allocation8 + $0x670] sm:$0xf] }
 0x5a7   :  { %v5236_v19 = vpop.f32.mrf.mxu0  ;;  %v5255_v56 = vpop.f32.mrf.mxu1  ;;  %5721 = vmatpush.bf16.msrb.mxu2 %v7968_v5  ;;  %5740 = vmatpush.bf16.msrb.mxu3 %v8160_v17  ;;  %v8924_v17 = vor.u32 %v9612_v25, %v8923_v37  ;;  %v9345_v25 = vld [vmem:[#allocation8 + $0x44] sm:$0xf] }
 0x5a8   :  { %v5237_v11 = vadd.f32 %v5236_v19, %v10724_v20  ;;  %v5274_v9 = vpop.f32.mrf.mxu2  ;;  %v5293_v49 = vpop.f32.mrf.mxu3  ;;  %5682 = vmatpush.bf16.msrb.mxu0 %v8756_v32  ;;  %v8112_v20 = vor.u32 %v9405_v12, %v8109_v35  ;;  %v9399_v32 = vld [vmem:[#allocation8 + $0x1f4] sm:$0xf]  ;;  %v8683_v19 = vld [vmem:[#allocation8 + $0x6a0] sm:$0xf]  ;;  %v9393_v35 = vld [vmem:[#allocation8 + $0x1c4] sm:$0xf] }
 0x5a9   :  { %v10752_v41 = vadd.f32 %v5293_v49, %v5274_v9  ;;  %5701 = vmatpush.bf16.msrb.mxu1 %v8948_v45  ;;  %v10754_v5 = vpop.permute.xlu1 %5861  ;;  %v10758_v9 = vpop.permute.xlu0 %5923  ;;  %v9552_v45 = vld [vmem:[#allocation8 + $0x6b4] sm:$0xf0]  ;;  %v8088_v37 = vor.u32 %v9399_v32, %v8085_v51  ;;  %v7845_v32 = vld [vmem:[#allocation8 + $0x28] sm:$0xf0]  ;;  %v9387_v51 = vld [vmem:[#allocation8 + $0x194] sm:$0xf] }
 0x5aa   :  { %v5256_v36 = vadd.f32 %v5255_v56, %v5237_v11  ;;  %11034 = vst [vmem:[#allocation30_spill] sm:$0xff] %v10754_v5  ;;  %v8899_v56 = vld [vmem:[#allocation8 + $0x850] sm:$0xf]  ;;  %v7869_v11 = vld [vmem:[#allocation8 + $0x58] sm:$0xf0]  ;;  %v8684_v61 = vor.u32 %v9552_v45, %v8683_v19 }
 0x5ab   :  { %5722 = vmatpush.bf16.msrb.mxu2 %v7944_v28  ;;  %5741 = vmatpush.bf16.msrb.mxu3 %v8136_v10  ;;  %11036 = vst [vmem:[#allocation32_spill] sm:$0xff] %v10758_v9  ;;  %v9606_v28 = vld [vmem:[#allocation8 + $0x864] sm:$0xf0]  ;;  %v8875_v5 = vld [vmem:[#allocation8 + $0x820] sm:$0xf] }
 0x5ac   :  { %v10756_v54 = vpack.c.bf16 %v5256_v36, %v5254_v62  ;;  %5683 = vmatpush.bf16.msrb.mxu0 %v8732_v21  ;;  %v7896_v62 = vor.u32 %v9351_v7, %v7893_v47  ;;  %v8061_v21 = vld [vmem:[#allocation8 + $0x1d8] sm:$0xf0]  ;;  %v8900_v36 = vor.u32 %v9606_v28, %v8899_v56  ;;  %v9339_v47 = vld [vmem:[#allocation8 + $0x14] sm:$0xf]  ;;  %v8635_v45 = vld [vmem:[#allocation8 + $0x640] sm:$0xf] }
 0x5ad   :  { %5580 = vmatmul.bf16.gmra.mxu2 %v10666_v55  ;;  %5599 = vmatmul.bf16.gmra.mxu3 %v10668_v15  ;;  %v8064_v7 = vor.u32 %v9393_v35, %v8061_v21  ;;  %v9573_v9 = vld [vmem:[#allocation8 + $0x764] sm:$0xf]  ;;  %v8781_v35 = vld [vmem:[#allocation8 + $0x778] sm:$0xf0] }
 0x5ae   :  { %11035 = vst [vmem:[#allocation31_spill] sm:$0xff] %v10756_v54  ;;  %5702 = vmatpush.bf16.msrb.mxu1 %v8924_v17  ;;  %v9546_v17 = vld [vmem:[#allocation8 + $0x684] sm:$0xf0]  ;;  %v9621_v21 = vld [vmem:[#allocation8 + $0x8e4] sm:$0xf] }
 0x5af   :  { %v5239_v10 = vpop.f32.mrf.mxu0  ;;  %v5258_v23 = vpop.f32.mrf.mxu1  ;;  %5723 = vmatpush.bf16.msrb.mxu2 %v7920_v43  ;;  %5742 = vmatpush.bf16.msrb.mxu3 %v8112_v20  ;;  %v9600_v43 = vld [vmem:[#allocation8 + $0x834] sm:$0xf0]  ;;  %v8660_v19 = vor.u32 %v9546_v17, %v8659_v58 }
 0x5b0   :  { %v5240_v49 = vadd.f32 %v5239_v10, %v10732_v8  ;;  %v10763_v18 = vpop.f32.mrf.mxu2  ;;  %v10765_v12 = vpop.f32.mrf.mxu3  ;;  %5684 = vmatpush.bf16.msrb.mxu0 %v8708_v50  ;;  %v7872_v8 = vor.u32 %v9345_v25, %v7869_v11  ;;  %v8037_v50 = vld [vmem:[#allocation8 + $0x1a8] sm:$0xf0]  ;;  %v8876_v28 = vor.u32 %v9600_v43, %v8875_v5  ;;  %v9540_v10 = vld [vmem:[#allocation8 + $0x654] sm:$0xf0]  ;;  %v7848_v25 = vor.u32 %v9339_v47, %v7845_v32  ;;  %v8611_v43 = vld [vmem:[#allocation8 + $0x610] sm:$0xf] }
 0x5b1   :  { %v10769_v56 = vpop.permute.xlu1 %5903  ;;  %v10771_v54 = vpop.permute.xlu0 %5901  ;;  %v8040_v11 = vor.u32 %v9387_v51, %v8037_v50  ;;  %v8636_v17 = vor.u32 %v9540_v10, %v8635_v45  ;;  %v8784_v47 = vor.u32 %v9573_v9, %v8781_v35  ;;  %v9567_v51 = vld [vmem:[#allocation8 + $0x734] sm:$0xf]  ;;  %v8757_v50 = vld [vmem:[#allocation8 + $0x748] sm:$0xf0]  ;;  %v9477_v45 = vld [vmem:[#allocation8 + $0x464] sm:$0xf] }
 0x5b2   :  { %v5259_v20 = vadd.f32 %v5258_v23, %v5240_v49  ;;  %5542 = vmatmul.bf16.gmra.mxu0 %v10610_v0  ;;  %5561 = vmatmul.bf16.gmra.mxu1 %v10612_v48  ;;  %v8851_v23 = vld [vmem:[#allocation8 + $0x7f0] sm:$0xf]  ;;  %v9594_v49 = vld [vmem:[#allocation8 + $0x804] sm:$0xf0]  ;;  %v8397_v10 = vld [vmem:[#allocation8 + $0x478] sm:$0xf0]  ;;  %v8760_v35 = vor.u32 %v9567_v51, %v8757_v50 }
 0x5b3   :  { %5724 = vmatpush.bf16.msrb.mxu2 %v7896_v62  ;;  %5743 = vmatpush.bf16.msrb.mxu3 %v8088_v37  ;;  %v8852_v16 = vor.u32 %v9594_v49, %v8851_v23  ;;  %v8803_v9 = vld [vmem:[#allocation8 + $0x790] sm:$0xf]  ;;  %v9582_v23 = vld [vmem:[#allocation8 + $0x7a4] sm:$0xf0]  ;;  %v9519_v51 = vld [vmem:[#allocation8 + $0x5b4] sm:$0xf] }
 0x5b4   :  { %5685 = vmatpush.bf16.msrb.mxu0 %v8684_v61  ;;  %5703 = vmatpush.bf16.msrb.mxu1 %v8900_v36  ;;  %v8973_v61 = vld [vmem:[#allocation8 + $0x8f8] sm:$0xf0]  ;;  %v8565_v50 = vld [vmem:[#allocation8 + $0x5c8] sm:$0xf0] }
 0x5b5   :  { %v8976_v32 = vor.u32 %v9621_v21, %v8973_v61  ;;  %v9561_v21 = vld [vmem:[#allocation8 + $0x704] sm:$0xf]  ;;  %v8733_v61 = vld [vmem:[#allocation8 + $0x718] sm:$0xf0] }
 0x5b7   :  { %v5241_v62 = vpop.f32.mrf.mxu0  ;;  %v5260_v37 = vpop.f32.mrf.mxu1  ;;  %5725 = vmatpush.bf16.msrb.mxu2 %v7872_v8  ;;  %5744 = vmatpush.bf16.msrb.mxu3 %v8064_v7  ;;  %v9588_v8 = vld [vmem:[#allocation8 + $0x7d4] sm:$0xf0] }
 0x5b8   :  { %v5242_v58 = vadd.f32 %v5241_v62, %v10738_v46  ;;  %v10774_v36 = vpop.f32.mrf.mxu2  ;;  %v10776_v5 = vpop.f32.mrf.mxu3  ;;  %5686 = vmatpush.bf16.msrb.mxu0 %v8660_v19  ;;  %5704 = vmatpush.bf16.msrb.mxu1 %v8876_v28  ;;  %v9615_v62 = vld [vmem:[#allocation8 + $0x8b4] sm:$0xf]  ;;  %v8612_v19 = vor.u32 %v9534_v24, %v8611_v43  ;;  %v8828_v28 = vor.u32 %v9588_v8, %v8827_v1 }
 0x5b9   :  { %v10782_v49 = vpop.permute.xlu1 %5939  ;;  %v8952_v24 = vor.u32 %v9615_v62, %v8949_v57  ;;  %v8400_v43 = vor.u32 %v9477_v45, %v8397_v10  ;;  %v8804_v8 = vor.u32 %v9582_v23, %v8803_v9  ;;  %v10789_v57 = vpop.permute.xlu0 %5883  ;;  %v8736_v62 = vor.u32 %v9561_v21, %v8733_v61  ;;  %v9555_v45 = vld [vmem:[#allocation8 + $0x6d4] sm:$0xf]  ;;  %v8901_v9 = vld [vmem:[#allocation8 + $0x868] sm:$0xf0]  ;;  %v9549_v21 = vld [vmem:[#allocation8 + $0x6a4] sm:$0xf] }
 0x5ba   :  { %v5261_v7 = vadd.f32 %v5260_v37, %v5242_v58  ;;  %11038 = vst [vmem:[#allocation34_spill] sm:$0xff] %v10782_v49  ;;  %v8589_v37 = vld [vmem:[#allocation8 + $0x5f8] sm:$0xf0]  ;;  %v9609_v58 = vld [vmem:[#allocation8 + $0x884] sm:$0xf] }
 0x5bb   :  { %5726 = vmatpush.bf16.msrb.mxu2 %v7848_v25  ;;  %5745 = vmatpush.bf16.msrb.mxu3 %v8040_v11  ;;  %v9603_v10 = vld [vmem:[#allocation8 + $0x854] sm:$0xf]  ;;  %v9513_v61 = vld [vmem:[#allocation8 + $0x584] sm:$0xf] }
 0x5bc   :  { %v10778_v46 = vpack.c.bf16 %v5261_v7, %v5259_v20  ;;  %5687 = vmatpush.bf16.msrb.mxu0 %v8636_v17  ;;  %5705 = vmatpush.bf16.msrb.mxu1 %v8852_v16  ;;  %v9525_v20 = vld [vmem:[#allocation8 + $0x5e4] sm:$0xf]  ;;  %v8925_v17 = vld [vmem:[#allocation8 + $0x898] sm:$0xf0]  ;;  %v9471_v7 = vld [vmem:[#allocation8 + $0x434] sm:$0xf] }
 0x5bd   :  { %5651 = vmatmul.bf16.vlgmr.msra.gmra.mxu2 %v10578_v31  ;;  %5670 = vmatmul.bf16.vlgmr.msra.gmra.mxu3 %v10580_v42 }
 0x5be   :  { %11037 = vst [vmem:[#allocation33_spill] sm:$0xff] %v10778_v46 }
 0x5bf   :  { %5795 = vmatpush.bf16.msra.mxu2 %v8784_v47  ;;  %5814 = vmatpush.bf16.msra.mxu3 %v8976_v32  ;;  %v5310_v25 = vpop.f32.mrf.mxu0  ;;  %v5329_v11 = vpop.f32.mrf.mxu1  ;;  %v8373_v47 = vld [vmem:[#allocation8 + $0x448] sm:$0xf0]  ;;  %v8592_v32 = vor.u32 %v9525_v20, %v8589_v37  ;;  %v8349_v20 = vld [vmem:[#allocation8 + $0x418] sm:$0xf0]  ;;  %v8568_v37 = vor.u32 %v9519_v51, %v8565_v50  ;;  %v9459_v51 = vld [vmem:[#allocation8 + $0x3d4] sm:$0xf] }
 0x5c0   :  { %v5348_v16 = vpop.f32.mrf.mxu2  ;;  %v10784_v1 = vpop.f32.mrf.mxu3  ;;  %5688 = vmatpush.bf16.msrb.mxu0 %v8612_v19  ;;  %5706 = vmatpush.bf16.msrb.mxu1 %v8828_v28  ;;  %v5311_v49 = vadd.f32 %v5310_v25, %v10745_v40  ;;  %v8928_v19 = vor.u32 %v9609_v58, %v8925_v17  ;;  %v8709_v28 = vld [vmem:[#allocation8 + $0x6e8] sm:$0xf0]  ;;  %v8376_v23 = vor.u32 %v9471_v7, %v8373_v47  ;;  %v9465_v40 = vld [vmem:[#allocation8 + $0x404] sm:$0xf]  ;;  %v8541_v58 = vld [vmem:[#allocation8 + $0x598] sm:$0xf0] }
 0x5c1   :  { %v9597_v7 = vld [vmem:[#allocation8 + $0x824] sm:$0xf]  ;;  %v8877_v47 = vld [vmem:[#allocation8 + $0x838] sm:$0xf0] }
 0x5c2   :  { %5613 = vmatmul.bf16.vlgmr.msra.gmra.mxu0 %v10590_v34  ;;  %5632 = vmatmul.bf16.vlgmr.msra.gmra.mxu1 %v10592_v14  ;;  %v5330_v25 = vadd.f32 %v5329_v11, %v5311_v49  ;;  %v8325_v49 = vld [vmem:[#allocation8 + $0x3e8] sm:$0xf0] }
 0x5c3   :  { %5796 = vmatpush.bf16.msra.mxu2 %v8760_v35  ;;  %5815 = vmatpush.bf16.msra.mxu3 %v8952_v24  ;;  %v8712_v35 = vor.u32 %v9555_v45, %v8709_v28  ;;  %v8904_v24 = vor.u32 %v9603_v10, %v8901_v9  ;;  %v8880_v28 = vor.u32 %v9597_v7, %v8877_v47  ;;  %v9591_v9 = vld [vmem:[#allocation8 + $0x7f4] sm:$0xf] }
 0x5c4   :  { %5757 = vmatpush.bf16.msra.mxu0 %v8400_v43  ;;  %5707 = vmatpush.bf16.msrb.mxu1 %v8804_v8  ;;  %v8685_v8 = vld [vmem:[#allocation8 + $0x6b8] sm:$0xf0]  ;;  %v5349_v11 = vadd.f32 %v5348_v16, %v5330_v25  ;;  %v8328_v22 = vor.u32 %v9459_v51, %v8325_v49  ;;  %v9453_v16 = vld [vmem:[#allocation8 + $0x3a4] sm:$0xf]  ;;  %v8517_v25 = vld [vmem:[#allocation8 + $0x568] sm:$0xf0] }
 0x5c5   :  { %v8688_v45 = vor.u32 %v9549_v21, %v8685_v8  ;;  %v8637_v8 = vld [vmem:[#allocation8 + $0x658] sm:$0xf0]  ;;  %v9447_v49 = vld [vmem:[#allocation8 + $0x374] sm:$0xf] }
 0x5c7   :  { %v5312_v42 = vpop.f32.mrf.mxu0  ;;  %v5331_v31 = vpop.f32.mrf.mxu1  ;;  %5797 = vmatpush.bf16.msra.mxu2 %v8736_v62  ;;  %5816 = vmatpush.bf16.msra.mxu3 %v8928_v19  ;;  %v8544_v19 = vor.u32 %v9513_v61, %v8541_v58 }
 0x5c8   :  { %5776 = vmatpush.bf16.msra.mxu1 %v8592_v32  ;;  %v5313_v17 = vadd.f32 %v5312_v42, %v10752_v41  ;;  %v5350_v43 = vpop.f32.mrf.mxu2  ;;  %v5369_v46 = vpop.f32.mrf.mxu3  ;;  %5758 = vmatpush.bf16.msra.mxu0 %v8376_v23  ;;  %v8352_v32 = vor.u32 %v9465_v40, %v8349_v20  ;;  %v9543_v42 = vld [vmem:[#allocation8 + $0x674] sm:$0xf]  ;;  %v8661_v41 = vld [vmem:[#allocation8 + $0x688] sm:$0xf0] }
 0x5c9   :  { %v10792_v62 = vpop.permute.xlu1 %5921  ;;  %v8853_v23 = vld [vmem:[#allocation8 + $0x808] sm:$0xf0]  ;;  %v10794_v40 = vpop.permute.xlu2 %5885  ;;  %v8664_v58 = vor.u32 %v9543_v42, %v8661_v41  ;;  %v9531_v41 = vld [vmem:[#allocation8 + $0x614] sm:$0xf] }
 0x5ca   :  { %v5332_v50 = vadd.f32 %v5331_v31, %v5313_v17  ;;  %v10796_v20 = vpop.permute.xlu0 %5899  ;;  %v8301_v31 = vld [vmem:[#allocation8 + $0x3b8] sm:$0xf0]  ;;  %v8856_v17 = vor.u32 %v9591_v9, %v8853_v23  ;;  %v8805_v9 = vld [vmem:[#allocation8 + $0x7a8] sm:$0xf0] }
 0x5cb   :  { %5798 = vmatpush.bf16.msra.mxu2 %v8712_v35  ;;  %5817 = vmatpush.bf16.msra.mxu3 %v8904_v24  ;;  %v5368_v35 = vadd.f32 %v10784_v1, %v5349_v11  ;;  %v9585_v1 = vld [vmem:[#allocation8 + $0x7c4] sm:$0xf]  ;;  %v8304_v51 = vor.u32 %v9453_v16, %v8301_v31 }
 0x5cc   :  { %5777 = vmatpush.bf16.msra.mxu1 %v8568_v37  ;;  %v5351_v10 = vadd.f32 %v5350_v43, %v5332_v50  ;;  %5759 = vmatpush.bf16.msra.mxu0 %v8352_v32  ;;  %v9507_v37 = vld [vmem:[#allocation8 + $0x554] sm:$0xf]  ;;  %v9537_v43 = vld [vmem:[#allocation8 + $0x644] sm:$0xf]  ;;  %v8277_v50 = vld [vmem:[#allocation8 + $0x388] sm:$0xf0] }
 0x5cd   :  { %5656 = vmatmul.bf16.gmra.mxu2 %v10610_v0  ;;  %5675 = vmatmul.bf16.gmra.mxu3 %v10612_v48  ;;  %v8520_v11 = vor.u32 %v9507_v37, %v8517_v25  ;;  %v8280_v16 = vor.u32 %v9447_v49, %v8277_v50  ;;  %v9441_v31 = vld [vmem:[#allocation8 + $0x344] sm:$0xf]  ;;  %v8253_v25 = vld [vmem:[#allocation8 + $0x358] sm:$0xf0] }
 0x5ce   :  { %v5370_v24 = vadd.f32 %v5369_v46, %v5351_v10  ;;  %v8829_v46 = vld [vmem:[#allocation8 + $0x7d8] sm:$0xf0]  ;;  %v8613_v10 = vld [vmem:[#allocation8 + $0x628] sm:$0xf0]  ;;  %v8256_v49 = vor.u32 %v9441_v31, %v8253_v25 }
 0x5cf   :  { %v10801_v21 = vpop.f32.mrf.mxu0  ;;  %v10803_v61 = vpop.f32.mrf.mxu1  ;;  %5799 = vmatpush.bf16.msra.mxu2 %v8688_v45  ;;  %5818 = vmatpush.bf16.msra.mxu3 %v8880_v28  ;;  %v8493_v45 = vld [vmem:[#allocation8 + $0x538] sm:$0xf0]  ;;  %v8640_v28 = vor.u32 %v9537_v43, %v8637_v8  ;;  %v8832_v42 = vor.u32 %v9585_v1, %v8829_v46  ;;  %v8616_v8 = vor.u32 %v9531_v41, %v8613_v10  ;;  %v8421_v41 = vld [vmem:[#allocation8 + $0x4a8] sm:$0xf0] }
 0x5d0   :  { %5778 = vmatpush.bf16.msra.mxu1 %v8544_v19  ;;  %v10805_v7 = vpack.c.bf16 %v5370_v24, %v5368_v35  ;;  %v10807_v47 = vpop.f32.mrf.mxu2  ;;  %v10809_v32 = vpop.f32.mrf.mxu3  ;;  %5760 = vmatpush.bf16.msra.mxu0 %v8328_v22  ;;  %v9501_v19 = vld [vmem:[#allocation8 + $0x524] sm:$0xf]  ;;  %v9579_v22 = vld [vmem:[#allocation8 + $0x794] sm:$0xf]  ;;  %v8469_v24 = vld [vmem:[#allocation8 + $0x508] sm:$0xf0] }
 0x5d1   :  { %v10813_v23 = vpop.permute.xlu1 %5937  ;;  %v8496_v37 = vor.u32 %v9501_v19, %v8493_v45  ;;  %v9495_v35 = vld [vmem:[#allocation8 + $0x4f4] sm:$0xf]  ;;  %v10815_v48 = vpop.permute.xlu2 %5919  ;;  %v8808_v1 = vor.u32 %v9579_v22, %v8805_v9  ;;  %v8229_v19 = vld [vmem:[#allocation8 + $0x328] sm:$0xf0]  ;;  %v9489_v45 = vld [vmem:[#allocation8 + $0x4c4] sm:$0xf] }
 0x5d2   :  { %5618 = vmatmul.bf16.gmra.mxu0 %v10622_v4  ;;  %5637 = vmatmul.bf16.gmra.mxu1 %v10624_v38  ;;  %v8472_v50 = vor.u32 %v9495_v35, %v8469_v24  ;;  %v8445_v0 = vld [vmem:[#allocation8 + $0x4d8] sm:$0xf0]  ;;  %v11040_v35 = vld [vmem:[#allocation24_spill] sm:$0xff]  ;;  %v11041_v24 = vld [vmem:[#allocation25_spill] sm:$0xff] }
 0x5d3   :  { %5800 = vmatpush.bf16.msra.mxu2 %v8664_v58  ;;  %5819 = vmatpush.bf16.msra.mxu3 %v8856_v17  ;;  %v10817_v58 = vpop.permute.xlu0 %5935 }
 0x5d4   :  { %5761 = vmatpush.bf16.msra.mxu0 %v8304_v51  ;;  %5779 = vmatpush.bf16.msra.mxu1 %v8520_v11  ;;  %11039 = vst [vmem:[#allocation35_spill] sm:$0xff] %v10817_v58  ;;  %v9435_v11 = vld [vmem:[#allocation8 + $0x314] sm:$0xf] }
 0x5d5   :  { %v8232_v58 = vor.u32 %v9435_v11, %v8229_v19  ;;  %v11050_v11 = vld [vmem:[#allocation32_spill] sm:$0xff]  ;;  %v11052_v19 = vld [vmem:[#allocation34_spill] sm:$0xff] }
 0x5d7   :  { %v5317_v17 = vpop.f32.mrf.mxu0  ;;  %v10819_v43 = vpop.f32.mrf.mxu1  ;;  %5801 = vmatpush.bf16.msra.mxu2 %v8640_v28  ;;  %5820 = vmatpush.bf16.msra.mxu3 %v8832_v42  ;;  %v8448_v28 = vor.u32 %v9489_v45, %v8445_v0  ;;  %v9483_v42 = vld [vmem:[#allocation8 + $0x494] sm:$0xf] }
 0x5d8   :  { %v10821_v46 = vpop.f32.mrf.mxu2  ;;  %v10823_v51 = vpop.f32.mrf.mxu3  ;;  %5762 = vmatpush.bf16.msra.mxu0 %v8280_v16  ;;  %5780 = vmatpush.bf16.msra.mxu1 %v8496_v37 }
 0x5d9   :  { %v5882_v10 = vpop.permute.xlu1 %5881 }
 0x5db   :  { %5802 = vmatpush.bf16.msra.mxu2 %v8616_v8  ;;  %5821 = vmatpush.bf16.msra.mxu3 %v8808_v1  ;;  %v5880_v0 = vpop.permute.xlu0 %5879 }
 0x5dc   :  { %5763 = vmatpush.bf16.msra.mxu0 %v8256_v49  ;;  %5781 = vmatpush.bf16.msra.mxu1 %v8472_v50  ;;  %v11047_v49 = vld [vmem:[#allocation31_spill] sm:$0xff]  ;;  %v11051_v50 = vld [vmem:[#allocation30_spill] sm:$0xff] }
 0x5dd   :  { %5727 = vmatmul.bf16.vlgmr.msrb.gmra.mxu2 %v10590_v34  ;;  %5746 = vmatmul.bf16.vlgmr.msrb.gmra.mxu3 %v10592_v14  ;;  %v8424_v34 = vor.u32 %v9483_v42, %v8421_v41  ;;  %v5898_v14 = vpop.permute.xlu2 %5897 }
 0x5df   :  { %6027 = vmatpush.bf16.msrb.mxu2 %v10710_v63  ;;  %6046 = vmatpush.bf16.msrb.mxu3 %v10718_v2  ;;  %v10829_v22 = vpop.f32.mrf.mxu0  ;;  %v10831_v9 = vpop.f32.mrf.mxu1 }
 0x5e0   :  { %v10833_v16 = vpop.f32.mrf.mxu2  ;;  %v10835_v31 = vpop.f32.mrf.mxu3  ;;  %5764 = vmatpush.bf16.msra.mxu0 %v8232_v58  ;;  %5782 = vmatpush.bf16.msra.mxu1 %v8448_v28  ;;  %v11043_v58 = vld [vmem:[#allocation26_spill] sm:$0xff] }
 0x5e2   :  { %5689 = vmatmul.bf16.vlgmr.msrb.gmra.mxu0 %v10654_v44  ;;  %5708 = vmatmul.bf16.vlgmr.msrb.gmra.mxu1 %v10656_v60 }
 0x5e3   :  { %6028 = vmatpush.bf16.msrb.mxu2 %v10726_v59  ;;  %6047 = vmatpush.bf16.msrb.mxu3 %v10736_v6  ;;  %v5297_v59 = vadd.f32 %v10765_v12, %v10763_v18 }
 0x5e4   :  { %5989 = vmatpush.bf16.msrb.mxu0 %v10676_v52  ;;  %5783 = vmatpush.bf16.msra.mxu1 %v8424_v34  ;;  %v5299_v52 = vadd.f32 %v10776_v5, %v10774_v36 }
 0x5e6   :  { %v5318_v6 = vadd.f32 %v5317_v17, %v5299_v52  ;;  %v11044_v17 = vld [vmem:[#allocation33_spill] sm:$0xff]  ;;  %v11053_v52 = vld [vmem:[#allocation35_spill] sm:$0xff] }
 0x5e7   :  { %v10843_v63 = vpop.f32.mrf.mxu0  ;;  %v10845_v2 = vpop.f32.mrf.mxu1  ;;  %6029 = vmatpush.bf16.msrb.mxu2 %v10749_v33  ;;  %6048 = vmatpush.bf16.msrb.mxu3 %v10769_v56 }
 0x5e8   :  { %6008 = vmatpush.bf16.msrb.mxu1 %v10684_v53  ;;  %v10849_v37 = vpop.f32.mrf.mxu2  ;;  %v10851_v25 = vpop.f32.mrf.mxu3  ;;  %5990 = vmatpush.bf16.msrb.mxu0 %v10680_v29 }
 0x5e9   :  { %v10857_v53 = vpop.permute.xlu1 %5917  ;;  %v10864_v33 = vpop.permute.xlu2 %5933 }
 0x5ea   :  { %v10866_v29 = vpop.permute.xlu0 %5915 }
 0x5eb   :  { %6030 = vmatpush.bf16.msrb.mxu2 %v10794_v40  ;;  %6049 = vmatpush.bf16.msrb.mxu3 %v10771_v54 }
 0x5ec   :  { %6009 = vmatpush.bf16.msrb.mxu1 %v10690_v39  ;;  %5991 = vmatpush.bf16.msrb.mxu0 %v10686_v26  ;;  %v5316_v39 = vadd.f32 %v10801_v21, %v5297_v59  ;;  %v5337_v26 = vadd.f32 %v10819_v43, %v5318_v6 }
 0x5ed   :  { %5732 = vmatmul.bf16.gmra.mxu2 %v10622_v4  ;;  %5751 = vmatmul.bf16.gmra.mxu3 %v10624_v38 }
 0x5ee   :  { %v5335_v4 = vadd.f32 %v10803_v61, %v5316_v39  ;;  %v5356_v38 = vadd.f32 %v10821_v46, %v5337_v26  ;;  %v11045_v46 = vld [vmem:[#allocation29_spill] sm:$0xff] }
 0x5ef   :  { %v10872_v56 = vpop.f32.mrf.mxu0  ;;  %v10874_v54 = vpop.f32.mrf.mxu1  ;;  %6031 = vmatpush.bf16.msrb.mxu2 %v10789_v57  ;;  %6050 = vmatpush.bf16.msrb.mxu3 %v10796_v20 }
 0x5f0   :  { %6010 = vmatpush.bf16.msrb.mxu1 %v10696_v13  ;;  %v10879_v18 = vpop.f32.mrf.mxu2  ;;  %v10881_v12 = vpop.f32.mrf.mxu3  ;;  %5992 = vmatpush.bf16.msrb.mxu0 %v10694_v27  ;;  %v5354_v36 = vadd.f32 %v10807_v47, %v5335_v4  ;;  %v5375_v20 = vadd.f32 %v10823_v51, %v5356_v38  ;;  %v11042_v47 = vld [vmem:[#allocation27_spill] sm:$0xff]  ;;  %v11046_v51 = vld [vmem:[#allocation28_spill] sm:$0xff] }
 0x5f1   :  { %v5896_v13 = vpop.permute.xlu1 %5895  ;;  %v5878_v5 = vpop.permute.xlu2 %5877 }
 0x5f2   :  { %5694 = vmatmul.bf16.gmra.mxu0 %v10666_v55  ;;  %5713 = vmatmul.bf16.gmra.mxu1 %v10668_v15  ;;  %v5894_v57 = vpop.permute.xlu0 %5893 }
 0x5f3   :  { %6032 = vmatpush.bf16.msrb.mxu2 %v5882_v10  ;;  %6051 = vmatpush.bf16.msrb.mxu3 %v5898_v14  ;;  %v5408_v10 = vadd.f32 %v10845_v2, %v10843_v63  ;;  %v5406_v14 = vadd.f32 %v10831_v9, %v10829_v22  ;;  %v11054_v9 = vld [vmem:[#allocation22_spill] sm:$0xff] }
 0x5f4   :  { %5993 = vmatpush.bf16.msrb.mxu0 %v10698_v30  ;;  %6011 = vmatpush.bf16.msrb.mxu1 %v10702_v3  ;;  %v5373_v30 = vadd.f32 %v10809_v32, %v5354_v36 }
 0x5f6   :  { %v10897_v3 = vpack.c.bf16 %v5375_v20, %v5373_v30 }
 0x5f7   :  { %v5393_v27 = vpop.f32.mrf.mxu0  ;;  %v5412_v40 = vpop.f32.mrf.mxu1  ;;  %6033 = vmatpush.bf16.msrb.mxu2 %v5880_v0  ;;  %6052 = vmatpush.bf16.msrb.mxu3 %v5896_v13  ;;  %v5427_v0 = vadd.f32 %v10849_v37, %v5408_v10 }
 0x5f8   :  { %v5431_v21 = vpop.f32.mrf.mxu2  ;;  %v10892_v61 = vpop.f32.mrf.mxu3  ;;  %5994 = vmatpush.bf16.msrb.mxu0 %v11040_v35  ;;  %6012 = vmatpush.bf16.msrb.mxu1 %v11041_v24  ;;  %v5413_v2 = vadd.f32 %v5412_v40, %v5393_v27 }
 0x5f9   :  { %v5932_v34 = vpop.permute.xlu1 %5931 }
 0x5fa   :  { %v5432_v39 = vadd.f32 %v5431_v21, %v5413_v2  ;;  %v5912_v36 = vpop.permute.xlu0 %5911 }
 0x5fb   :  { %6034 = vmatpush.bf16.msrb.mxu2 %v5878_v5  ;;  %6053 = vmatpush.bf16.msrb.mxu3 %v5894_v57 }
 0x5fc   :  { %5995 = vmatpush.bf16.msrb.mxu0 %v11042_v47  ;;  %6013 = vmatpush.bf16.msrb.mxu1 %v11043_v58 }
 0x5fd   :  { %5803 = vmatmul.bf16.vlgmr.msra.gmra.mxu2 %v10654_v44  ;;  %5822 = vmatmul.bf16.vlgmr.msra.gmra.mxu3 %v10656_v60  ;;  %v11048_v44 = vld [vmem:[#allocation20_spill] sm:$0xff]  ;;  %v11049_v60 = vld [vmem:[#allocation21_spill] sm:$0xff] }
 0x5ff   :  { %6268 = vmatpush.bf16.msra.mxu2 %v11044_v17  ;;  %6287 = vmatpush.bf16.msra.mxu3 %v10897_v3  ;;  %v5462_v43 = vpop.f32.mrf.mxu0  ;;  %v5481_v8 = vpop.f32.mrf.mxu1 }
 0x600   :  { %v10905_v1 = vpop.f32.mrf.mxu2  ;;  %v10907_v32 = vpop.f32.mrf.mxu3  ;;  %5996 = vmatpush.bf16.msrb.mxu0 %v11045_v46  ;;  %6014 = vmatpush.bf16.msrb.mxu1 %v11046_v51 }
 0x601   :  { %v5930_v37 = vpop.permute.xlu1 %5929 }
 0x602   :  { %5765 = vmatmul.bf16.vlgmr.msra.gmra.mxu0 %v11048_v44  ;;  %5784 = vmatmul.bf16.vlgmr.msra.gmra.mxu1 %v11049_v60 }
 0x603   :  { %6269 = vmatpush.bf16.msra.mxu2 %v11047_v49  ;;  %6288 = vmatpush.bf16.msra.mxu3 %v10805_v7 }
 0x604   :  { %6065 = vmatpush.bf16.msra.mxu0 %v11050_v11  ;;  %6015 = vmatpush.bf16.msrb.mxu1 %v11051_v50 }
 0x607   :  { %v5464_v45 = vpop.f32.mrf.mxu0  ;;  %v5483_v28 = vpop.f32.mrf.mxu1 }
 0x608   :  { %6084 = vmatpush.bf16.msra.mxu1 %v11052_v19  ;;  %v10918_v42 = vpop.f32.mrf.mxu2  ;;  %v10920_v41 = vpop.f32.mrf.mxu3  ;;  %6066 = vmatpush.bf16.msra.mxu0 %v10792_v62  ;;  %v5425_v62 = vadd.f32 %v10833_v16, %v5406_v14  ;;  %v11055_v16 = vld [vmem:[#allocation23_spill] sm:$0xff] }
 0x60c   :  { %6085 = vmatpush.bf16.msra.mxu1 %v10813_v23  ;;  %6067 = vmatpush.bf16.msra.mxu0 %v10815_v48  ;;  %v5446_v48 = vadd.f32 %v10851_v25, %v5427_v0 }
 0x60d   :  { %5808 = vmatmul.bf16.gmra.mxu2 %v10666_v55  ;;  %5827 = vmatmul.bf16.gmra.mxu3 %v10668_v15  ;;  %v5411_v55 = vadd.f32 %v10874_v54, %v10872_v56  ;;  %v5444_v15 = vadd.f32 %v10835_v31, %v5425_v62 }
 0x60e   :  { %v5465_v22 = vadd.f32 %v5464_v45, %v5446_v48 }
 0x60f   :  { %v5467_v59 = vpop.f32.mrf.mxu0  ;;  %v5486_v63 = vpop.f32.mrf.mxu1  ;;  %v5463_v26 = vadd.f32 %v5462_v43, %v5444_v15  ;;  %v5430_v25 = vadd.f32 %v10879_v18, %v5411_v55 }
 0x610   :  { %6086 = vmatpush.bf16.msra.mxu1 %v11053_v52  ;;  %v10934_v6 = vpop.f32.mrf.mxu2  ;;  %v10936_v23 = vpop.f32.mrf.mxu3  ;;  %6068 = vmatpush.bf16.msra.mxu0 %v10857_v53  ;;  %v5484_v4 = vadd.f32 %v5483_v28, %v5465_v22 }
 0x611   :  { %v5914_v53 = vpop.permute.xlu2 %5913  ;;  %v5482_v13 = vadd.f32 %v5481_v8, %v5463_v26  ;;  %v5449_v5 = vadd.f32 %v10881_v12, %v5430_v25  ;;  %v5910_v18 = vpop.permute.xlu1 %5909  ;;  %v5522_v8 = vadd.f32 %v10920_v41, %v10918_v42  ;;  %v5525_v10 = vadd.f32 %v10936_v23, %v10934_v6 }
 0x612   :  { %5770 = vmatmul.bf16.gmra.mxu0 %v11054_v9  ;;  %5789 = vmatmul.bf16.gmra.mxu1 %v11055_v16  ;;  %v5926_v43 = vpop.permute.xlu0 %5925 }
 0x613   :  { %v5468_v27 = vadd.f32 %v5467_v59, %v5449_v5 }
 0x614   :  { %6087 = vmatpush.bf16.msra.mxu1 %v10864_v33  ;;  %6069 = vmatpush.bf16.msra.mxu0 %v10866_v29  ;;  %v5451_v33 = vadd.f32 %v10892_v61, %v5432_v39  ;;  %v5835_v29 = vpack.c.bf16 %v5484_v4, %v5482_v13  ;;  %v5520_v61 = vadd.f32 %v10907_v32, %v10905_v1 }
 0x615   :  { %v5487_v24 = vadd.f32 %v5486_v63, %v5468_v27 }
 0x617   :  { %v5469_v56 = vpop.f32.mrf.mxu0  ;;  %v5488_v54 = vpop.f32.mrf.mxu1 }
 0x618   :  { %6088 = vmatpush.bf16.msra.mxu1 %v5932_v34  ;;  %v5507_v31 = vpop.f32.mrf.mxu2  ;;  %v5526_v38 = vpop.f32.mrf.mxu3  ;;  %6070 = vmatpush.bf16.msra.mxu0 %v5914_v53  ;;  %v5470_v57 = vadd.f32 %v5469_v56, %v5451_v33 }
 0x619   :  { %v5928_v20 = vpop.permute.xlu2 %5927  ;;  %v5527_v0 = vadd.f32 %v5526_v38, %v5507_v31 }
 0x61a   :  { %v5489_v40 = vadd.f32 %v5488_v54, %v5470_v57 }
 0x61c   :  { %6089 = vmatpush.bf16.msra.mxu1 %v5930_v37  ;;  %6071 = vmatpush.bf16.msra.mxu0 %v5912_v36  ;;  %v5841_v12 = vpack.c.bf16 %v5489_v40, %v5487_v24 }
 0x61d   :  { %6035 = vmatmul.bf16.vlgmr.msrb.gmra.mxu2 %v5835_v29 }
 0x61f   :  { %v5538_v21 = vpop.f32.mrf.mxu0  ;;  %v5557_v35 = vpop.f32.mrf.mxu1 }
 0x620   :  { %6090 = vmatpush.bf16.msra.mxu1 %v5928_v20  ;;  %v5576_v30 = vpop.f32.mrf.mxu2  ;;  %v5595_v47 = vpop.f32.mrf.mxu3  ;;  %6072 = vmatpush.bf16.msra.mxu0 %v5910_v18  ;;  %v5539_v58 = vadd.f32 %v5538_v21, %v5520_v61 }
 0x622   :  { %5997 = vmatmul.bf16.vlgmr.msrb.gmra.mxu0 %v11047_v49  ;;  %6016 = vmatmul.bf16.vlgmr.msrb.gmra.mxu1 %v10805_v7  ;;  %v5558_v46 = vadd.f32 %v5557_v35, %v5539_v58 }
 0x624   :  { %6306 = vmatpush.bf16.msrb.mxu0 %v5841_v12  ;;  %6091 = vmatpush.bf16.msra.mxu1 %v5926_v43  ;;  %v5577_v11 = vadd.f32 %v5576_v30, %v5558_v46 }
 0x626   :  { %v5596_v45 = vadd.f32 %v5595_v47, %v5577_v11 }
 0x627   :  { %v5540_v51 = vpop.f32.mrf.mxu0  ;;  %v5559_v44 = vpop.f32.mrf.mxu1 }
 0x628   :  { %6307 = vmatpush.bf16.msrb.mxu0 %v5835_v29  ;;  %v5541_v1 = vadd.f32 %v5540_v51, %v5522_v8  ;;  %v5578_v32 = vpop.f32.mrf.mxu2  ;;  %v5597_v60 = vpop.f32.mrf.mxu3 }
 0x62a   :  { %v5560_v50 = vadd.f32 %v5559_v44, %v5541_v1 }
 0x62c   :  { %v5579_v19 = vadd.f32 %v5578_v32, %v5560_v50 }
 0x62d   :  { %6040 = vmatmul.bf16.gmra.mxu2 %v5841_v12 }
 0x62e   :  { %v5598_v49 = vadd.f32 %v5597_v60, %v5579_v19 }
 0x62f   :  { %v5543_v28 = vpop.f32.mrf.mxu0  ;;  %v5562_v7 = vpop.f32.mrf.mxu1 }
 0x630   :  { %v5836_v34 = vpack.c.bf16 %v5598_v49, %v5596_v45  ;;  %v5581_v42 = vpop.f32.mrf.mxu2  ;;  %v5600_v41 = vpop.f32.mrf.mxu3  ;;  %v5544_v14 = vadd.f32 %v5543_v28, %v5525_v10 }
 0x632   :  { %6054 = vmatmul.bf16.vlgmr.msrb.gmra.mxu3 %v5836_v34  ;;  %6002 = vmatmul.bf16.gmra.mxu0 %v11044_v17  ;;  %v5563_v52 = vadd.f32 %v5562_v7, %v5544_v14 }
 0x633   :  { %6021 = vmatmul.bf16.gmra.mxu1 %v10897_v3 }
 0x634   :  { %v5582_v55 = vadd.f32 %v5581_v42, %v5563_v52 }
 0x636   :  { %v5601_v6 = vadd.f32 %v5600_v41, %v5582_v55 }
 0x637   :  { %v5545_v62 = vpop.f32.mrf.mxu0  ;;  %v5564_v59 = vpop.f32.mrf.mxu1 }
 0x638   :  { %v5546_v63 = vadd.f32 %v5545_v62, %v5527_v0  ;;  %v5583_v2 = vpop.f32.mrf.mxu2  ;;  %v5602_v48 = vpop.f32.mrf.mxu3 }
 0x63a   :  { %v5565_v15 = vadd.f32 %v5564_v59, %v5546_v63 }
 0x63c   :  { %v5584_v22 = vadd.f32 %v5583_v2, %v5565_v15 }
 0x63e   :  { %v5603_v23 = vadd.f32 %v5602_v48, %v5584_v22 }
 0x63f   :  { %v5614_v9 = vpop.f32.mrf.mxu0  ;;  %v5633_v16 = vpop.f32.mrf.mxu1 }
 0x640   :  { %v5842_v37 = vpack.c.bf16 %v5603_v23, %v5601_v6  ;;  %v5652_v39 = vpop.f32.mrf.mxu2  ;;  %v5671_v26 = vpop.f32.mrf.mxu3  ;;  %v5634_v5 = vadd.f32 %v5633_v16, %v5614_v9 }
 0x642   :  { %6059 = vmatmul.bf16.gmra.mxu3 %v5842_v37  ;;  %6325 = vmatpush.bf16.msrb.mxu1 %v5842_v37  ;;  %v5653_v18 = vadd.f32 %v5652_v39, %v5634_v5 }
 0x644   :  { %v5672_v35 = vadd.f32 %v5671_v26, %v5653_v18 }
 0x646   :  { %6326 = vmatpush.bf16.msrb.mxu1 %v5836_v34 }
 0x647   :  { %v5616_v3 = vpop.f32.mrf.mxu0  ;;  %v5635_v17 = vpop.f32.mrf.mxu1 }
 0x648   :  { %v5654_v53 = vpop.f32.mrf.mxu2  ;;  %v5673_v25 = vpop.f32.mrf.mxu3  ;;  %v5636_v57 = vadd.f32 %v5635_v17, %v5616_v3 }
 0x64a   :  { %v5655_v21 = vadd.f32 %v5654_v53, %v5636_v57 }
 0x64c   :  { %v5674_v61 = vadd.f32 %v5673_v25, %v5655_v21 }
 0x64f   :  { %v5619_v4 = vpop.f32.mrf.mxu0  ;;  %v5638_v56 = vpop.f32.mrf.mxu1 }
 0x650   :  { %v5657_v54 = vpop.f32.mrf.mxu2  ;;  %v5676_v33 = vpop.f32.mrf.mxu3  ;;  %v5639_v51 = vadd.f32 %v5638_v56, %v5619_v4 }
 0x652   :  { %v5658_v11 = vadd.f32 %v5657_v54, %v5639_v51 }
 0x654   :  { %v5677_v49 = vadd.f32 %v5676_v33, %v5658_v11 }
 0x657   :  { %v5621_v31 = vpop.f32.mrf.mxu0  ;;  %v5640_v38 = vpop.f32.mrf.mxu1 }
 0x658   :  { %v5659_v13 = vpop.f32.mrf.mxu2  ;;  %v5678_v36 = vpop.f32.mrf.mxu3  ;;  %v5641_v1 = vadd.f32 %v5640_v38, %v5621_v31 }
 0x65a   :  { %v5660_v45 = vadd.f32 %v5659_v13, %v5641_v1 }
 0x65c   :  { %v5679_v28 = vadd.f32 %v5678_v36, %v5660_v45 }
 0x65f   :  { %v5690_v29 = vpop.f32.mrf.mxu0  ;;  %v5709_v27 = vpop.f32.mrf.mxu1 }
 0x660   :  { %v5728_v40 = vpop.f32.mrf.mxu2  ;;  %v5747_v20 = vpop.f32.mrf.mxu3  ;;  %v5691_v24 = vadd.f32 %v5690_v29, %v5672_v35 }
 0x661   :  { %v5748_v2 = vadd.f32 %v5747_v20, %v5728_v40 }
 0x662   :  { %v5710_v8 = vadd.f32 %v5709_v27, %v5691_v24 }
 0x667   :  { %v5692_v30 = vpop.f32.mrf.mxu0  ;;  %v5711_v47 = vpop.f32.mrf.mxu1 }
 0x668   :  { %v5693_v12 = vadd.f32 %v5692_v30, %v5674_v61  ;;  %v5730_v58 = vpop.f32.mrf.mxu2  ;;  %v5749_v43 = vpop.f32.mrf.mxu3 }
 0x669   :  { %v5750_v22 = vadd.f32 %v5749_v43, %v5730_v58 }
 0x66a   :  { %v5712_v46 = vadd.f32 %v5711_v47, %v5693_v12 }
 0x66c   :  { %v5837_v44 = vpack.c.bf16 %v5712_v46, %v5710_v8 }
 0x66e   :  { %6073 = vmatmul.bf16.vlgmr.msra.gmra.mxu0 %v5837_v44 }
 0x66f   :  { %v5695_v32 = vpop.f32.mrf.mxu0  ;;  %v5714_v60 = vpop.f32.mrf.mxu1 }
 0x670   :  { %v5733_v50 = vpop.f32.mrf.mxu2  ;;  %v5752_v19 = vpop.f32.mrf.mxu3  ;;  %v5696_v7 = vadd.f32 %v5695_v32, %v5677_v49 }
 0x671   :  { %v5753_v54 = vadd.f32 %v5752_v19, %v5733_v50 }
 0x672   :  { %v5715_v0 = vadd.f32 %v5714_v60, %v5696_v7 }
 0x677   :  { %v5697_v10 = vpop.f32.mrf.mxu0  ;;  %v5716_v34 = vpop.f32.mrf.mxu1 }
 0x678   :  { %v5698_v42 = vadd.f32 %v5697_v10, %v5679_v28  ;;  %v5735_v41 = vpop.f32.mrf.mxu2  ;;  %v5754_v14 = vpop.f32.mrf.mxu3 }
 0x679   :  { %v5755_v36 = vadd.f32 %v5754_v14, %v5735_v41 }
 0x67a   :  { %v5717_v52 = vadd.f32 %v5716_v34, %v5698_v42 }
 0x67c   :  { %v5843_v62 = vpack.c.bf16 %v5717_v52, %v5715_v0 }
 0x67e   :  { %6078 = vmatmul.bf16.gmra.mxu0 %v5843_v62  ;;  %6344 = vmatpush.bf16.msrb.mxu2 %v5843_v62 }
 0x67f   :  { %v5766_v59 = vpop.f32.mrf.mxu0  ;;  %v5785_v63 = vpop.f32.mrf.mxu1 }
 0x680   :  { %v5804_v48 = vpop.f32.mrf.mxu2  ;;  %v5823_v55 = vpop.f32.mrf.mxu3  ;;  %v5767_v15 = vadd.f32 %v5766_v59, %v5748_v2 }
 0x682   :  { %6345 = vmatpush.bf16.msrb.mxu2 %v5837_v44  ;;  %v5786_v6 = vadd.f32 %v5785_v63, %v5767_v15 }
 0x684   :  { %v5805_v26 = vadd.f32 %v5804_v48, %v5786_v6 }
 0x686   :  { %v5824_v53 = vadd.f32 %v5823_v55, %v5805_v26 }
 0x687   :  { %v5768_v23 = vpop.f32.mrf.mxu0  ;;  %v5787_v9 = vpop.f32.mrf.mxu1 }
 0x688   :  { %v5769_v16 = vadd.f32 %v5768_v23, %v5750_v22  ;;  %v5806_v37 = vpop.f32.mrf.mxu2  ;;  %v5825_v39 = vpop.f32.mrf.mxu3 }
 0x68a   :  { %v5788_v3 = vadd.f32 %v5787_v9, %v5769_v16 }
 0x68c   :  { %v5807_v17 = vadd.f32 %v5806_v37, %v5788_v3 }
 0x68e   :  { %v5826_v25 = vadd.f32 %v5825_v39, %v5807_v17 }
 0x68f   :  { %v5771_v4 = vpop.f32.mrf.mxu0  ;;  %v5790_v56 = vpop.f32.mrf.mxu1 }
 0x690   :  { %v5838_v33 = vpack.c.bf16 %v5826_v25, %v5824_v53  ;;  %v5809_v31 = vpop.f32.mrf.mxu2  ;;  %v5772_v38 = vadd.f32 %v5771_v4, %v5753_v54  ;;  %v5828_v13 = vpop.f32.mrf.mxu3 }
 0x692   :  { %6092 = vmatmul.bf16.vlgmr.msra.gmra.mxu1 %v5838_v33  ;;  %v5791_v5 = vadd.f32 %v5790_v56, %v5772_v38 }
 0x694   :  { %v5810_v18 = vadd.f32 %v5809_v31, %v5791_v5 }
 0x696   :  { %v5829_v61 = vadd.f32 %v5828_v13, %v5810_v18 }
 0x697   :  { %v5773_v57 = vpop.f32.mrf.mxu0  ;;  %v5792_v27 = vpop.f32.mrf.mxu1 }
 0x698   :  { %v5774_v29 = vadd.f32 %v5773_v57, %v5755_v36  ;;  %v5811_v20 = vpop.f32.mrf.mxu2  ;;  %v5830_v35 = vpop.f32.mrf.mxu3 }
 0x69a   :  { %v5793_v40 = vadd.f32 %v5792_v27, %v5774_v29 }
 0x69c   :  { %v5812_v21 = vadd.f32 %v5811_v20, %v5793_v40 }
 0x69e   :  { %v5831_v24 = vadd.f32 %v5830_v35, %v5812_v21 }
 0x69f   :  { %v5998_v47 = vpop.f32.mrf.mxu0  ;;  %v6017_v12 = vpop.f32.mrf.mxu1 }
 0x6a0   :  { %v5844_v30 = vpack.c.bf16 %v5831_v24, %v5829_v61  ;;  %v6036_v44 = vpop.f32.mrf.mxu2  ;;  %v6018_v60 = vadd.f32 %v6017_v12, %v5998_v47  ;;  %v11056_v47 = vld [vmem:[#allocation16_spill] sm:$0xff] }
 0x6a2   :  { %6097 = vmatmul.bf16.gmra.mxu1 %v5844_v30  ;;  %6363 = vmatpush.bf16.msrb.mxu3 %v5844_v30  ;;  %v6037_v50 = vadd.f32 %v6036_v44, %v6018_v60  ;;  %v11059_v60 = vld [vmem:[#allocation19_spill] sm:$0xff] }
 0x6a6   :  { %6364 = vmatpush.bf16.msrb.mxu3 %v5838_v33 }
 0x6a7   :  { %v6000_v58 = vpop.f32.mrf.mxu0  ;;  %v6019_v43 = vpop.f32.mrf.mxu1 }
 0x6a8   :  { %v6038_v19 = vpop.f32.mrf.mxu2  ;;  %v6020_v28 = vadd.f32 %v6019_v43, %v6000_v58  ;;  %v11057_v58 = vld [vmem:[#allocation17_spill] sm:$0xff] }
 0x6aa   :  { %v6039_v41 = vadd.f32 %v6038_v19, %v6020_v28 }
 0x6af   :  { %v6003_v8 = vpop.f32.mrf.mxu0 }
 0x6b0   :  { %v6022_v46 = vpop.f32.mrf.mxu1  ;;  %v6041_v52 = vpop.f32.mrf.mxu2 }
 0x6b1   :  { %v6023_v0 = vadd.f32 %v6022_v46, %v6003_v8 }
 0x6b3   :  { %v6042_v55 = vadd.f32 %v6041_v52, %v6023_v0 }
 0x6b5   :  { %v6055_v1 = vpop.f32.mrf.mxu3 }
 0x6b6   :  { %v6056_v45 = vadd.f32 %v6055_v1, %v6037_v50  ;;  %v11058_v1 = vld [vmem:[#allocation18_spill] sm:$0xff] }
 0x6b7   :  { %v6005_v51 = vpop.f32.mrf.mxu0 }
 0x6b8   :  { %v6024_v11 = vpop.f32.mrf.mxu1  ;;  %v6043_v16 = vpop.f32.mrf.mxu2 }
 0x6b9   :  { %v6025_v22 = vadd.f32 %v6024_v11, %v6005_v51 }
 0x6bb   :  { %v6044_v39 = vadd.f32 %v6043_v16, %v6025_v22 }
 0x6bd   :  { %v6057_v49 = vpop.f32.mrf.mxu3 }
 0x6be   :  { %v6058_v14 = vadd.f32 %v6057_v49, %v6039_v41 }
 0x6c5   :  { %v6060_v59 = vpop.f32.mrf.mxu3 }
 0x6c6   :  { %v6061_v15 = vadd.f32 %v6060_v59, %v6042_v55 }
 0x6cd   :  { %v6062_v37 = vpop.f32.mrf.mxu3 }
 0x6ce   :  { %v6063_v3 = vadd.f32 %v6062_v37, %v6044_v39 }
 0x6eb   :  { %v6074_v32 = vpop.f32.mrf.mxu0 }
 0x6ec   :  { %v6075_v7 = vadd.f32 %v6074_v32, %v6056_v45 }
 0x6f3   :  { %v6076_v10 = vpop.f32.mrf.mxu0 }
 0x6f4   :  { %v6077_v62 = vadd.f32 %v6076_v10, %v6058_v14 }
 0x6fb   :  { %v6079_v48 = vpop.f32.mrf.mxu0 }
 0x6fc   :  { %v6080_v6 = vadd.f32 %v6079_v48, %v6061_v15 }
 0x703   :  { %v6081_v26 = vpop.f32.mrf.mxu0 }
 0x704   :  { %v6082_v17 = vadd.f32 %v6081_v26, %v6063_v3 }
 0x70f   :  { %v6093_v34 = vpop.f32.mrf.mxu1 }
 0x710   :  { %v6094_v42 = vadd.f32 %v6093_v34, %v6075_v7 }
 0x712   :  { %6107 = vrot.lane.b32.xlu2 %v6094_v42, %s9879_s30 }
 0x717   :  { %v6095_v63 = vpop.f32.mrf.mxu1 }
 0x718   :  { %v6096_v2 = vadd.f32 %v6095_v63, %v6077_v62 }
 0x71a   :  { %6109 = vrot.lane.b32.xlu1 %v6096_v2, %s9879_s30 }
 0x71f   :  { %v6098_v23 = vpop.f32.mrf.mxu1 }
 0x720   :  { %v6099_v9 = vadd.f32 %v6098_v23, %v6080_v6 }
 0x722   :  { %6111 = vrot.lane.b32.xlu0 %v6099_v9, %s9879_s30  ;;  %6152 = vperm.xlu1 %9652, %v6094_v42  }
 0x727   :  { %v6100_v53 = vpop.f32.mrf.mxu1 }
 0x728   :  { %v6101_v25 = vadd.f32 %v6100_v53, %v6082_v17 }
 0x72a   :  { %6156 = vperm.xlu0 %9651, %v6096_v2   ;;  %6164 = vperm.xlu1 %9652, %v6101_v25  }
 0x72b   :  { %6113 = vrot.lane.b32.xlu2 %v6101_v25, %s9879_s30  ;;  %s6404_s30 = sshll.u32 %s9881_s4, 4  ;;  %s6405_s30 = int_to_ptr.vmem [resolvable:$true] %s6404_s30 }
 0x733   :  { %6160 = vperm.xlu2 %9650, %v6099_v9  }
 0x76c   :  { %v6108_v4 = vpop.permute.xlu2 %6107 }
 0x76d   :  { %6119 = vxpose.xlu0.b32.start [1/4] (short) (narrow) %v6108_v4, 8 }
 0x785   :  { %v6114_v33 = vpop.permute.xlu2 %6113 }
 0x78c   :  { %v6110_v56 = vpop.permute.xlu1 %6109 }
 0x78d   :  { %6120 = vxpose.xlu0.b32.cont [2/4] (short) (narrow) %v6110_v56, 8  ;;  %v6161_v5 = vpop.permute.xlu2 %6160 }
 0x794   :  { %v6112_v54 = vpop.permute.xlu0 %6111  ;;  %v6153_v31 = vpop.permute.xlu1 %6152 }
 0x795   :  { %6121 = vxpose.xlu0.b32.cont [3/4] (short) (narrow) %v6112_v54, 8 }
 0x79c   :  { %v6157_v38 = vpop.permute.xlu0 %6156  ;;  %v6165_v57 = vpop.permute.xlu1 %6164 }
 0x79d   :  { %6122 = vxpose.xlu0.b32.end [4/4] (short) (narrow) %v6114_v33, 8 }
 0x829   :  { %v6135_v13 = vpop.trf.xlu0 }
 0x82a   :  { %v6167_v36 = vperm.slane %v6135_v13, 0 }
 0x82c   :  { %v6169_v29 = vadd.f32 %v6167_v36, %v6157_v38  ;;  %v6168_v27 = vadd.f32 %v6167_v36, %v6153_v31  ;;  %v6171_v18 = vadd.f32 %v6167_v36, %v6165_v57  ;;  %v6170_v40 = vadd.f32 %v6167_v36, %v6161_v5  ;;  %v9715_v5 = vld [vmem:[#allocation10] sm:$0xff] }
 0x82d   :  { %v6240_v57 = vperm.slane %v9715_v5, 5 }
 0x82e   :  { %vm6173_vm9 = vcmp.ge.f32.partialorder %v6169_v29, 0.0  ;;  %v6177_v20 = vmul.f32 0.2, %v6169_v29  ;;  %vm6172_vm10 = vcmp.ge.f32.partialorder %v6168_v27, 0.0  ;;  %v6176_v21 = vmul.f32 0.2, %v6168_v27 }
 0x82f   :  { %v6179_v24 = vmul.f32 0.2, %v6171_v18  ;;  %v6178_v30 = vmul.f32 0.2, %v6170_v40  ;;  %vm6175_vm11 = vcmp.ge.f32.partialorder %v6171_v18, 0.0  ;;  %vm6174_vm12 = vcmp.ge.f32.partialorder %v6170_v40, 0.0 }
 0x830   :  { %v6181_v35 = vsel %vm6173_vm9, %v6169_v29, %v6177_v20  ;;  %v6180_v61 = vsel %vm6172_vm10, %v6168_v27, %v6176_v21  ;;  %v6241_v29 = vperm.slane %v9715_v5, 7  ;;  %v6252_v27 = vperm.slane %v6240_v57, 1 }
 0x831   :  { %v6185_v12 = vsel %vm110_vm0, %v6181_v35, -1e+30  ;;  %v6184_v43 = vsel %vm109_vm1, %v6180_v61, -1e+30  ;;  %v6183_v51 = vsel %vm6175_vm11, %v6171_v18, %v6179_v24  ;;  %v6182_v44 = vsel %vm6174_vm12, %v6170_v40, %v6178_v30 }
 0x832   :  { %v6191_v8 = vsel %vm3194_vm4, %v6185_v12, -inf  ;;  %v6188_v46 = vsel %vm3194_vm4, %v6184_v43, -inf  ;;  %v6187_v32 = vsel %vm112_vm7, %v6183_v51, -1e+30  ;;  %v6186_v11 = vsel %vm111_vm8, %v6182_v44, -1e+30 }
 0x833   :  { %6192 = vmax.xlane.f32.xlu1 %v6191_v8  ;;  %6189 = vmax.xlane.f32.xlu2 %v6188_v46  ;;  %v6197_v50 = vsel %vm3194_vm4, %v6187_v32, -inf  ;;  %v6194_v19 = vsel %vm3194_vm4, %v6186_v11, -inf  ;;  %v6253_v18 = vperm.slane %v6241_v29, 1  ;;  %v6238_v40 = vperm.slane %v9715_v5, 1 }
 0x834   :  { %v6239_v20 = vperm.slane %v9715_v5, 3 }
 0x835   :  { %v6250_v30 = vperm.slane %v6238_v40, 1 }
 0x83b   :  { %6198 = vmax.xlane.f32.xlu1 %v6197_v50  ;;  %6195 = vmax.xlane.f32.xlu2 %v6194_v19 }
 0x8a6   :  { %v6193_v45 = vpop.xlane.xlu1 %6192  ;;  %v6190_v49 = vpop.xlane.xlu2 %6189 }
 0x8a7   :  { %v6201_v28 = vsub.f32 %v6185_v12, %v6193_v45  ;;  %v6200_v7 = vsub.f32 %v6184_v43, %v6190_v49 }
 0x8a9   :  { %v6206_v10 = vmul.f32 1.442695, %v6201_v28  ;;  %v6204_v34 = vmul.f32 1.442695, %v6200_v7 }
 0x8ab   :  { %9669 = vpow2.f32 %v6206_v10 }
 0x8ac   :  { %9671 = vpow2.f32 %v6204_v34 }
 0x8ae   :  { %v6199_v42 = vpop.xlane.xlu1 %6198  ;;  %v6196_v41 = vpop.xlane.xlu2 %6195 }
 0x8af   :  { %v6203_v14 = vsub.f32 %v6187_v32, %v6199_v42  ;;  %v6202_v0 = vsub.f32 %v6186_v11, %v6196_v41 }
 0x8b1   :  { %v9670_v52 = vpop.eup %9669  ;;  %v6210_v62 = vmul.f32 1.442695, %v6203_v14  ;;  %v6208_v59 = vmul.f32 1.442695, %v6202_v0 }
 0x8b2   :  { %v9672_v63 = vpop.eup %9671  ;;  %v6213_v2 = vmul.f32 %v9670_v52, %v11056_v47  ;;  %v6251_v47 = vperm.slane %v6239_v20, 1 }
 0x8b3   :  { %9673 = vpow2.f32 %v6210_v62  ;;  %v6212_v48 = vmul.f32 %v9672_v63, %v11057_v58 }
 0x8b4   :  { %9675 = vpow2.f32 %v6208_v59  ;;  %v6219_v55 = vsel %vm3194_vm4, %v6213_v2, 0.0 }
 0x8b5   :  { %6220 = vadd.xlane.f32.xlu1 %v6219_v55  ;;  %v6216_v15 = vsel %vm3194_vm4, %v6212_v48, 0.0 }
 0x8b6   :  { %6217 = vadd.xlane.f32.xlu2 %v6216_v15 }
 0x8b9   :  { %v9674_v22 = vpop.eup %9673 }
 0x8ba   :  { %v9676_v6 = vpop.eup %9675  ;;  %v6215_v23 = vmul.f32 %v9674_v22, %v11058_v1 }
 0x8bb   :  { %v6214_v9 = vmul.f32 %v9676_v6, %v11059_v60 }
 0x8bc   :  { %v6225_v16 = vsel %vm3194_vm4, %v6215_v23, 0.0 }
 0x8bd   :  { %v6222_v37 = vsel %vm3194_vm4, %v6214_v9, 0.0 }
 0x8be   :  { %6226 = vadd.xlane.f32.xlu2 %v6225_v16  ;;  %6223 = vadd.xlane.f32.xlu0 %v6222_v37 }
 0x928   :  { %v6221_v39 = vpop.xlane.xlu1 %6220 }
 0x929   :  { %9677 = vrcp.f32 %v6221_v39  ;;  %v6218_v26 = vpop.xlane.xlu2 %6217 }
 0x92a   :  { %9679 = vrcp.f32 %v6218_v26 }
 0x92f   :  { %v9678_v3 = vpop.eup %9677 }
 0x930   :  { %v9680_v17 = vpop.eup %9679  ;;  %v6233_v53 = vmul.f32 %v9678_v3, %v6213_v2 }
 0x931   :  { %v6232_v25 = vmul.f32 %v9680_v17, %v6212_v48  ;;  %v6224_v4 = vpop.xlane.xlu0 %6223  ;;  %v6227_v54 = vpop.xlane.xlu2 %6226  ;;  %v9716_v48 = vld [vmem:[#allocation10 + $0x8] sm:$0xf] }
 0x932   :  { %9681 = vrcp.f32 %v6224_v4  ;;  %v6242_v55 = vperm.slane %v9716_v48, 1  ;;  %v6243_v15 = vperm.slane %v9716_v48, 3 }
 0x933   :  { %v6236_v56 = vpack.c.bf16 %v6233_v53, %v6232_v25  ;;  %9683 = vrcp.f32 %v6227_v54 }
 0x934   :  { %v6254_v22 = vperm.slane %v6242_v55, 1  ;;  %v6255_v6 = vperm.slane %v6243_v15, 1 }
 0x935   :  { %8977 = vmatmul.msk.bf16.vlgmr.msra.gmra.mxu2 %vm3194_vm4, %v6236_v56  ;;  %8979 = vmatmul.msk.bf16.vlgmr.msra.gmra.mxu3 %vm3194_vm4, %v6236_v56 }
 0x936   :  { %8981 = vmatmul.msk.bf16.vlgmr.msrb.gmra.mxu0 %vm3194_vm4, %v6236_v56  ;;  %8983 = vmatmul.msk.bf16.vlgmr.msrb.gmra.mxu1 %vm3194_vm4, %v6236_v56 }
 0x938   :  { %v9682_v33 = vpop.eup %9681 }
 0x939   :  { %v9684_v31 = vpop.eup %9683  ;;  %v6234_v38 = vmul.f32 %v9682_v33, %v6214_v9 }
 0x93a   :  { %v6235_v13 = vmul.f32 %v9684_v31, %v6215_v23 }
 0x93c   :  { %v6237_v36 = vpack.c.bf16 %v6235_v13, %v6234_v38 }
 0x945   :  { %8978 = vmatmul.msk.bf16.gmra.mxu2 %vm3194_vm4, %v6237_v36  ;;  %8980 = vmatmul.msk.bf16.gmra.mxu3 %vm3194_vm4, %v6237_v36 }
 0x946   :  { %8982 = vmatmul.msk.bf16.gmra.mxu0 %vm3194_vm4, %v6237_v36  ;;  %8984 = vmatmul.msk.bf16.gmra.mxu1 %vm3194_vm4, %v6237_v36 }
 0x955   :  { %8985 = vmatmul.msk.bf16.vlgmr.msrb.gmra.mxu2 %vm3194_vm4, %v6236_v56  ;;  %8987 = vmatmul.msk.bf16.vlgmr.msrb.gmra.mxu3 %vm3194_vm4, %v6236_v56 }
 0x965   :  { %8986 = vmatmul.msk.bf16.gmra.mxu2 %vm3194_vm4, %v6237_v36  ;;  %8988 = vmatmul.msk.bf16.gmra.mxu3 %vm3194_vm4, %v6237_v36 }
 0x9b3   :  { %v6309_v21 = vpop.f32.mrf.mxu0  ;;  %v6328_v35 = vpop.f32.mrf.mxu1 }
 0x9b4   :  { %v6310_v61 = vadd.f32 %v6309_v21, %v6252_v27  ;;  %v6329_v24 = vadd.f32 %v6328_v35, %v6253_v18 }
 0x9b6   :  { %6378 = vst [vmem:[#allocation11 + $0x10] sm:$0xff] %v6310_v61 }
 0x9b7   :  { %6379 = vst [vmem:[#allocation11 + $0x18] sm:$0xff] %v6329_v24 }
 0x9b8   :  { %v6271_v12 = vpop.f32.mrf.mxu2  ;;  %v6290_v58 = vpop.f32.mrf.mxu3 }
 0x9b9   :  { %v6272_v43 = vadd.f32 %v6271_v12, %v6250_v30  ;;  %v6291_v8 = vadd.f32 %v6290_v58, %v6251_v47 }
 0x9bb   :  { %6376 = vst [vmem:[#allocation11] sm:$0xff] %v6272_v43  ;;  %v6311_v46 = vpop.f32.mrf.mxu0  ;;  %v6330_v51 = vpop.f32.mrf.mxu1 }
 0x9bc   :  { %6377 = vst [vmem:[#allocation11 + $0x8] sm:$0xff] %v6291_v8  ;;  %v6312_v44 = vadd.f32 %v6311_v46, %v6252_v27  ;;  %v6331_v1 = vadd.f32 %v6330_v51, %v6253_v18 }
 0x9be   :  { %6384 = vst [vmem:[#allocation11 + $0x40] sm:$0xff] %v6312_v44 }
 0x9bf   :  { %6385 = vst [vmem:[#allocation11 + $0x48] sm:$0xff] %v6331_v1 }
 0x9c0   :  { %v6273_v32 = vpop.f32.mrf.mxu2  ;;  %v6292_v60 = vpop.f32.mrf.mxu3 }
 0x9c1   :  { %v6274_v11 = vadd.f32 %v6273_v32, %v6250_v30  ;;  %v6293_v50 = vadd.f32 %v6292_v60, %v6251_v47 }
 0x9c3   :  { %6382 = vst [vmem:[#allocation11 + $0x30] sm:$0xff] %v6274_v11  ;;  %v6314_v19 = vpop.f32.mrf.mxu0  ;;  %v6333_v45 = vpop.f32.mrf.mxu1 }
 0x9c4   :  { %6383 = vst [vmem:[#allocation11 + $0x38] sm:$0xff] %v6293_v50  ;;  %v6315_v49 = vadd.f32 %v6314_v19, %v6252_v27  ;;  %v6334_v28 = vadd.f32 %v6333_v45, %v6253_v18 }
 0x9c6   :  { %6390 = vst [vmem:[#allocation11 + $0x70] sm:$0xff] %v6315_v49 }
 0x9c7   :  { %6391 = vst [vmem:[#allocation11 + $0x78] sm:$0xff] %v6334_v28 }
 0x9c8   :  { %v6276_v7 = vpop.f32.mrf.mxu2  ;;  %v6295_v10 = vpop.f32.mrf.mxu3 }
 0x9c9   :  { %v6277_v34 = vadd.f32 %v6276_v7, %v6250_v30  ;;  %v6296_v42 = vadd.f32 %v6295_v10, %v6251_v47 }
 0x9cb   :  { %6388 = vst [vmem:[#allocation11 + $0x60] sm:$0xff] %v6277_v34  ;;  %v6316_v41 = vpop.f32.mrf.mxu0  ;;  %v6335_v14 = vpop.f32.mrf.mxu1 }
 0x9cc   :  { %6389 = vst [vmem:[#allocation11 + $0x68] sm:$0xff] %v6296_v42  ;;  %v6317_v0 = vadd.f32 %v6316_v41, %v6252_v27  ;;  %v6336_v52 = vadd.f32 %v6335_v14, %v6253_v18 }
 0x9ce   :  { %6396 = vst [vmem:[#allocation11 + $0xa0] sm:$0xff] %v6317_v0 }
 0x9cf   :  { %6397 = vst [vmem:[#allocation11 + $0xa8] sm:$0xff] %v6336_v52 }
 0x9d0   :  { %v6278_v62 = vpop.f32.mrf.mxu2  ;;  %v6297_v59 = vpop.f32.mrf.mxu3 }
 0x9d1   :  { %v6279_v63 = vadd.f32 %v6278_v62, %v6250_v30  ;;  %v6298_v2 = vadd.f32 %v6297_v59, %v6251_v47 }
 0x9d3   :  { %6394 = vst [vmem:[#allocation11 + $0x90] sm:$0xff] %v6279_v63 }
 0x9d4   :  { %6395 = vst [vmem:[#allocation11 + $0x98] sm:$0xff] %v6298_v2 }
 0x9d8   :  { %v6347_v23 = vpop.f32.mrf.mxu2  ;;  %v6366_v9 = vpop.f32.mrf.mxu3 }
 0x9d9   :  { %v6348_v16 = vadd.f32 %v6347_v23, %v6254_v22  ;;  %v6367_v37 = vadd.f32 %v6366_v9, %v6255_v6 }
 0x9db   :  { %6380 = vst [vmem:[#allocation11 + $0x20] sm:$0xff] %v6348_v16 }
 0x9dc   :  { %6381 = vst [vmem:[#allocation11 + $0x28] sm:$0xff] %v6367_v37 }
 0x9e0   :  { %v6349_v39 = vpop.f32.mrf.mxu2  ;;  %v6368_v26 = vpop.f32.mrf.mxu3 }
 0x9e1   :  { %v6350_v3 = vadd.f32 %v6349_v39, %v6254_v22  ;;  %v6369_v17 = vadd.f32 %v6368_v26, %v6255_v6 }
 0x9e3   :  { %6386 = vst [vmem:[#allocation11 + $0x50] sm:$0xff] %v6350_v3 }
 0x9e4   :  { %6387 = vst [vmem:[#allocation11 + $0x58] sm:$0xff] %v6369_v17 }
 0x9e8   :  { %v6352_v53 = vpop.f32.mrf.mxu2  ;;  %v6371_v25 = vpop.f32.mrf.mxu3 }
 0x9e9   :  { %v6353_v4 = vadd.f32 %v6352_v53, %v6254_v22  ;;  %v6372_v56 = vadd.f32 %v6371_v25, %v6255_v6 }
 0x9eb   :  { %6392 = vst [vmem:[#allocation11 + $0x80] sm:$0xff] %v6353_v4 }
 0x9ec   :  { %6393 = vst [vmem:[#allocation11 + $0x88] sm:$0xff] %v6372_v56 }
 0x9f0   :  { %v6354_v54 = vpop.f32.mrf.mxu2  ;;  %v6373_v33 = vpop.f32.mrf.mxu3 }
 0x9f1   :  { %v6355_v31 = vadd.f32 %v6354_v54, %v6254_v22  ;;  %v6374_v38 = vadd.f32 %v6373_v33, %v6255_v6 }
 0x9f3   :  { %6398 = vst [vmem:[#allocation11 + $0xb0] sm:$0xff] %v6355_v31 }
 0x9f4   :  { %6399 = vst [vmem:[#allocation11 + $0xb8] sm:$0xff] %v6374_v38 }
 0x9f5   :  { %6412 = dma.vmem_to_hbm [thread:$0]  %s6405_s30, 3072, %s6407_s14, [#allocation4], %s9882_s15, %s9882_s15, %s9883_s16  }
 0x9f6   :  { %9867 = dma.done.wait [#allocation4], 3072  }
 0x9f7   :  { %9868 = vsyncadd [#allocation4], 4294964224 }
 0x9f8   :  { %6417 = vsyncpa [#allocation3], 1 }
 0x9f9   :  { %6418 = vsyncpa [#allocation6], 1 }
 0x9fa   :  { %6419 = vsyncpa [#allocation9], 1 }
 0x9fb   :  { %6420 = vsyncpa [#allocation4], 1 }

</bundles_post_ra>
